<compile_context>
chip_gen: v7x
topology: tpu7x:2x2x1
jax: 0.10.0
libtpu: 0.0.40
codegen_flags: <defaults>
</compile_context>

<pallas_src>
import jax
import jax.numpy as jnp
from jax import lax
from jax.experimental import pallas as pl
from jax.experimental.pallas import tpu as pltpu

EPS = 1e-5
EXPANSION = 4
LANE = 128


def _round_up(x, m):
    return (x + m - 1) // m * m


# ------------------------------ kernels ------------------------------------ #

def _stat_rows(h):
    """(8, C) tile: row0 = per-channel sum, row1 = per-channel sum of squares."""
    c = h.shape[1]
    s = jnp.sum(h, axis=0, keepdims=True)
    ss = jnp.sum(h * h, axis=0, keepdims=True)
    return jnp.concatenate([s, ss, jnp.zeros((6, c), jnp.float32)], axis=0)


def _conv1_kernel(x_ref, w1_ref, h1_ref, s1_ref):
    """1x1 conv (row-tile matmul) + BN1 partial-stat accumulation."""
    i = pl.program_id(0)
    h = jnp.dot(x_ref[...].astype(jnp.bfloat16), w1_ref[...],
                preferred_element_type=jnp.float32)
    h1_ref[...] = h

    @pl.when(i == 0)
    def _():
        s1_ref[...] = jnp.zeros_like(s1_ref)

    s1_ref[...] += _stat_rows(h)


def _conv2_kernel(h1_ref, sc1_ref, sh1_ref, w2_ref, h2_ref, s2_ref):
    """BN1+ReLU, then 3x3 conv as 9 shifted matmuls (in-VMEM im2col-free),
    plus BN2 partial-stat accumulation.  One grid step per batch image."""
    n = pl.program_id(0)
    _, H, W, CI = h1_ref.shape
    CO = h2_ref.shape[-1]

    # normalize + relu (f32), then cast once to bf16 for the MXU
    a = jnp.maximum(h1_ref[0] * sc1_ref[...] + sh1_ref[...], 0.0)
    a = a.astype(jnp.bfloat16)

    # spatial zero padding (pad=1) built in VMEM with two concatenates
    zrow = jnp.zeros((1, W, CI), jnp.bfloat16)
    zcol = jnp.zeros((H + 2, 1, CI), jnp.bfloat16)
    ap = jnp.concatenate([zrow, a, zrow], axis=0)        # (H+2, W,   CI)
    ap = jnp.concatenate([zcol, ap, zcol], axis=1)       # (H+2, W+2, CI)

    acc = jnp.zeros((H * W, CO), jnp.float32)
    for dy in range(3):
        for dx in range(3):
            win = ap[dy:dy + H, dx:dx + W, :].reshape(H * W, CI)
            acc = acc + jnp.dot(win, w2_ref[dy * 3 + dx],
                                preferred_element_type=jnp.float32)

    h2_ref[...] = acc.reshape(1, H, W, CO)

    @pl.when(n == 0)
    def _():
        s2_ref[...] = jnp.zeros_like(s2_ref)

    s2_ref[...] += _stat_rows(acc)


def _conv3_kernel(h2_ref, sc2_ref, sh2_ref, w3_ref, h3_ref, s3_ref):
    """BN2+ReLU, then 1x1 conv (row-tile matmul) + BN3 partial-stat accum."""
    i = pl.program_id(0)
    a = jnp.maximum(h2_ref[...] * sc2_ref[...] + sh2_ref[...], 0.0)
    h = jnp.dot(a.astype(jnp.bfloat16), w3_ref[...],
                preferred_element_type=jnp.float32)
    h3_ref[...] = h

    @pl.when(i == 0)
    def _():
        s3_ref[...] = jnp.zeros_like(s3_ref)

    s3_ref[...] += _stat_rows(h)


def _bn3_residual_kernel(h3_ref, res_ref, sc3_ref, sh3_ref, o_ref):
    """BN3 + identity residual + final ReLU.  Fully parallel over row tiles."""
    y = h3_ref[...] * sc3_ref[...] + sh3_ref[...] + res_ref[...]
    o_ref[...] = jnp.maximum(y, 0.0)


# --------------------------- host-side helpers ------------------------------ #

def _bn_scale_shift(stats, gamma, beta, count):
    """Tiny XLA finalize: fold rsqrt(var+eps)*gamma into one per-channel scale."""
    mean = stats[0:1, :] / count
    var = jnp.maximum(stats[1:2, :] / count - mean * mean, 0.0)
    scale = gamma * lax.rsqrt(var + EPS)
    shift = beta - mean * scale
    return scale, shift


def _pick_row_tile(R, requested):
    tr = min(requested, R)
    while tr > 8 and R % tr:
        tr //= 2
    if R % tr:
        tr = R  # fall back: single full-array block
    return tr


# -------------------------------- wrapper ----------------------------------- #

def bottleneck_forward(x_nchw, params, *, row_tile=512):
    N, C, H, W = x_nchw.shape
    P = params["w1"].shape[1]
    CO = P * EXPANSION
    if CO != C:
        # TODO(synk): downsample branch (strided conv1x1 + BN) not implemented;
        # this kernel covers the identity-residual configuration (stride=1).
        raise ValueError("identity residual requires inplanes == planes*expansion")

    Cp = _round_up(C, LANE)
    Pp = _round_up(P, LANE)
    Op = _round_up(CO, LANE)
    R = N * H * W
    tr = _pick_row_tile(R, row_tile)
    n_row_tiles = R // tr
    f32, bf16 = jnp.float32, jnp.bfloat16

    # --- one-time layout / padding prep (small, outside the hot loop) -------
    # TODO(synk): keep NHWC end-to-end if the caller allows; NCHW is kept here
    # only to match the PyTorch module interface.
    x_rows = jnp.transpose(x_nchw, (0, 2, 3, 1)).reshape(R, C).astype(f32)
    x_rows = jnp.pad(x_rows, ((0, 0), (0, Cp - C)))          # lane-dense, also residual

    w1 = jnp.pad(params["w1"], ((0, Cp - C), (0, Pp - P))).astype(bf16)
    w2 = jnp.pad(params["w2"], ((0, 0), (0, 0), (0, Pp - P), (0, Pp - P)))
    w2 = w2.reshape(9, Pp, Pp).astype(bf16)                   # HWIO -> (tap, in, out)
    w3 = jnp.pad(params["w3"], ((0, Pp - P), (0, Op - CO))).astype(bf16)

    def padvec(v, n):
        return jnp.pad(v.astype(f32), ((0, 0), (0, n - v.shape[1])))

    g1, b1 = padvec(params["g1"], Pp), padvec(params["b1"], Pp)
    g2, b2 = padvec(params["g2"], Pp), padvec(params["b2"], Pp)
    g3, b3 = padvec(params["g3"], Op), padvec(params["b3"], Op)

    # --- stage 1: conv1 + BN1 stats ------------------------------------------
    h1, st1 = pl.pallas_call(
        _conv1_kernel,
        grid=(n_row_tiles,),
        in_specs=[pl.BlockSpec((tr, Cp), lambda i: (i, 0)),
                  pl.BlockSpec((Cp, Pp), lambda i: (0, 0))],
        out_specs=[pl.BlockSpec((tr, Pp), lambda i: (i, 0)),
                   pl.BlockSpec((8, Pp), lambda i: (0, 0))],
        out_shape=[jax.ShapeDtypeStruct((R, Pp), f32),
                   jax.ShapeDtypeStruct((8, Pp), f32)],
        compiler_params=pltpu.CompilerParams(dimension_semantics=("arbitrary",)),
    )(x_rows, w1)
    sc1, sh1 = _bn_scale_shift(st1, g1, b1, R)

    # --- stage 2: BN1+ReLU + 3x3 conv + BN2 stats (per-image grid) -----------
    h1_img = h1.reshape(N, H, W, Pp)
    h2, st2 = pl.pallas_call(
        _conv2_kernel,
        grid=(N,),
        in_specs=[pl.BlockSpec((1, H, W, Pp), lambda n: (n, 0, 0, 0)),
                  pl.BlockSpec((1, Pp), lambda n: (0, 0)),
                  pl.BlockSpec((1, Pp), lambda n: (0, 0)),
                  pl.BlockSpec((9, Pp, Pp), lambda n: (0, 0, 0))],
        out_specs=[pl.BlockSpec((1, H, W, Pp), lambda n: (n, 0, 0, 0)),
                   pl.BlockSpec((8, Pp), lambda n: (0, 0))],
        out_shape=[jax.ShapeDtypeStruct((N, H, W, Pp), f32),
                   jax.ShapeDtypeStruct((8, Pp), f32)],
        compiler_params=pltpu.CompilerParams(dimension_semantics=("arbitrary",)),
    )(h1_img, sc1, sh1, w2)
    sc2, sh2 = _bn_scale_shift(st2, g2, b2, R)

    # --- stage 3: BN2+ReLU + conv3 + BN3 stats --------------------------------
    h2_rows = h2.reshape(R, Pp)
    h3, st3 = pl.pallas_call(
        _conv3_kernel,
        grid=(n_row_tiles,),
        in_specs=[pl.BlockSpec((tr, Pp), lambda i: (i, 0)),
                  pl.BlockSpec((1, Pp), lambda i: (0, 0)),
                  pl.BlockSpec((1, Pp), lambda i: (0, 0)),
                  pl.BlockSpec((Pp, Op), lambda i: (0, 0))],
        out_specs=[pl.BlockSpec((tr, Op), lambda i: (i, 0)),
                   pl.BlockSpec((8, Op), lambda i: (0, 0))],
        out_shape=[jax.ShapeDtypeStruct((R, Op), f32),
                   jax.ShapeDtypeStruct((8, Op), f32)],
        compiler_params=pltpu.CompilerParams(dimension_semantics=("arbitrary",)),
    )(h2_rows, sc2, sh2, w3)
    sc3, sh3 = _bn_scale_shift(st3, g3, b3, R)

    # --- stage 4: BN3 + residual + ReLU (fully parallel) ----------------------
    out_rows = pl.pallas_call(
        _bn3_residual_kernel,
        grid=(n_row_tiles,),
        in_specs=[pl.BlockSpec((tr, Op), lambda i: (i, 0)),
                  pl.BlockSpec((tr, Op), lambda i: (i, 0)),
                  pl.BlockSpec((1, Op), lambda i: (0, 0)),
                  pl.BlockSpec((1, Op), lambda i: (0, 0))],
        out_specs=pl.BlockSpec((tr, Op), lambda i: (i, 0)),
        out_shape=jax.ShapeDtypeStruct((R, Op), f32),
        compiler_params=pltpu.CompilerParams(dimension_semantics=("parallel",)),
    )(h3, x_rows, sc3, sh3)

    out = out_rows[:, :CO].reshape(N, H, W, CO)
    return jnp.transpose(out, (0, 3, 1, 2))


# ------------------------- reference (pure JAX, f32) ------------------------- #

def reference_forward(x_nchw, params):
    x = jnp.transpose(x_nchw, (0, 2, 3, 1))  # NHWC

    def conv(h, w, pad):
        return lax.conv_general_dilated(
            h, w, (1, 1), pad,
            dimension_numbers=("NHWC", "HWIO", "NHWC"),
            precision=lax.Precision.HIGHEST)

    def bn(h, g, b):
        mean = jnp.mean(h, axis=(0, 1, 2), keepdims=True)
        var = jnp.mean((h - mean) ** 2, axis=(0, 1, 2), keepdims=True)
        return (h - mean) * lax.rsqrt(var + EPS) * g.reshape(1, 1, 1, -1) + b.reshape(1, 1, 1, -1)

    P = params["w1"].shape[1]
    h = jax.nn.relu(bn(conv(x, params["w1"].reshape(1, 1, -1, P), [(0, 0), (0, 0)]),
                       params["g1"], params["b1"]))
    h = jax.nn.relu(bn(conv(h, params["w2"], [(1, 1), (1, 1)]),
                       params["g2"], params["b2"]))
    y = bn(conv(h, params["w3"].reshape(1, 1, P, EXPANSION * P), [(0, 0), (0, 0)]),
           params["g3"], params["b3"])
    y = jax.nn.relu(y + x)
    return jnp.transpose(y, (0, 3, 1, 2))


# ---------------------------------- main ------------------------------------ #

def init_params(key, inplanes, planes):
    ks = jax.random.split(key, 9)
    w1 = jax.random.normal(ks[0], (inplanes, planes), jnp.float32) / jnp.sqrt(inplanes)
    w2 = jax.random.normal(ks[1], (3, 3, planes, planes), jnp.float32) / jnp.sqrt(9.0 * planes)
    w3 = jax.random.normal(ks[2], (planes, planes * EXPANSION), jnp.float32) / jnp.sqrt(planes)
    g1 = 1.0 + 0.1 * jax.random.normal(ks[3], (1, planes), jnp.float32)
    b1 = 0.1 * jax.random.normal(ks[4], (1, planes), jnp.float32)
    g2 = 1.0 + 0.1 * jax.random.normal(ks[5], (1, planes), jnp.float32)
    b2 = 0.1 * jax.random.normal(ks[6], (1, planes), jnp.float32)
    g3 = 1.0 + 0.1 * jax.random.normal(ks[7], (1, planes * EXPANSION), jnp.float32)
    b3 = 0.1 * jax.random.normal(ks[8], (1, planes * EXPANSION), jnp.float32)
    return dict(w1=w1, w2=w2, w3=w3, g1=g1, b1=b1, g2=g2, b2=b2, g3=g3, b3=b3)


if __name__ == "__main__":
    key = jax.random.PRNGKey(0)
    kx, kp = jax.random.split(key)

    # identity residual config: inplanes == planes*expansion, stride=1
    N, inplanes, planes, H, W = 4, 16, 4, 16, 16
    x = jax.random.normal(kx, (N, inplanes, H, W), jnp.float32)
    params = init_params(kp, inplanes, planes)

    out = jax.jit(bottleneck_forward)(x, params)
    out = jax.block_until_ready(out)

    ref = reference_forward(x, params)
    assert out.shape == (N, planes * EXPANSION, H, W)
    max_err = float(jnp.max(jnp.abs(out - ref)))
    # bf16 MXU inputs (f32 accumulation) per the perf review -> slightly wider tol
    assert jnp.allclose(out, ref, rtol=2e-2, atol=4e-2), f"mismatch vs reference (max err {max_err})"
    print("KERNEL_OK")
</pallas_src>

<mosaic_0001>
module attributes {stable_mosaic.version = 11 : i64} {
  func.func @_conv1_kernel(%arg0: i32, %arg1: memref<512x128xf32, #tpu.memory_space<vmem>>, %arg2: memref<128x128xbf16, #tpu.memory_space<vmem>>, %arg3: memref<512x128xf32, #tpu.memory_space<vmem>>, %arg4: memref<8x128xf32, #tpu.memory_space<vmem>>) attributes {dimension_semantics = [#tpu.dimension_semantics<arbitrary>], iteration_bounds = array<i64: 2>, scalar_prefetch = 0 : i64, scratch_operands = 0 : i64, tpu.core_type = #tpu.core_type<tc>, window_params = [{transform_indices = @transform_0, window_bounds = array<i64: 512, 128>}, {pipeline_mode = #tpu.pipeline_mode<synchronous>, transform_indices = @transform_1, window_bounds = array<i64: 128, 128>}, {transform_indices = @transform_2, window_bounds = array<i64: 512, 128>}, {pipeline_mode = #tpu.pipeline_mode<synchronous>, transform_indices = @transform_3, window_bounds = array<i64: 8, 128>}]} {
    %c0 = arith.constant 0 : index
    %c0_0 = arith.constant 0 : index
    %0 = vector.load %arg1[%c0, %c0_0] : memref<512x128xf32, #tpu.memory_space<vmem>>, vector<512x128xf32>
    %1 = arith.truncf %0 : vector<512x128xf32> to vector<512x128xbf16>
    %c0_1 = arith.constant 0 : index
    %c0_2 = arith.constant 0 : index
    %2 = vector.load %arg2[%c0_1, %c0_2] : memref<128x128xbf16, #tpu.memory_space<vmem>>, vector<128x128xbf16>
    %cst = arith.constant dense<0.000000e+00> : vector<512x128xf32>
    %3 = tpu.matmul %1, %2, %cst {dimension_numbers = #tpu.dot_dimension_numbers<[1], [0], [0], [1], [0, 0, 1, 1], [], []>} : vector<512x128xbf16>, vector<128x128xbf16>, vector<512x128xf32> -> vector<512x128xf32>
    %c0_3 = arith.constant 0 : index
    %c0_4 = arith.constant 0 : index
    %4 = vector.load %arg3[%c0_3, %c0_4] : memref<512x128xf32, #tpu.memory_space<vmem>>, vector<512x128xf32>
    tpu.vector_store %arg3[%c0_3, %c0_4], %3 {strides = array<i32>} : memref<512x128xf32, #tpu.memory_space<vmem>>, vector<512x128xf32>,
    %c0_i32 = arith.constant 0 : i32
    %5 = arith.cmpi eq, %arg0, %c0_i32 : i32
    %6 = arith.extui %5 : i1 to i32
    %c0_i32_5 = arith.constant 0 : i32
    %7 = arith.cmpi ne, %6, %c0_i32_5 : i32
    scf.if %7 {
      %cst_13 = arith.constant 0.000000e+00 : f32
      %18 = vector.broadcast %cst_13 : f32 to vector<8x128xf32>
      %c0_14 = arith.constant 0 : index
      %c0_15 = arith.constant 0 : index
      %19 = vector.load %arg4[%c0_14, %c0_15] : memref<8x128xf32, #tpu.memory_space<vmem>>, vector<8x128xf32>
      tpu.vector_store %arg4[%c0_14, %c0_15], %18 {strides = array<i32>} : memref<8x128xf32, #tpu.memory_space<vmem>>, vector<8x128xf32>,
    } else {
    }
    %c0_6 = arith.constant 0 : index
    %c0_7 = arith.constant 0 : index
    %8 = vector.load %arg4[%c0_6, %c0_7] : memref<8x128xf32, #tpu.memory_space<vmem>>, vector<8x128xf32>
    %cst_8 = arith.constant dense<0.000000e+00> : vector<128xf32>
    %9 = vector.multi_reduction <add>, %3, %cst_8 [0] : vector<512x128xf32> to vector<128xf32>
    %10 = vector.shape_cast %9 : vector<128xf32> to vector<1x128xf32>
    %11 = arith.mulf %3, %3 : vector<512x128xf32>
    %cst_9 = arith.constant dense<0.000000e+00> : vector<128xf32>
    %12 = vector.multi_reduction <add>, %11, %cst_9 [0] : vector<512x128xf32> to vector<128xf32>
    %13 = vector.shape_cast %12 : vector<128xf32> to vector<1x128xf32>
    %cst_10 = arith.constant 0.000000e+00 : f32
    %14 = vector.broadcast %cst_10 : f32 to vector<6x128xf32>
    %15 = tpu.concatenate %10, %13, %14 in 0 : vector<1x128xf32>, vector<1x128xf32>, vector<6x128xf32> -> vector<8x128xf32>
    %16 = arith.addf %8, %15 : vector<8x128xf32>
    %c0_11 = arith.constant 0 : index
    %c0_12 = arith.constant 0 : index
    %17 = vector.load %arg4[%c0_11, %c0_12] : memref<8x128xf32, #tpu.memory_space<vmem>>, vector<8x128xf32>
    tpu.vector_store %arg4[%c0_11, %c0_12], %16 {strides = array<i32>} : memref<8x128xf32, #tpu.memory_space<vmem>>, vector<8x128xf32>,
    return
  }
  func.func @transform_0(%arg0: i32) -> (i32, i32) {
    %c0_i32 = arith.constant 0 : i32
    %c0_i32_0 = arith.constant 0 : i32
    return %arg0, %c0_i32 : i32, i32
  }
  func.func @transform_1(%arg0: i32) -> (i32, i32) {
    %c0_i32 = arith.constant 0 : i32
    %c0_i32_0 = arith.constant 0 : i32
    %c0_i32_1 = arith.constant 0 : i32
    return %c0_i32, %c0_i32_0 : i32, i32
  }
  func.func @transform_2(%arg0: i32) -> (i32, i32) {
    %c0_i32 = arith.constant 0 : i32
    %c0_i32_0 = arith.constant 0 : i32
    return %arg0, %c0_i32 : i32, i32
  }
  func.func @transform_3(%arg0: i32) -> (i32, i32) {
    %c0_i32 = arith.constant 0 : i32
    %c0_i32_0 = arith.constant 0 : i32
    %c0_i32_1 = arith.constant 0 : i32
    return %c0_i32, %c0_i32_0 : i32, i32
  }
}

module attributes {stable_mosaic.version = 11 : i64} {
  func.func @_conv2_kernel(%arg0: i32, %arg1: memref<1x16x16x128xf32, #tpu.memory_space<vmem>>, %arg2: memref<1x128xf32, #tpu.memory_space<vmem>>, %arg3: memref<1x128xf32, #tpu.memory_space<vmem>>, %arg4: memref<9x128x128xbf16, #tpu.memory_space<vmem>>, %arg5: memref<1x16x16x128xf32, #tpu.memory_space<vmem>>, %arg6: memref<8x128xf32, #tpu.memory_space<vmem>>) attributes {dimension_semantics = [#tpu.dimension_semantics<arbitrary>], iteration_bounds = array<i64: 4>, scalar_prefetch = 0 : i64, scratch_operands = 0 : i64, tpu.core_type = #tpu.core_type<tc>, window_params = [{transform_indices = @transform_0, window_bounds = array<i64: 1, 16, 16, 128>}, {pipeline_mode = #tpu.pipeline_mode<synchronous>, transform_indices = @transform_1, window_bounds = array<i64: 1, 128>}, {pipeline_mode = #tpu.pipeline_mode<synchronous>, transform_indices = @transform_2, window_bounds = array<i64: 1, 128>}, {pipeline_mode = #tpu.pipeline_mode<synchronous>, transform_indices = @transform_3, window_bounds = array<i64: 9, 128, 128>}, {transform_indices = @transform_4, window_bounds = array<i64: 1, 16, 16, 128>}, {pipeline_mode = #tpu.pipeline_mode<synchronous>, transform_indices = @transform_5, window_bounds = array<i64: 8, 128>}]} {
    %c0 = arith.constant 0 : index
    %c0_0 = arith.constant 0 : index
    %c0_1 = arith.constant 0 : index
    %c0_2 = arith.constant 0 : index
    %0 = vector.load %arg1[%c0, %c0_0, %c0_1, %c0_2] : memref<1x16x16x128xf32, #tpu.memory_space<vmem>>, vector<1x16x16x128xf32>
    %1 = vector.shape_cast %0 : vector<1x16x16x128xf32> to vector<16x16x128xf32>
    %c0_3 = arith.constant 0 : index
    %c0_4 = arith.constant 0 : index
    %2 = vector.load %arg2[%c0_3, %c0_4] : memref<1x128xf32, #tpu.memory_space<vmem>>, vector<1x128xf32>
    %3 = vector.shape_cast %2 : vector<1x128xf32> to vector<1x1x128xf32>
    %4 = vector.broadcast %3 : vector<1x1x128xf32> to vector<16x16x128xf32>
    %5 = arith.mulf %1, %4 : vector<16x16x128xf32>
    %c0_5 = arith.constant 0 : index
    %c0_6 = arith.constant 0 : index
    %6 = vector.load %arg3[%c0_5, %c0_6] : memref<1x128xf32, #tpu.memory_space<vmem>>, vector<1x128xf32>
    %7 = vector.shape_cast %6 : vector<1x128xf32> to vector<1x1x128xf32>
    %8 = vector.broadcast %7 : vector<1x1x128xf32> to vector<16x16x128xf32>
    %9 = arith.addf %5, %8 : vector<16x16x128xf32>
    %cst = arith.constant 0.000000e+00 : f32
    %10 = vector.broadcast %cst : f32 to vector<16x16x128xf32>
    %11 = arith.maximumf %9, %10 : vector<16x16x128xf32>
    %12 = arith.truncf %11 : vector<16x16x128xf32> to vector<16x16x128xbf16>
    %cst_7 = arith.constant 0.000000e+00 : bf16
    %13 = vector.broadcast %cst_7 : bf16 to vector<1x16x128xbf16>
    %cst_8 = arith.constant 0.000000e+00 : bf16
    %14 = vector.broadcast %cst_8 : bf16 to vector<18x1x128xbf16>
    %15 = tpu.concatenate %13, %12, %13 in 0 : vector<1x16x128xbf16>, vector<16x16x128xbf16>, vector<1x16x128xbf16> -> vector<18x16x128xbf16>
    %16 = tpu.concatenate %14, %15, %14 in 1 : vector<18x1x128xbf16>, vector<18x16x128xbf16>, vector<18x1x128xbf16> -> vector<18x18x128xbf16>
    %cst_9 = arith.constant 0.000000e+00 : f32
    %17 = vector.broadcast %cst_9 : f32 to vector<256x128xf32>
    %18 = vector.extract_strided_slice %16 {offsets = [0, 0, 0], sizes = [16, 16, 128], strides = [1, 1, 1]} : vector<18x18x128xbf16> to vector<16x16x128xbf16>
    %19 = vector.shape_cast %18 : vector<16x16x128xbf16> to vector<256x128xbf16>
    %c0_10 = arith.constant 0 : index
    %c0_11 = arith.constant 0 : index
    %c0_12 = arith.constant 0 : index
    %20 = vector.load %arg4[%c0_10, %c0_11, %c0_12] : memref<9x128x128xbf16, #tpu.memory_space<vmem>>, vector<1x128x128xbf16>
    %21 = vector.shape_cast %20 : vector<1x128x128xbf16> to vector<128x128xbf16>
    %cst_13 = arith.constant dense<0.000000e+00> : vector<256x128xf32>
    %22 = tpu.matmul %19, %21, %cst_13 {dimension_numbers = #tpu.dot_dimension_numbers<[1], [0], [0], [1], [0, 0, 1, 1], [], []>} : vector<256x128xbf16>, vector<128x128xbf16>, vector<256x128xf32> -> vector<256x128xf32>
    %23 = arith.addf %17, %22 : vector<256x128xf32>
    %24 = vector.extract_strided_slice %16 {offsets = [0, 1, 0], sizes = [16, 16, 128], strides = [1, 1, 1]} : vector<18x18x128xbf16> to vector<16x16x128xbf16>
    %25 = vector.shape_cast %24 : vector<16x16x128xbf16> to vector<256x128xbf16>
    %c1 = arith.constant 1 : index
    %c0_14 = arith.constant 0 : index
    %c0_15 = arith.constant 0 : index
    %26 = vector.load %arg4[%c1, %c0_14, %c0_15] : memref<9x128x128xbf16, #tpu.memory_space<vmem>>, vector<1x128x128xbf16>
    %27 = vector.shape_cast %26 : vector<1x128x128xbf16> to vector<128x128xbf16>
    %cst_16 = arith.constant dense<0.000000e+00> : vector<256x128xf32>
    %28 = tpu.matmul %25, %27, %cst_16 {dimension_numbers = #tpu.dot_dimension_numbers<[1], [0], [0], [1], [0, 0, 1, 1], [], []>} : vector<256x128xbf16>, vector<128x128xbf16>, vector<256x128xf32> -> vector<256x128xf32>
    %29 = arith.addf %23, %28 : vector<256x128xf32>
    %30 = vector.extract_strided_slice %16 {offsets = [0, 2, 0], sizes = [16, 16, 128], strides = [1, 1, 1]} : vector<18x18x128xbf16> to vector<16x16x128xbf16>
    %31 = vector.shape_cast %30 : vector<16x16x128xbf16> to vector<256x128xbf16>
    %c2 = arith.constant 2 : index
    %c0_17 = arith.constant 0 : index
    %c0_18 = arith.constant 0 : index
    %32 = vector.load %arg4[%c2, %c0_17, %c0_18] : memref<9x128x128xbf16, #tpu.memory_space<vmem>>, vector<1x128x128xbf16>
    %33 = vector.shape_cast %32 : vector<1x128x128xbf16> to vector<128x128xbf16>
    %cst_19 = arith.constant dense<0.000000e+00> : vector<256x128xf32>
    %34 = tpu.matmul %31, %33, %cst_19 {dimension_numbers = #tpu.dot_dimension_numbers<[1], [0], [0], [1], [0, 0, 1, 1], [], []>} : vector<256x128xbf16>, vector<128x128xbf16>, vector<256x128xf32> -> vector<256x128xf32>
    %35 = arith.addf %29, %34 : vector<256x128xf32>
    %36 = vector.extract_strided_slice %16 {offsets = [1, 0, 0], sizes = [16, 16, 128], strides = [1, 1, 1]} : vector<18x18x128xbf16> to vector<16x16x128xbf16>
    %37 = vector.shape_cast %36 : vector<16x16x128xbf16> to vector<256x128xbf16>
    %c3 = arith.constant 3 : index
    %c0_20 = arith.constant 0 : index
    %c0_21 = arith.constant 0 : index
    %38 = vector.load %arg4[%c3, %c0_20, %c0_21] : memref<9x128x128xbf16, #tpu.memory_space<vmem>>, vector<1x128x128xbf16>
    %39 = vector.shape_cast %38 : vector<1x128x128xbf16> to vector<128x128xbf16>
    %cst_22 = arith.constant dense<0.000000e+00> : vector<256x128xf32>
    %40 = tpu.matmul %37, %39, %cst_22 {dimension_numbers = #tpu.dot_dimension_numbers<[1], [0], [0], [1], [0, 0, 1, 1], [], []>} : vector<256x128xbf16>, vector<128x128xbf16>, vector<256x128xf32> -> vector<256x128xf32>
    %41 = arith.addf %35, %40 : vector<256x128xf32>
    %42 = vector.extract_strided_slice %16 {offsets = [1, 1, 0], sizes = [16, 16, 128], strides = [1, 1, 1]} : vector<18x18x128xbf16> to vector<16x16x128xbf16>
    %43 = vector.shape_cast %42 : vector<16x16x128xbf16> to vector<256x128xbf16>
    %c4 = arith.constant 4 : index
    %c0_23 = arith.constant 0 : index
    %c0_24 = arith.constant 0 : index
    %44 = vector.load %arg4[%c4, %c0_23, %c0_24] : memref<9x128x128xbf16, #tpu.memory_space<vmem>>, vector<1x128x128xbf16>
    %45 = vector.shape_cast %44 : vector<1x128x128xbf16> to vector<128x128xbf16>
    %cst_25 = arith.constant dense<0.000000e+00> : vector<256x128xf32>
    %46 = tpu.matmul %43, %45, %cst_25 {dimension_numbers = #tpu.dot_dimension_numbers<[1], [0], [0], [1], [0, 0, 1, 1], [], []>} : vector<256x128xbf16>, vector<128x128xbf16>, vector<256x128xf32> -> vector<256x128xf32>
    %47 = arith.addf %41, %46 : vector<256x128xf32>
    %48 = vector.extract_strided_slice %16 {offsets = [1, 2, 0], sizes = [16, 16, 128], strides = [1, 1, 1]} : vector<18x18x128xbf16> to vector<16x16x128xbf16>
    %49 = vector.shape_cast %48 : vector<16x16x128xbf16> to vector<256x128xbf16>
    %c5 = arith.constant 5 : index
    %c0_26 = arith.constant 0 : index
    %c0_27 = arith.constant 0 : index
    %50 = vector.load %arg4[%c5, %c0_26, %c0_27] : memref<9x128x128xbf16, #tpu.memory_space<vmem>>, vector<1x128x128xbf16>
    %51 = vector.shape_cast %50 : vector<1x128x128xbf16> to vector<128x128xbf16>
    %cst_28 = arith.constant dense<0.000000e+00> : vector<256x128xf32>
    %52 = tpu.matmul %49, %51, %cst_28 {dimension_numbers = #tpu.dot_dimension_numbers<[1], [0], [0], [1], [0, 0, 1, 1], [], []>} : vector<256x128xbf16>, vector<128x128xbf16>, vector<256x128xf32> -> vector<256x128xf32>
    %53 = arith.addf %47, %52 : vector<256x128xf32>
    %54 = vector.extract_strided_slice %16 {offsets = [2, 0, 0], sizes = [16, 16, 128], strides = [1, 1, 1]} : vector<18x18x128xbf16> to vector<16x16x128xbf16>
    %55 = vector.shape_cast %54 : vector<16x16x128xbf16> to vector<256x128xbf16>
    %c6 = arith.constant 6 : index
    %c0_29 = arith.constant 0 : index
    %c0_30 = arith.constant 0 : index
    %56 = vector.load %arg4[%c6, %c0_29, %c0_30] : memref<9x128x128xbf16, #tpu.memory_space<vmem>>, vector<1x128x128xbf16>
    %57 = vector.shape_cast %56 : vector<1x128x128xbf16> to vector<128x128xbf16>
    %cst_31 = arith.constant dense<0.000000e+00> : vector<256x128xf32>
    %58 = tpu.matmul %55, %57, %cst_31 {dimension_numbers = #tpu.dot_dimension_numbers<[1], [0], [0], [1], [0, 0, 1, 1], [], []>} : vector<256x128xbf16>, vector<128x128xbf16>, vector<256x128xf32> -> vector<256x128xf32>
    %59 = arith.addf %53, %58 : vector<256x128xf32>
    %60 = vector.extract_strided_slice %16 {offsets = [2, 1, 0], sizes = [16, 16, 128], strides = [1, 1, 1]} : vector<18x18x128xbf16> to vector<16x16x128xbf16>
    %61 = vector.shape_cast %60 : vector<16x16x128xbf16> to vector<256x128xbf16>
    %c7 = arith.constant 7 : index
    %c0_32 = arith.constant 0 : index
    %c0_33 = arith.constant 0 : index
    %62 = vector.load %arg4[%c7, %c0_32, %c0_33] : memref<9x128x128xbf16, #tpu.memory_space<vmem>>, vector<1x128x128xbf16>
    %63 = vector.shape_cast %62 : vector<1x128x128xbf16> to vector<128x128xbf16>
    %cst_34 = arith.constant dense<0.000000e+00> : vector<256x128xf32>
    %64 = tpu.matmul %61, %63, %cst_34 {dimension_numbers = #tpu.dot_dimension_numbers<[1], [0], [0], [1], [0, 0, 1, 1], [], []>} : vector<256x128xbf16>, vector<128x128xbf16>, vector<256x128xf32> -> vector<256x128xf32>
    %65 = arith.addf %59, %64 : vector<256x128xf32>
    %66 = vector.extract_strided_slice %16 {offsets = [2, 2, 0], sizes = [16, 16, 128], strides = [1, 1, 1]} : vector<18x18x128xbf16> to vector<16x16x128xbf16>
    %67 = vector.shape_cast %66 : vector<16x16x128xbf16> to vector<256x128xbf16>
    %c8 = arith.constant 8 : index
    %c0_35 = arith.constant 0 : index
    %c0_36 = arith.constant 0 : index
    %68 = vector.load %arg4[%c8, %c0_35, %c0_36] : memref<9x128x128xbf16, #tpu.memory_space<vmem>>, vector<1x128x128xbf16>
    %69 = vector.shape_cast %68 : vector<1x128x128xbf16> to vector<128x128xbf16>
    %cst_37 = arith.constant dense<0.000000e+00> : vector<256x128xf32>
    %70 = tpu.matmul %67, %69, %cst_37 {dimension_numbers = #tpu.dot_dimension_numbers<[1], [0], [0], [1], [0, 0, 1, 1], [], []>} : vector<256x128xbf16>, vector<128x128xbf16>, vector<256x128xf32> -> vector<256x128xf32>
    %71 = arith.addf %65, %70 : vector<256x128xf32>
    %72 = vector.shape_cast %71 : vector<256x128xf32> to vector<1x16x16x128xf32>
    %c0_38 = arith.constant 0 : index
    %c0_39 = arith.constant 0 : index
    %c0_40 = arith.constant 0 : index
    %c0_41 = arith.constant 0 : index
    %73 = vector.load %arg5[%c0_38, %c0_39, %c0_40, %c0_41] : memref<1x16x16x128xf32, #tpu.memory_space<vmem>>, vector<1x16x16x128xf32>
    tpu.vector_store %arg5[%c0_38, %c0_39, %c0_40, %c0_41], %72 {strides = array<i32>} : memref<1x16x16x128xf32, #tpu.memory_space<vmem>>, vector<1x16x16x128xf32>,
    %c0_i32 = arith.constant 0 : i32
    %74 = arith.cmpi eq, %arg0, %c0_i32 : i32
    %75 = arith.extui %74 : i1 to i32
    %c0_i32_42 = arith.constant 0 : i32
    %76 = arith.cmpi ne, %75, %c0_i32_42 : i32
    scf.if %76 {
      %cst_50 = arith.constant 0.000000e+00 : f32
      %87 = vector.broadcast %cst_50 : f32 to vector<8x128xf32>
      %c0_51 = arith.constant 0 : index
      %c0_52 = arith.constant 0 : index
      %88 = vector.load %arg6[%c0_51, %c0_52] : memref<8x128xf32, #tpu.memory_space<vmem>>, vector<8x128xf32>
      tpu.vector_store %arg6[%c0_51, %c0_52], %87 {strides = array<i32>} : memref<8x128xf32, #tpu.memory_space<vmem>>, vector<8x128xf32>,
    } else {
    }
    %c0_43 = arith.constant 0 : index
    %c0_44 = arith.constant 0 : index
    %77 = vector.load %arg6[%c0_43, %c0_44] : memref<8x128xf32, #tpu.memory_space<vmem>>, vector<8x128xf32>
    %cst_45 = arith.constant dense<0.000000e+00> : vector<128xf32>
    %78 = vector.multi_reduction <add>, %71, %cst_45 [0] : vector<256x128xf32> to vector<128xf32>
    %79 = vector.shape_cast %78 : vector<128xf32> to vector<1x128xf32>
    %80 = arith.mulf %71, %71 : vector<256x128xf32>
    %cst_46 = arith.constant dense<0.000000e+00> : vector<128xf32>
    %81 = vector.multi_reduction <add>, %80, %cst_46 [0] : vector<256x128xf32> to vector<128xf32>
    %82 = vector.shape_cast %81 : vector<128xf32> to vector<1x128xf32>
    %cst_47 = arith.constant 0.000000e+00 : f32
    %83 = vector.broadcast %cst_47 : f32 to vector<6x128xf32>
    %84 = tpu.concatenate %79, %82, %83 in 0 : vector<1x128xf32>, vector<1x128xf32>, vector<6x128xf32> -> vector<8x128xf32>
    %85 = arith.addf %77, %84 : vector<8x128xf32>
    %c0_48 = arith.constant 0 : index
    %c0_49 = arith.constant 0 : index
    %86 = vector.load %arg6[%c0_48, %c0_49] : memref<8x128xf32, #tpu.memory_space<vmem>>, vector<8x128xf32>
    tpu.vector_store %arg6[%c0_48, %c0_49], %85 {strides = array<i32>} : memref<8x128xf32, #tpu.memory_space<vmem>>, vector<8x128xf32>,
    return
  }
  func.func @transform_0(%arg0: i32) -> (i32, i32, i32, i32) {
    %c0_i32 = arith.constant 0 : i32
    %c0_i32_0 = arith.constant 0 : i32
    %c0_i32_1 = arith.constant 0 : i32
    %c0_i32_2 = arith.constant 0 : i32
    return %arg0, %c0_i32, %c0_i32_0, %c0_i32_1 : i32, i32, i32, i32
  }
  func.func @transform_1(%arg0: i32) -> (i32, i32) {
    %c0_i32 = arith.constant 0 : i32
    %c0_i32_0 = arith.constant 0 : i32
    %c0_i32_1 = arith.constant 0 : i32
    return %c0_i32, %c0_i32_0 : i32, i32
  }
  func.func @transform_2(%arg0: i32) -> (i32, i32) {
    %c0_i32 = arith.constant 0 : i32
    %c0_i32_0 = arith.constant 0 : i32
    %c0_i32_1 = arith.constant 0 : i32
    return %c0_i32, %c0_i32_0 : i32, i32
  }
  func.func @transform_3(%arg0: i32) -> (i32, i32, i32) {
    %c0_i32 = arith.constant 0 : i32
    %c0_i32_0 = arith.constant 0 : i32
    %c0_i32_1 = arith.constant 0 : i32
    %c0_i32_2 = arith.constant 0 : i32
    return %c0_i32, %c0_i32_0, %c0_i32_1 : i32, i32, i32
  }
  func.func @transform_4(%arg0: i32) -> (i32, i32, i32, i32) {
    %c0_i32 = arith.constant 0 : i32
    %c0_i32_0 = arith.constant 0 : i32
    %c0_i32_1 = arith.constant 0 : i32
    %c0_i32_2 = arith.constant 0 : i32
    return %arg0, %c0_i32, %c0_i32_0, %c0_i32_1 : i32, i32, i32, i32
  }
  func.func @transform_5(%arg0: i32) -> (i32, i32) {
    %c0_i32 = arith.constant 0 : i32
    %c0_i32_0 = arith.constant 0 : i32
    %c0_i32_1 = arith.constant 0 : i32
    return %c0_i32, %c0_i32_0 : i32, i32
  }
}

module attributes {stable_mosaic.version = 11 : i64} {
  func.func @_conv3_kernel(%arg0: i32, %arg1: memref<512x128xf32, #tpu.memory_space<vmem>>, %arg2: memref<1x128xf32, #tpu.memory_space<vmem>>, %arg3: memref<1x128xf32, #tpu.memory_space<vmem>>, %arg4: memref<128x128xbf16, #tpu.memory_space<vmem>>, %arg5: memref<512x128xf32, #tpu.memory_space<vmem>>, %arg6: memref<8x128xf32, #tpu.memory_space<vmem>>) attributes {dimension_semantics = [#tpu.dimension_semantics<arbitrary>], iteration_bounds = array<i64: 2>, scalar_prefetch = 0 : i64, scratch_operands = 0 : i64, tpu.core_type = #tpu.core_type<tc>, window_params = [{transform_indices = @transform_0, window_bounds = array<i64: 512, 128>}, {pipeline_mode = #tpu.pipeline_mode<synchronous>, transform_indices = @transform_1, window_bounds = array<i64: 1, 128>}, {pipeline_mode = #tpu.pipeline_mode<synchronous>, transform_indices = @transform_2, window_bounds = array<i64: 1, 128>}, {pipeline_mode = #tpu.pipeline_mode<synchronous>, transform_indices = @transform_3, window_bounds = array<i64: 128, 128>}, {transform_indices = @transform_4, window_bounds = array<i64: 512, 128>}, {pipeline_mode = #tpu.pipeline_mode<synchronous>, transform_indices = @transform_5, window_bounds = array<i64: 8, 128>}]} {
    %c0 = arith.constant 0 : index
    %c0_0 = arith.constant 0 : index
    %0 = vector.load %arg1[%c0, %c0_0] : memref<512x128xf32, #tpu.memory_space<vmem>>, vector<512x128xf32>
    %c0_1 = arith.constant 0 : index
    %c0_2 = arith.constant 0 : index
    %1 = vector.load %arg2[%c0_1, %c0_2] : memref<1x128xf32, #tpu.memory_space<vmem>>, vector<1x128xf32>
    %2 = vector.broadcast %1 : vector<1x128xf32> to vector<512x128xf32>
    %3 = arith.mulf %0, %2 : vector<512x128xf32>
    %c0_3 = arith.constant 0 : index
    %c0_4 = arith.constant 0 : index
    %4 = vector.load %arg3[%c0_3, %c0_4] : memref<1x128xf32, #tpu.memory_space<vmem>>, vector<1x128xf32>
    %5 = vector.broadcast %4 : vector<1x128xf32> to vector<512x128xf32>
    %6 = arith.addf %3, %5 : vector<512x128xf32>
    %cst = arith.constant 0.000000e+00 : f32
    %7 = vector.broadcast %cst : f32 to vector<512x128xf32>
    %8 = arith.maximumf %6, %7 : vector<512x128xf32>
    %9 = arith.truncf %8 : vector<512x128xf32> to vector<512x128xbf16>
    %c0_5 = arith.constant 0 : index
    %c0_6 = arith.constant 0 : index
    %10 = vector.load %arg4[%c0_5, %c0_6] : memref<128x128xbf16, #tpu.memory_space<vmem>>, vector<128x128xbf16>
    %cst_7 = arith.constant dense<0.000000e+00> : vector<512x128xf32>
    %11 = tpu.matmul %9, %10, %cst_7 {dimension_numbers = #tpu.dot_dimension_numbers<[1], [0], [0], [1], [0, 0, 1, 1], [], []>} : vector<512x128xbf16>, vector<128x128xbf16>, vector<512x128xf32> -> vector<512x128xf32>
    %c0_8 = arith.constant 0 : index
    %c0_9 = arith.constant 0 : index
    %12 = vector.load %arg5[%c0_8, %c0_9] : memref<512x128xf32, #tpu.memory_space<vmem>>, vector<512x128xf32>
    tpu.vector_store %arg5[%c0_8, %c0_9], %11 {strides = array<i32>} : memref<512x128xf32, #tpu.memory_space<vmem>>, vector<512x128xf32>,
    %c0_i32 = arith.constant 0 : i32
    %13 = arith.cmpi eq, %arg0, %c0_i32 : i32
    %14 = arith.extui %13 : i1 to i32
    %c0_i32_10 = arith.constant 0 : i32
    %15 = arith.cmpi ne, %14, %c0_i32_10 : i32
    scf.if %15 {
      %cst_18 = arith.constant 0.000000e+00 : f32
      %26 = vector.broadcast %cst_18 : f32 to vector<8x128xf32>
      %c0_19 = arith.constant 0 : index
      %c0_20 = arith.constant 0 : index
      %27 = vector.load %arg6[%c0_19, %c0_20] : memref<8x128xf32, #tpu.memory_space<vmem>>, vector<8x128xf32>
      tpu.vector_store %arg6[%c0_19, %c0_20], %26 {strides = array<i32>} : memref<8x128xf32, #tpu.memory_space<vmem>>, vector<8x128xf32>,
    } else {
    }
    %c0_11 = arith.constant 0 : index
    %c0_12 = arith.constant 0 : index
    %16 = vector.load %arg6[%c0_11, %c0_12] : memref<8x128xf32, #tpu.memory_space<vmem>>, vector<8x128xf32>
    %cst_13 = arith.constant dense<0.000000e+00> : vector<128xf32>
    %17 = vector.multi_reduction <add>, %11, %cst_13 [0] : vector<512x128xf32> to vector<128xf32>
    %18 = vector.shape_cast %17 : vector<128xf32> to vector<1x128xf32>
    %19 = arith.mulf %11, %11 : vector<512x128xf32>
    %cst_14 = arith.constant dense<0.000000e+00> : vector<128xf32>
    %20 = vector.multi_reduction <add>, %19, %cst_14 [0] : vector<512x128xf32> to vector<128xf32>
    %21 = vector.shape_cast %20 : vector<128xf32> to vector<1x128xf32>
    %cst_15 = arith.constant 0.000000e+00 : f32
    %22 = vector.broadcast %cst_15 : f32 to vector<6x128xf32>
    %23 = tpu.concatenate %18, %21, %22 in 0 : vector<1x128xf32>, vector<1x128xf32>, vector<6x128xf32> -> vector<8x128xf32>
    %24 = arith.addf %16, %23 : vector<8x128xf32>
    %c0_16 = arith.constant 0 : index
    %c0_17 = arith.constant 0 : index
    %25 = vector.load %arg6[%c0_16, %c0_17] : memref<8x128xf32, #tpu.memory_space<vmem>>, vector<8x128xf32>
    tpu.vector_store %arg6[%c0_16, %c0_17], %24 {strides = array<i32>} : memref<8x128xf32, #tpu.memory_space<vmem>>, vector<8x128xf32>,
    return
  }
  func.func @transform_0(%arg0: i32) -> (i32, i32) {
    %c0_i32 = arith.constant 0 : i32
    %c0_i32_0 = arith.constant 0 : i32
    return %arg0, %c0_i32 : i32, i32
  }
  func.func @transform_1(%arg0: i32) -> (i32, i32) {
    %c0_i32 = arith.constant 0 : i32
    %c0_i32_0 = arith.constant 0 : i32
    %c0_i32_1 = arith.constant 0 : i32
    return %c0_i32, %c0_i32_0 : i32, i32
  }
  func.func @transform_2(%arg0: i32) -> (i32, i32) {
    %c0_i32 = arith.constant 0 : i32
    %c0_i32_0 = arith.constant 0 : i32
    %c0_i32_1 = arith.constant 0 : i32
    return %c0_i32, %c0_i32_0 : i32, i32
  }
  func.func @transform_3(%arg0: i32) -> (i32, i32) {
    %c0_i32 = arith.constant 0 : i32
    %c0_i32_0 = arith.constant 0 : i32
    %c0_i32_1 = arith.constant 0 : i32
    return %c0_i32, %c0_i32_0 : i32, i32
  }
  func.func @transform_4(%arg0: i32) -> (i32, i32) {
    %c0_i32 = arith.constant 0 : i32
    %c0_i32_0 = arith.constant 0 : i32
    return %arg0, %c0_i32 : i32, i32
  }
  func.func @transform_5(%arg0: i32) -> (i32, i32) {
    %c0_i32 = arith.constant 0 : i32
    %c0_i32_0 = arith.constant 0 : i32
    %c0_i32_1 = arith.constant 0 : i32
    return %c0_i32, %c0_i32_0 : i32, i32
  }
}

module attributes {stable_mosaic.version = 11 : i64} {
  func.func @_bn3_residual_kernel(%arg0: i32, %arg1: memref<512x128xf32, #tpu.memory_space<vmem>>, %arg2: memref<512x128xf32, #tpu.memory_space<vmem>>, %arg3: memref<1x128xf32, #tpu.memory_space<vmem>>, %arg4: memref<1x128xf32, #tpu.memory_space<vmem>>, %arg5: memref<512x128xf32, #tpu.memory_space<vmem>>) attributes {dimension_semantics = [#tpu.dimension_semantics<parallel>], iteration_bounds = array<i64: 2>, scalar_prefetch = 0 : i64, scratch_operands = 0 : i64, tpu.core_type = #tpu.core_type<tc>, window_params = [{transform_indices = @transform_0, window_bounds = array<i64: 512, 128>}, {transform_indices = @transform_1, window_bounds = array<i64: 512, 128>}, {pipeline_mode = #tpu.pipeline_mode<synchronous>, transform_indices = @transform_2, window_bounds = array<i64: 1, 128>}, {pipeline_mode = #tpu.pipeline_mode<synchronous>, transform_indices = @transform_3, window_bounds = array<i64: 1, 128>}, {transform_indices = @transform_4, window_bounds = array<i64: 512, 128>}]} {
    %c0 = arith.constant 0 : index
    %c0_0 = arith.constant 0 : index
    %0 = vector.load %arg1[%c0, %c0_0] : memref<512x128xf32, #tpu.memory_space<vmem>>, vector<512x128xf32>
    %c0_1 = arith.constant 0 : index
    %c0_2 = arith.constant 0 : index
    %1 = vector.load %arg3[%c0_1, %c0_2] : memref<1x128xf32, #tpu.memory_space<vmem>>, vector<1x128xf32>
    %2 = vector.broadcast %1 : vector<1x128xf32> to vector<512x128xf32>
    %3 = arith.mulf %0, %2 : vector<512x128xf32>
    %c0_3 = arith.constant 0 : index
    %c0_4 = arith.constant 0 : index
    %4 = vector.load %arg4[%c0_3, %c0_4] : memref<1x128xf32, #tpu.memory_space<vmem>>, vector<1x128xf32>
    %5 = vector.broadcast %4 : vector<1x128xf32> to vector<512x128xf32>
    %6 = arith.addf %3, %5 : vector<512x128xf32>
    %c0_5 = arith.constant 0 : index
    %c0_6 = arith.constant 0 : index
    %7 = vector.load %arg2[%c0_5, %c0_6] : memref<512x128xf32, #tpu.memory_space<vmem>>, vector<512x128xf32>
    %8 = arith.addf %6, %7 : vector<512x128xf32>
    %cst = arith.constant 0.000000e+00 : f32
    %9 = vector.broadcast %cst : f32 to vector<512x128xf32>
    %10 = arith.maximumf %8, %9 : vector<512x128xf32>
    %c0_7 = arith.constant 0 : index
    %c0_8 = arith.constant 0 : index
    %11 = vector.load %arg5[%c0_7, %c0_8] : memref<512x128xf32, #tpu.memory_space<vmem>>, vector<512x128xf32>
    tpu.vector_store %arg5[%c0_7, %c0_8], %10 {strides = array<i32>} : memref<512x128xf32, #tpu.memory_space<vmem>>, vector<512x128xf32>,
    return
  }
  func.func @transform_0(%arg0: i32) -> (i32, i32) {
    %c0_i32 = arith.constant 0 : i32
    %c0_i32_0 = arith.constant 0 : i32
    return %arg0, %c0_i32 : i32, i32
  }
  func.func @transform_1(%arg0: i32) -> (i32, i32) {
    %c0_i32 = arith.constant 0 : i32
    %c0_i32_0 = arith.constant 0 : i32
    return %arg0, %c0_i32 : i32, i32
  }
  func.func @transform_2(%arg0: i32) -> (i32, i32) {
    %c0_i32 = arith.constant 0 : i32
    %c0_i32_0 = arith.constant 0 : i32
    %c0_i32_1 = arith.constant 0 : i32
    return %c0_i32, %c0_i32_0 : i32, i32
  }
  func.func @transform_3(%arg0: i32) -> (i32, i32) {
    %c0_i32 = arith.constant 0 : i32
    %c0_i32_0 = arith.constant 0 : i32
    %c0_i32_1 = arith.constant 0 : i32
    return %c0_i32, %c0_i32_0 : i32, i32
  }
  func.func @transform_4(%arg0: i32) -> (i32, i32) {
    %c0_i32 = arith.constant 0 : i32
    %c0_i32_0 = arith.constant 0 : i32
    return %arg0, %c0_i32 : i32, i32
  }
}

</mosaic_0001>

<bundles_post_ra>
// kernel: bottleneck_forward.4
= control target key start
LH: loop header
LB: loop body
LE: loop exit
PB: predicated region body
PF: predicated region fallthrough
CT: control target
= control target key end

     0   :  { %s1164_s12 = smov 0   ;;  %s1741_s0 = inlined_call_operand.vmem [shape: f32[1024,128], index: 0, kind: input, shape index: {}]   ;;  %s1742_s1 = inlined_call_operand.vmem [shape: bf16[128,128], index: 1, kind: input, shape index: {}]   ;;  %s1743_s2 = inlined_call_operand.vmem [shape: f32[1024,128], index: 2, kind: output, shape index: {0}]   ;;  %s1744_s3 = inlined_call_operand.vmem [shape: f32[8,128], index: 3, kind: output, shape index: {1}]  }
   0x1 LB: > { %s962_s13 = sadd.s32 4294967295, %s1141_s12   ;;  %p966_p0 = scmp.ge.s32.totalorder %s1141_s12, 1  ;;  %s1141_s12 = sphi %s1164_s12, %s14_s12  }
   0x2   : > { %p136_p1 = scmp.lt.s32.totalorder %s1141_s12, 3 }
   0x4   : > { %p137_p2 = pnand %p966_p0, %p136_p1 }
   0x6   : > { %140 = sbr.rel (%p137_p2) target bundleno = 476 (0x1dc), region = 28 }
   0xd   : > { %v1127_v0 = vld [vmem:[%s1742_s1] sm:$0xff]   ;;  %s967_s16 = sshll.u32 %s962_s13, 6  ;;  %v1128_v1 = vld [vmem:[%s1742_s1 + $0x8] sm:$0xff]   ;;  %v1129_v2 = vld [vmem:[%s1742_s1 + $0x10] sm:$0xff]   ;;  %p979_p4 = scmp.ne.s32.totalorder %s962_s13, 0 }
   0xe   : > { %p161_p3 = scmp.lt.s32.totalorder %s967_s16, 127  ;;  %1022 = vmatprep.subr.bf16.mxu0 %v1127_v0  ;;  %1102 = vmatprep.subr.bf16.mxu1 %v1127_v0  ;;  %v1130_v3 = vld [vmem:[%s1742_s1 + $0x18] sm:$0xff]   ;;  %v1131_v10 = vld [vmem:[%s1742_s1 + $0x20] sm:$0xff]   ;;  %v1132_v11 = vld [vmem:[%s1742_s1 + $0x28] sm:$0xff]  }
   0xf   : > { %1023 = vmatpush3.bf16.msra.mxu0 %v1127_v0  ;;  %1110 = vmatpush3.bf16.msra.mxu1 %v1127_v0  ;;  %v1133_v12 = vld [vmem:[%s1742_s1 + $0x30] sm:$0xff]   ;;  %v1134_v13 = vld [vmem:[%s1742_s1 + $0x38] sm:$0xff]  }
  0x10   : > { %s1794_s16 = smov (!%p161_p3, %s967_s16), 127  ;;  %1024 = vmatprep.subr.bf16.mxu0 %v1128_v1  ;;  %1103 = vmatprep.subr.bf16.mxu1 %v1128_v1 }
  0x11   : > { %s968_s21 = sshll.u32 %s1794_s16, 3 }
  0x12   : > { %s1191_s24 = scalar_lea.vmem %s1741_s0, %s968_s21  ;;  %s1277_s10 = scalar_lea.vmem %s1743_s2, %s968_s21 }
  0x13   : > { %1025 = vmatpush3.bf16.msra.mxu0 %v1128_v1  ;;  %1111 = vmatpush3.bf16.msra.mxu1 %v1128_v1  ;;  %v173_v4 = vld [vmem:[%s1191_s24] sm:$0xff]  ;;  %v174_v5 = vld [vmem:[%s1191_s24 + $0x8] sm:$0xff]  ;;  %v175_v14 = vld [vmem:[%s1191_s24 + $0x10] sm:$0xff] }
  0x14   : > { %1026 = vmatprep.subr.bf16.mxu0 %v1129_v2  ;;  %1104 = vmatprep.subr.bf16.mxu1 %v1129_v2  ;;  %v205_v6 = vld [vmem:[%s1191_s24 + $0x100] sm:$0xff]  ;;  %v237_v7 = vpack.c.bf16 %v174_v5, %v173_v4  ;;  %v206_v8 = vld [vmem:[%s1191_s24 + $0x108] sm:$0xff]  ;;  %v176_v15 = vld [vmem:[%s1191_s24 + $0x18] sm:$0xff] }
  0x15   : > { %v253_v9 = vpack.c.bf16 %v206_v8, %v205_v6  ;;  %v207_v16 = vld [vmem:[%s1191_s24 + $0x110] sm:$0xff]  ;;  %v208_v17 = vld [vmem:[%s1191_s24 + $0x118] sm:$0xff]  ;;  %v177_v18 = vld [vmem:[%s1191_s24 + $0x20] sm:$0xff]  ;;  %v238_v22 = vpack.c.bf16 %v176_v15, %v175_v14 }
  0x16   : > { %1038 = vmatprep.mubr.bf16.mxu0 %v237_v7  ;;  %v178_v19 = vld [vmem:[%s1191_s24 + $0x28] sm:$0xff]  ;;  %v209_v20 = vld [vmem:[%s1191_s24 + $0x120] sm:$0xff]  ;;  %v254_v23 = vpack.c.bf16 %v208_v17, %v207_v16  ;;  %v179_v26 = vld [vmem:[%s1191_s24 + $0x30] sm:$0xff] }
  0x17   : > { %1027 = vmatpush3.bf16.msra.mxu0 %v1129_v2  ;;  %1112 = vmatpush3.bf16.msra.mxu1 %v1129_v2  ;;  %v210_v21 = vld [vmem:[%s1191_s24 + $0x128] sm:$0xff]  ;;  %v239_v24 = vpack.c.bf16 %v178_v19, %v177_v18  ;;  %v180_v27 = vld [vmem:[%s1191_s24 + $0x38] sm:$0xff]  ;;  %v211_v28 = vld [vmem:[%s1191_s24 + $0x130] sm:$0xff] }
  0x18   : > { %1028 = vmatprep.subr.bf16.mxu0 %v1130_v3  ;;  %1105 = vmatprep.subr.bf16.mxu1 %v1130_v3  ;;  %v255_v25 = vpack.c.bf16 %v210_v21, %v209_v20  ;;  %v212_v29 = vld [vmem:[%s1191_s24 + $0x138] sm:$0xff]  ;;  %v181_v30 = vld [vmem:[%s1191_s24 + $0x40] sm:$0xff]  ;;  %v182_v31 = vld [vmem:[%s1191_s24 + $0x48] sm:$0xff]  ;;  %v240_v34 = vpack.c.bf16 %v180_v27, %v179_v26 }
  0x19   : > { %1070 = vmatprep.mubr.bf16.mxu1 %v253_v9  ;;  %v213_v32 = vld [vmem:[%s1191_s24 + $0x140] sm:$0xff]  ;;  %v214_v33 = vld [vmem:[%s1191_s24 + $0x148] sm:$0xff]  ;;  %v256_v35 = vpack.c.bf16 %v212_v29, %v211_v28  ;;  %v241_v36 = vpack.c.bf16 %v182_v31, %v181_v30  ;;  %v183_v38 = vld [vmem:[%s1191_s24 + $0x50] sm:$0xff] }
  0x1a   : > { %v257_v37 = vpack.c.bf16 %v214_v33, %v213_v32  ;;  %v184_v39 = vld [vmem:[%s1191_s24 + $0x58] sm:$0xff]  ;;  %v215_v40 = vld [vmem:[%s1191_s24 + $0x150] sm:$0xff]  ;;  %v185_v42 = vld [vmem:[%s1191_s24 + $0x60] sm:$0xff] }
  0x1b   : > { %1029 = vmatpush3.bf16.msra.mxu0 %v1130_v3  ;;  %1113 = vmatpush3.bf16.msra.mxu1 %v1130_v3  ;;  %v216_v41 = vld [vmem:[%s1191_s24 + $0x158] sm:$0xff]  ;;  %v186_v43 = vld [vmem:[%s1191_s24 + $0x68] sm:$0xff]  ;;  %v217_v44 = vld [vmem:[%s1191_s24 + $0x160] sm:$0xff]  ;;  %v242_v46 = vpack.c.bf16 %v184_v39, %v183_v38 }
  0x1c   : > { %1030 = vmatprep.subr.bf16.mxu0 %v1131_v10  ;;  %1106 = vmatprep.subr.bf16.mxu1 %v1131_v10  ;;  %v218_v45 = vld [vmem:[%s1191_s24 + $0x168] sm:$0xff]  ;;  %v258_v47 = vpack.c.bf16 %v216_v41, %v215_v40  ;;  %v243_v48 = vpack.c.bf16 %v186_v43, %v185_v42  ;;  %v187_v50 = vld [vmem:[%s1191_s24 + $0x70] sm:$0xff]  ;;  %v188_v51 = vld [vmem:[%s1191_s24 + $0x78] sm:$0xff] }
  0x1d   : > { %v259_v49 = vpack.c.bf16 %v218_v45, %v217_v44  ;;  %v219_v52 = vld [vmem:[%s1191_s24 + $0x170] sm:$0xff]  ;;  %v220_v53 = vld [vmem:[%s1191_s24 + $0x178] sm:$0xff]  ;;  %v189_v54 = vld [vmem:[%s1191_s24 + $0x80] sm:$0xff]  ;;  %v244_v58 = vpack.c.bf16 %v188_v51, %v187_v50 }
  0x1e   : > { %v190_v55 = vld [vmem:[%s1191_s24 + $0x88] sm:$0xff]  ;;  %v221_v56 = vld [vmem:[%s1191_s24 + $0x180] sm:$0xff]  ;;  %v260_v59 = vpack.c.bf16 %v220_v53, %v219_v52  ;;  %v191_v62 = vld [vmem:[%s1191_s24 + $0x90] sm:$0xff] }
  0x1f   : > { %1031 = vmatpush3.bf16.msra.mxu0 %v1131_v10  ;;  %1114 = vmatpush3.bf16.msra.mxu1 %v1131_v10  ;;  %v222_v57 = vld [vmem:[%s1191_s24 + $0x188] sm:$0xff]  ;;  %v245_v60 = vpack.c.bf16 %v190_v55, %v189_v54  ;;  %v192_v63 = vld [vmem:[%s1191_s24 + $0x98] sm:$0xff]  ;;  %v223_v0 = vld [vmem:[%s1191_s24 + $0x190] sm:$0xff] }
  0x20   : > { %1032 = vmatprep.subr.bf16.mxu0 %v1132_v11  ;;  %1107 = vmatprep.subr.bf16.mxu1 %v1132_v11  ;;  %v261_v61 = vpack.c.bf16 %v222_v57, %v221_v56  ;;  %v224_v1 = vld [vmem:[%s1191_s24 + $0x198] sm:$0xff]  ;;  %v193_v2 = vld [vmem:[%s1191_s24 + $0xa0] sm:$0xff]  ;;  %v194_v3 = vld [vmem:[%s1191_s24 + $0xa8] sm:$0xff]  ;;  %v246_v6 = vpack.c.bf16 %v192_v63, %v191_v62 }
  0x21   : > { %v225_v4 = vld [vmem:[%s1191_s24 + $0x1a0] sm:$0xff]  ;;  %v226_v5 = vld [vmem:[%s1191_s24 + $0x1a8] sm:$0xff]  ;;  %v262_v7 = vpack.c.bf16 %v224_v1, %v223_v0  ;;  %v247_v8 = vpack.c.bf16 %v194_v3, %v193_v2  ;;  %v195_v10 = vld [vmem:[%s1191_s24 + $0xb0] sm:$0xff] }
  0x22   : > { %v263_v9 = vpack.c.bf16 %v226_v5, %v225_v4  ;;  %v197_v14 = vld [vmem:[%s1191_s24 + $0xc0] sm:$0xff]  ;;  %v198_v15 = vld [vmem:[%s1191_s24 + $0xc8] sm:$0xff] }
  0x23   : > { %1033 = vmatpush3.bf16.msra.mxu0 %v1132_v11  ;;  %1115 = vmatpush3.bf16.msra.mxu1 %v1132_v11  ;;  %v196_v11 = vld [vmem:[%s1191_s24 + $0xb8] sm:$0xff]  ;;  %v229_v16 = vld [vmem:[%s1191_s24 + $0x1c0] sm:$0xff]  ;;  %v230_v17 = vld [vmem:[%s1191_s24 + $0x1c8] sm:$0xff]  ;;  %v249_v20 = vpack.c.bf16 %v198_v15, %v197_v14 }
  0x24   : > { %1034 = vmatprep.subr.bf16.mxu0 %v1133_v12  ;;  %1108 = vmatprep.subr.bf16.mxu1 %v1133_v12  ;;  %v248_v18 = vpack.c.bf16 %v196_v11, %v195_v10  ;;  %v265_v21 = vpack.c.bf16 %v230_v17, %v229_v16  ;;  %v201_v26 = vld [vmem:[%s1191_s24 + $0xe0] sm:$0xff]  ;;  %v202_v27 = vld [vmem:[%s1191_s24 + $0xe8] sm:$0xff] }
  0x25   : > { %v233_v28 = vld [vmem:[%s1191_s24 + $0x1e0] sm:$0xff]  ;;  %v234_v29 = vld [vmem:[%s1191_s24 + $0x1e8] sm:$0xff]  ;;  %v251_v32 = vpack.c.bf16 %v202_v27, %v201_v26 }
  0x26   : > { %v267_v33 = vpack.c.bf16 %v234_v29, %v233_v28 }
  0x27   : > { %1035 = vmatpush3.bf16.msra.mxu0 %v1133_v12  ;;  %1116 = vmatpush3.bf16.msra.mxu1 %v1133_v12  ;;  %v227_v12 = vld [vmem:[%s1191_s24 + $0x1b0] sm:$0xff] }
  0x28   : > { %1036 = vmatprep.subr.bf16.mxu0 %v1134_v13  ;;  %1109 = vmatprep.subr.bf16.mxu1 %v1134_v13 }
  0x2b   : > { %1037 = vmatpush3.bf16.msra.mxu0 %v1134_v13  ;;  %1117 = vmatpush3.bf16.msra.mxu1 %v1134_v13  ;;  %v228_v13 = vld [vmem:[%s1191_s24 + $0x1b8] sm:$0xff] }
  0x2c   : > { %v264_v19 = vpack.c.bf16 %v228_v13, %v227_v12 }
  0x2e   : > { %1039 = vmatmul.mubr.bf16.vlgmr.msra.gmra.mrb[0].mxu0 %v238_v22  ;;  %1071 = vmatmul.mubr.bf16.vlgmr.msra.gmra.mrb[0].mxu1 %v254_v23  ;;  %v199_v22 = vld [vmem:[%s1191_s24 + $0xd0] sm:$0xff]  ;;  %v200_v23 = vld [vmem:[%s1191_s24 + $0xd8] sm:$0xff] }
  0x2f   : > { %1042 = vmatprep.mubr.bf16.mxu0 %v239_v24  ;;  %1074 = vmatprep.mubr.bf16.mxu1 %v255_v25  ;;  %v231_v24 = vld [vmem:[%s1191_s24 + $0x1d0] sm:$0xff]  ;;  %v232_v25 = vld [vmem:[%s1191_s24 + $0x1d8] sm:$0xff]  ;;  %v250_v30 = vpack.c.bf16 %v200_v23, %v199_v22 }
  0x30   : > { %v266_v31 = vpack.c.bf16 %v232_v25, %v231_v24 }
  0x36   : > { %1043 = vmatmul.mubr.bf16.gmra.mrb[4].mxu0 %v240_v34  ;;  %1075 = vmatmul.mubr.bf16.gmra.mrb[4].mxu1 %v256_v35  ;;  %v203_v34 = vld [vmem:[%s1191_s24 + $0xf0] sm:$0xff]  ;;  %v204_v35 = vld [vmem:[%s1191_s24 + $0xf8] sm:$0xff] }
  0x37   : > { %1046 = vmatprep.mubr.bf16.mxu0 %v241_v36  ;;  %1078 = vmatprep.mubr.bf16.mxu1 %v257_v37  ;;  %v235_v36 = vld [vmem:[%s1191_s24 + $0x1f0] sm:$0xff]  ;;  %v236_v37 = vld [vmem:[%s1191_s24 + $0x1f8] sm:$0xff]  ;;  %v252_v38 = vpack.c.bf16 %v204_v35, %v203_v34 }
  0x38   : > { %v268_v39 = vpack.c.bf16 %v236_v37, %v235_v36 }
  0x3e   : > { %1047 = vmatmul.mubr.bf16.gmra.mrb[8].mxu0 %v242_v46  ;;  %1079 = vmatmul.mubr.bf16.gmra.mrb[8].mxu1 %v258_v47 }
  0x3f   : > { %1050 = vmatprep.mubr.bf16.mxu0 %v243_v48  ;;  %1082 = vmatprep.mubr.bf16.mxu1 %v259_v49 }
  0x46   : > { %1051 = vmatmul.mubr.bf16.gmra.mrb[12].mxu0 %v244_v58  ;;  %1083 = vmatmul.mubr.bf16.gmra.mrb[12].mxu1 %v260_v59 }
  0x47   : > { %1054 = vmatprep.mubr.bf16.mxu0 %v245_v60  ;;  %1086 = vmatprep.mubr.bf16.mxu1 %v261_v61 }
  0x4e   : > { %1055 = vmatmul.mubr.bf16.gmra.mrb[16].mxu0 %v246_v6  ;;  %1087 = vmatmul.mubr.bf16.gmra.mrb[16].mxu1 %v262_v7 }
  0x4f   : > { %1058 = vmatprep.mubr.bf16.mxu0 %v247_v8  ;;  %1090 = vmatprep.mubr.bf16.mxu1 %v263_v9 }
  0x56   : > { %1059 = vmatmul.mubr.bf16.gmra.mrb[20].mxu0 %v248_v18  ;;  %1091 = vmatmul.mubr.bf16.gmra.mrb[20].mxu1 %v264_v19 }
  0x57   : > { %1062 = vmatprep.mubr.bf16.mxu0 %v249_v20  ;;  %1094 = vmatprep.mubr.bf16.mxu1 %v265_v21 }
  0x5e   : > { %1063 = vmatmul.mubr.bf16.gmra.mrb[24].mxu0 %v250_v30  ;;  %1095 = vmatmul.mubr.bf16.gmra.mrb[24].mxu1 %v266_v31 }
  0x5f   : > { %1066 = vmatprep.mubr.bf16.mxu0 %v251_v32  ;;  %1098 = vmatprep.mubr.bf16.mxu1 %v267_v33 }
  0x66   : > { %1067 = vmatmul.mubr.bf16.gmra.mrb[28].mxu0 %v252_v38  ;;  %1099 = vmatmul.mubr.bf16.gmra.mrb[28].mxu1 %v268_v39 }
 0x101   : > { %v1279_v40 = vpop.f32.mrb[0].mxu0  ;;  %v1281_v41 = vpop.f32.mrb[0].mxu1 }
 0x102   : > { %624 = vst [vmem:[%s1277_s10 + $0x10] sm:$0xff] %v1279_v40  ;;  %656 = vst [vmem:[%s1277_s10 + $0x110] sm:$0xff] %v1281_v41  ;;  %v1287_v42 = vpop.f32.mrb[1].mxu0  ;;  %v1289_v43 = vpop.f32.mrb[1].mxu1 }
 0x103   : > { %622 = vst [vmem:[%s1277_s10] sm:$0xff] %v1287_v42  ;;  %654 = vst [vmem:[%s1277_s10 + $0x100] sm:$0xff] %v1289_v43  ;;  %v1295_v44 = vpop.f32.mrb[2].mxu0  ;;  %v1297_v45 = vpop.f32.mrb[2].mxu1 }
 0x104   : > { %625 = vst [vmem:[%s1277_s10 + $0x18] sm:$0xff] %v1295_v44  ;;  %657 = vst [vmem:[%s1277_s10 + $0x118] sm:$0xff] %v1297_v45  ;;  %v1303_v46 = vpop.f32.mrb[3].mxu0  ;;  %v1305_v47 = vpop.f32.mrb[3].mxu1 }
 0x105   : > { %623 = vst [vmem:[%s1277_s10 + $0x8] sm:$0xff] %v1303_v46  ;;  %655 = vst [vmem:[%s1277_s10 + $0x108] sm:$0xff] %v1305_v47 }
 0x109   : > { %v1311_v48 = vpop.f32.mrb[4].mxu0  ;;  %v1313_v49 = vpop.f32.mrb[4].mxu1 }
 0x10a   : > { %628 = vst [vmem:[%s1277_s10 + $0x30] sm:$0xff] %v1311_v48  ;;  %660 = vst [vmem:[%s1277_s10 + $0x130] sm:$0xff] %v1313_v49  ;;  %v1319_v50 = vpop.f32.mrb[5].mxu0  ;;  %v1321_v51 = vpop.f32.mrb[5].mxu1 }
 0x10b   : > { %626 = vst [vmem:[%s1277_s10 + $0x20] sm:$0xff] %v1319_v50  ;;  %658 = vst [vmem:[%s1277_s10 + $0x120] sm:$0xff] %v1321_v51  ;;  %v1327_v52 = vpop.f32.mrb[6].mxu0  ;;  %v1329_v53 = vpop.f32.mrb[6].mxu1 }
 0x10c   : > { %629 = vst [vmem:[%s1277_s10 + $0x38] sm:$0xff] %v1327_v52  ;;  %661 = vst [vmem:[%s1277_s10 + $0x138] sm:$0xff] %v1329_v53  ;;  %v1335_v54 = vpop.f32.mrb[7].mxu0  ;;  %v1337_v55 = vpop.f32.mrb[7].mxu1 }
 0x10d   : > { %627 = vst [vmem:[%s1277_s10 + $0x28] sm:$0xff] %v1335_v54  ;;  %659 = vst [vmem:[%s1277_s10 + $0x128] sm:$0xff] %v1337_v55 }
 0x111   : > { %v1343_v56 = vpop.f32.mrb[8].mxu0  ;;  %v1345_v57 = vpop.f32.mrb[8].mxu1 }
 0x112   : > { %632 = vst [vmem:[%s1277_s10 + $0x50] sm:$0xff] %v1343_v56  ;;  %664 = vst [vmem:[%s1277_s10 + $0x150] sm:$0xff] %v1345_v57  ;;  %v1351_v58 = vpop.f32.mrb[9].mxu0  ;;  %v1353_v59 = vpop.f32.mrb[9].mxu1 }
 0x113   : > { %630 = vst [vmem:[%s1277_s10 + $0x40] sm:$0xff] %v1351_v58  ;;  %662 = vst [vmem:[%s1277_s10 + $0x140] sm:$0xff] %v1353_v59  ;;  %v1359_v60 = vpop.f32.mrb[10].mxu0  ;;  %v1361_v61 = vpop.f32.mrb[10].mxu1 }
 0x114   : > { %633 = vst [vmem:[%s1277_s10 + $0x58] sm:$0xff] %v1359_v60  ;;  %665 = vst [vmem:[%s1277_s10 + $0x158] sm:$0xff] %v1361_v61  ;;  %v1367_v62 = vpop.f32.mrb[11].mxu0  ;;  %v1369_v63 = vpop.f32.mrb[11].mxu1 }
 0x115   : > { %631 = vst [vmem:[%s1277_s10 + $0x48] sm:$0xff] %v1367_v62  ;;  %663 = vst [vmem:[%s1277_s10 + $0x148] sm:$0xff] %v1369_v63 }
 0x119   : > { %v1375_v0 = vpop.f32.mrb[12].mxu0  ;;  %v1377_v1 = vpop.f32.mrb[12].mxu1 }
 0x11a   : > { %636 = vst [vmem:[%s1277_s10 + $0x70] sm:$0xff] %v1375_v0  ;;  %668 = vst [vmem:[%s1277_s10 + $0x170] sm:$0xff] %v1377_v1  ;;  %v1383_v2 = vpop.f32.mrb[13].mxu0  ;;  %v1385_v3 = vpop.f32.mrb[13].mxu1 }
 0x11b   : > { %634 = vst [vmem:[%s1277_s10 + $0x60] sm:$0xff] %v1383_v2  ;;  %666 = vst [vmem:[%s1277_s10 + $0x160] sm:$0xff] %v1385_v3  ;;  %v1391_v4 = vpop.f32.mrb[14].mxu0  ;;  %v1393_v5 = vpop.f32.mrb[14].mxu1 }
 0x11c   : > { %637 = vst [vmem:[%s1277_s10 + $0x78] sm:$0xff] %v1391_v4  ;;  %669 = vst [vmem:[%s1277_s10 + $0x178] sm:$0xff] %v1393_v5  ;;  %v1399_v6 = vpop.f32.mrb[15].mxu0  ;;  %v1401_v7 = vpop.f32.mrb[15].mxu1 }
 0x11d   : > { %635 = vst [vmem:[%s1277_s10 + $0x68] sm:$0xff] %v1399_v6  ;;  %667 = vst [vmem:[%s1277_s10 + $0x168] sm:$0xff] %v1401_v7 }
 0x121   : > { %v1407_v8 = vpop.f32.mrb[16].mxu0  ;;  %v1409_v9 = vpop.f32.mrb[16].mxu1 }
 0x122   : > { %640 = vst [vmem:[%s1277_s10 + $0x90] sm:$0xff] %v1407_v8  ;;  %672 = vst [vmem:[%s1277_s10 + $0x190] sm:$0xff] %v1409_v9  ;;  %v1415_v10 = vpop.f32.mrb[17].mxu0  ;;  %v1417_v11 = vpop.f32.mrb[17].mxu1 }
 0x123   : > { %638 = vst [vmem:[%s1277_s10 + $0x80] sm:$0xff] %v1415_v10  ;;  %670 = vst [vmem:[%s1277_s10 + $0x180] sm:$0xff] %v1417_v11  ;;  %v1423_v12 = vpop.f32.mrb[18].mxu0  ;;  %v1425_v13 = vpop.f32.mrb[18].mxu1 }
 0x124   : > { %641 = vst [vmem:[%s1277_s10 + $0x98] sm:$0xff] %v1423_v12  ;;  %673 = vst [vmem:[%s1277_s10 + $0x198] sm:$0xff] %v1425_v13  ;;  %v1431_v14 = vpop.f32.mrb[19].mxu0  ;;  %v1433_v15 = vpop.f32.mrb[19].mxu1 }
 0x125   : > { %639 = vst [vmem:[%s1277_s10 + $0x88] sm:$0xff] %v1431_v14  ;;  %671 = vst [vmem:[%s1277_s10 + $0x188] sm:$0xff] %v1433_v15 }
 0x129   : > { %v1439_v16 = vpop.f32.mrb[20].mxu0  ;;  %v1441_v17 = vpop.f32.mrb[20].mxu1 }
 0x12a   : > { %1769 = vst [vmem:[#allocation2_spill] sm:$0xff] %v1441_v17  ;;  %644 = vst [vmem:[%s1277_s10 + $0xb0] sm:$0xff] %v1439_v16  ;;  %v1447_v18 = vpop.f32.mrb[21].mxu0  ;;  %v1449_v19 = vpop.f32.mrb[21].mxu1 }
 0x12b   : > { %676 = vst [vmem:[%s1277_s10 + $0x1b0] sm:$0xff] %v1441_v17  ;;  %1770 = vst [vmem:[#allocation3_spill] sm:$0xff] %v1449_v19  ;;  %v1455_v20 = vpop.f32.mrb[22].mxu0  ;;  %v1457_v21 = vpop.f32.mrb[22].mxu1 }
 0x12c   : > { %642 = vst [vmem:[%s1277_s10 + $0xa0] sm:$0xff] %v1447_v18  ;;  %674 = vst [vmem:[%s1277_s10 + $0x1a0] sm:$0xff] %v1449_v19  ;;  %v1463_v22 = vpop.f32.mrb[23].mxu0  ;;  %v1465_v23 = vpop.f32.mrb[23].mxu1 }
 0x12d   : > { %1771 = vst [vmem:[#allocation4_spill] sm:$0xff] %v1457_v21  ;;  %645 = vst [vmem:[%s1277_s10 + $0xb8] sm:$0xff] %v1455_v20 }
 0x12e   : > { %677 = vst [vmem:[%s1277_s10 + $0x1b8] sm:$0xff] %v1457_v21  ;;  %1772 = vst [vmem:[#allocation5_spill] sm:$0xff] %v1465_v23 }
 0x12f   : > { %643 = vst [vmem:[%s1277_s10 + $0xa8] sm:$0xff] %v1463_v22  ;;  %675 = vst [vmem:[%s1277_s10 + $0x1a8] sm:$0xff] %v1465_v23 }
 0x131   : > { %v1471_v24 = vpop.f32.mrb[24].mxu0  ;;  %v1473_v25 = vpop.f32.mrb[24].mxu1 }
 0x132   : > { %1773 = vst [vmem:[#allocation6_spill] sm:$0xff] %v1473_v25  ;;  %648 = vst [vmem:[%s1277_s10 + $0xd0] sm:$0xff] %v1471_v24  ;;  %v1479_v26 = vpop.f32.mrb[25].mxu0  ;;  %v1481_v27 = vpop.f32.mrb[25].mxu1 }
 0x133   : > { %680 = vst [vmem:[%s1277_s10 + $0x1d0] sm:$0xff] %v1473_v25  ;;  %1774 = vst [vmem:[#allocation7_spill] sm:$0xff] %v1481_v27  ;;  %v1487_v28 = vpop.f32.mrb[26].mxu0  ;;  %v1489_v29 = vpop.f32.mrb[26].mxu1 }
 0x134   : > { %646 = vst [vmem:[%s1277_s10 + $0xc0] sm:$0xff] %v1479_v26  ;;  %678 = vst [vmem:[%s1277_s10 + $0x1c0] sm:$0xff] %v1481_v27  ;;  %v1495_v30 = vpop.f32.mrb[27].mxu0  ;;  %v1497_v31 = vpop.f32.mrb[27].mxu1 }
 0x135   : > { %1775 = vst [vmem:[#allocation8_spill] sm:$0xff] %v1489_v29  ;;  %649 = vst [vmem:[%s1277_s10 + $0xd8] sm:$0xff] %v1487_v28 }
 0x136   : > { %681 = vst [vmem:[%s1277_s10 + $0x1d8] sm:$0xff] %v1489_v29  ;;  %1776 = vst [vmem:[#allocation9_spill] sm:$0xff] %v1497_v31 }
 0x137   : > { %647 = vst [vmem:[%s1277_s10 + $0xc8] sm:$0xff] %v1495_v30  ;;  %679 = vst [vmem:[%s1277_s10 + $0x1c8] sm:$0xff] %v1497_v31 }
 0x139   : > { %v1503_v32 = vpop.f32.mrb[28].mxu0  ;;  %v1505_v33 = vpop.f32.mrb[28].mxu1  ;;  %689 = sbr.rel (%p979_p4) target bundleno = 321 (0x141), region = 32 }
 0x13a   : > { %1777 = vst [vmem:[#allocation10_spill] sm:$0xff] %v1505_v33  ;;  %652 = vst [vmem:[%s1277_s10 + $0xf0] sm:$0xff] %v1503_v32  ;;  %v1511_v34 = vpop.f32.mrb[29].mxu0  ;;  %v1513_v35 = vpop.f32.mrb[29].mxu1 }
 0x13b   : > { %684 = vst [vmem:[%s1277_s10 + $0x1f0] sm:$0xff] %v1505_v33  ;;  %1778 = vst [vmem:[#allocation11_spill] sm:$0xff] %v1513_v35  ;;  %v1519_v36 = vpop.f32.mrb[30].mxu0  ;;  %v1521_v37 = vpop.f32.mrb[30].mxu1  ;;  %v1143_v33 = vmov (!%p979_p4), 0.0  }
 0x13c   : > { %650 = vst [vmem:[%s1277_s10 + $0xe0] sm:$0xff] %v1511_v34  ;;  %682 = vst [vmem:[%s1277_s10 + $0x1e0] sm:$0xff] %v1513_v35  ;;  %v1527_v38 = vpop.f32.mrb[31].mxu0  ;;  %v1529_v39 = vpop.f32.mrb[31].mxu1 }
 0x13d   : > { %1779 = vst [vmem:[#allocation12_spill] sm:$0xff] %v1521_v37  ;;  %653 = vst [vmem:[%s1277_s10 + $0xf8] sm:$0xff] %v1519_v36 }
 0x13e   : > { %685 = vst [vmem:[%s1277_s10 + $0x1f8] sm:$0xff] %v1521_v37  ;;  %1780 = vst [vmem:[#allocation13_spill] sm:$0xff] %v1529_v39 }
 0x13f   : > { %651 = vst [vmem:[%s1277_s10 + $0xe8] sm:$0xff] %v1527_v38  ;;  %683 = vst [vmem:[%s1277_s10 + $0x1e8] sm:$0xff] %v1529_v39 }
 0x140   : > { %690 = vst [vmem:[%s1744_s3] sm:$0xff] %v1143_v33 }
 0x141 PF: > { %v692_v37 = vadd.f32 %v1303_v46, %v1287_v42  ;;  %v761_v33 = vmul.f32 %v1287_v42, %v1287_v42  ;;  %v762_v17 = vmul.f32 %v1303_v46, %v1303_v46  ;;  %v766_v46 = vmul.f32 %v1335_v54, %v1335_v54 }
 0x142   : > { %vm894_vm0 = vcmask 1040384   ;;  %vm896_vm1 = vcmask 1041408  }
 0x143   : > { %v693_v35 = vadd.f32 %v1279_v40, %v692_v37 }
 0x145   : > { %v694_v29 = vadd.f32 %v1295_v44, %v693_v35  ;;  %v763_v35 = vmul.f32 %v1279_v40, %v1279_v40 }
 0x147   : > { %v695_v25 = vadd.f32 %v694_v29, %v1319_v50 }
 0x149   : > { %v696_v39 = vadd.f32 %v695_v25, %v1335_v54  ;;  %v764_v25 = vmul.f32 %v1295_v44, %v1295_v44 }
 0x14b   : > { %v697_v31 = vadd.f32 %v1311_v48, %v696_v39  ;;  %v825_v39 = vadd.f32 %v762_v17, %v761_v33  ;;  %v768_v17 = vmul.f32 %v1327_v52, %v1327_v52 }
 0x14d   : > { %v698_v27 = vadd.f32 %v1327_v52, %v697_v31  ;;  %v826_v42 = vadd.f32 %v825_v39, %v763_v35  ;;  %v769_v35 = vmul.f32 %v1351_v58, %v1351_v58  ;;  %v771_v39 = vmul.f32 %v1343_v56, %v1343_v56 }
 0x14f   : > { %v699_v21 = vadd.f32 %v698_v27, %v1351_v58  ;;  %v765_v27 = vmul.f32 %v1319_v50, %v1319_v50 }
 0x151   : > { %v700_v37 = vadd.f32 %v699_v21, %v1367_v62  ;;  %v827_v21 = vadd.f32 %v826_v42, %v764_v25  ;;  %v773_v42 = vmul.f32 %v1383_v2, %v1383_v2 }
 0x153   : > { %v701_v29 = vadd.f32 %v1343_v56, %v700_v37  ;;  %v767_v37 = vmul.f32 %v1311_v48, %v1311_v48  ;;  %v828_v19 = vadd.f32 %v827_v21, %v765_v27  ;;  %v774_v21 = vmul.f32 %v1399_v6, %v1399_v6 }
 0x155   : > { %v702_v31 = vadd.f32 %v1359_v60, %v701_v29  ;;  %v829_v33 = vadd.f32 %v828_v19, %v766_v46  ;;  %v772_v19 = vmul.f32 %v1359_v60, %v1359_v60 }
 0x157   : > { %v703_v23 = vadd.f32 %v702_v31, %v1383_v2  ;;  %v830_v29 = vadd.f32 %v829_v33, %v767_v37  ;;  %v775_v37 = vmul.f32 %v1375_v0, %v1375_v0 }
 0x159   : > { %v704_v40 = vadd.f32 %v703_v23, %v1399_v6  ;;  %v770_v23 = vmul.f32 %v1367_v62, %v1367_v62  ;;  %v831_v25 = vadd.f32 %v830_v29, %v768_v17  ;;  %v776_v17 = vmul.f32 %v1391_v4, %v1391_v4 }
 0x15a   : > { %v778_v29 = vmul.f32 %v1431_v14, %v1431_v14 }
 0x15b   : > { %v705_v44 = vadd.f32 %v1375_v0, %v704_v40  ;;  %v832_v31 = vadd.f32 %v831_v25, %v769_v35 }
 0x15d   : > { %v706_v50 = vadd.f32 %v1391_v4, %v705_v44  ;;  %v833_v27 = vadd.f32 %v832_v31, %v770_v23  ;;  %v779_v23 = vmul.f32 %v1407_v8, %v1407_v8  ;;  %v781_v31 = vmul.f32 %v1447_v18, %v1447_v18 }
 0x15f   : > { %v707_v54 = vadd.f32 %v706_v50, %v1415_v10  ;;  %v834_v46 = vadd.f32 %v833_v27, %v771_v39  ;;  %v777_v50 = vmul.f32 %v1415_v10, %v1415_v10 }
 0x161   : > { %v708_v48 = vadd.f32 %v707_v54, %v1431_v14  ;;  %v835_v40 = vadd.f32 %v834_v46, %v772_v19  ;;  %v782_v19 = vmul.f32 %v1463_v22, %v1463_v22  ;;  %v784_v46 = vmul.f32 %v1455_v20, %v1455_v20 }
 0x163   : > { %v709_v52 = vadd.f32 %v1407_v8, %v708_v48  ;;  %v836_v44 = vadd.f32 %v835_v40, %v773_v42  ;;  %v780_v48 = vmul.f32 %v1423_v12, %v1423_v12 }
 0x165   : > { %v710_v58 = vadd.f32 %v1423_v12, %v709_v52  ;;  %v837_v33 = vadd.f32 %v836_v44, %v774_v21  ;;  %v785_v21 = vmul.f32 %v1479_v26, %v1479_v26  ;;  %v787_v44 = vmul.f32 %v1471_v24, %v1471_v24 }
 0x167   : > { %v711_v62 = vadd.f32 %v710_v58, %v1447_v18  ;;  %v838_v35 = vadd.f32 %v837_v33, %v775_v37  ;;  %v783_v58 = vmul.f32 %v1439_v16, %v1439_v16 }
 0x169   : > { %v712_v56 = vadd.f32 %v711_v62, %v1463_v22  ;;  %v839_v54 = vadd.f32 %v838_v35, %v776_v17  ;;  %v788_v17 = vmul.f32 %v1487_v28, %v1487_v28  ;;  %v790_v35 = vmul.f32 %v1527_v38, %v1527_v38 }
 0x16b   : > { %v713_v60 = vadd.f32 %v1439_v16, %v712_v56  ;;  %v840_v25 = vadd.f32 %v839_v54, %v777_v50  ;;  %v786_v56 = vmul.f32 %v1495_v30, %v1495_v30 }
 0x16d   : > { %v714_v2 = vadd.f32 %v1455_v20, %v713_v60  ;;  %v841_v39 = vadd.f32 %v840_v25, %v778_v29  ;;  %v791_v29 = vmul.f32 %v1503_v32, %v1503_v32  ;;  %v793_v25 = vmul.f32 %v1289_v43, %v1289_v43 }
 0x16f   : > { %v715_v6 = vadd.f32 %v714_v2, %v1479_v26  ;;  %v842_v52 = vadd.f32 %v841_v39, %v779_v23  ;;  %v789_v2 = vmul.f32 %v1511_v34, %v1511_v34 }
 0x171   : > { %v716_v0 = vadd.f32 %v715_v6, %v1495_v30  ;;  %v843_v27 = vadd.f32 %v842_v52, %v780_v48  ;;  %v794_v48 = vmul.f32 %v1305_v47, %v1305_v47  ;;  %v796_v52 = vmul.f32 %v1297_v45, %v1297_v45 }
 0x173   : > { %v717_v4 = vadd.f32 %v1471_v24, %v716_v0  ;;  %v844_v42 = vadd.f32 %v843_v27, %v781_v31  ;;  %v792_v0 = vmul.f32 %v1519_v36, %v1519_v36 }
 0x175   : > { %v718_v10 = vadd.f32 %v1487_v28, %v717_v4  ;;  %v845_v62 = vadd.f32 %v844_v42, %v782_v19  ;;  %v797_v19 = vmul.f32 %v1321_v51, %v1321_v51  ;;  %v799_v42 = vmul.f32 %v1313_v49, %v1313_v49 }
 0x177   : > { %v719_v14 = vadd.f32 %v718_v10, %v1511_v34  ;;  %v846_v40 = vadd.f32 %v845_v62, %v783_v58  ;;  %v795_v10 = vmul.f32 %v1281_v41, %v1281_v41 }
 0x179   : > { %v720_v8 = vadd.f32 %v719_v14, %v1527_v38  ;;  %v847_v37 = vadd.f32 %v846_v40, %v784_v46  ;;  %v800_v46 = vmul.f32 %v1329_v53, %v1329_v53  ;;  %v802_v40 = vmul.f32 %v1369_v63, %v1369_v63 }
 0x17b   : > { %v721_v12 = vadd.f32 %v1503_v32, %v720_v8  ;;  %v848_v60 = vadd.f32 %v847_v37, %v785_v21  ;;  %v798_v8 = vmul.f32 %v1337_v55, %v1337_v55 }
 0x17d   : > { %v722_v18 = vadd.f32 %v1519_v36, %v721_v12  ;;  %v849_v33 = vadd.f32 %v848_v60, %v786_v56  ;;  %v803_v56 = vmul.f32 %v1345_v57, %v1345_v57  ;;  %v805_v60 = vmul.f32 %v1385_v3, %v1385_v3 }
 0x17f   : > { %v723_v22 = vadd.f32 %v722_v18, %v1289_v43  ;;  %v850_v50 = vadd.f32 %v849_v33, %v787_v44  ;;  %v801_v18 = vmul.f32 %v1353_v59, %v1353_v59  ;;  %v806_v33 = vmul.f32 %v1401_v7, %v1401_v7 }
 0x181   : > { %v724_v16 = vadd.f32 %v723_v22, %v1305_v47  ;;  %v851_v6 = vadd.f32 %v850_v50, %v788_v17  ;;  %v807_v50 = vmul.f32 %v1377_v1, %v1377_v1 }
 0x183   : > { %v725_v20 = vadd.f32 %v1281_v41, %v724_v16  ;;  %v852_v54 = vadd.f32 %v851_v6, %v789_v2  ;;  %v804_v16 = vmul.f32 %v1361_v61, %v1361_v61  ;;  %v808_v6 = vmul.f32 %v1393_v5, %v1393_v5 }
 0x185   : > { %v726_v26 = vadd.f32 %v1297_v45, %v725_v20  ;;  %v853_v23 = vadd.f32 %v852_v54, %v790_v35  ;;  %v809_v54 = vmul.f32 %v1417_v11, %v1417_v11 }
 0x187   : > { %v727_v30 = vadd.f32 %v726_v26, %v1321_v51  ;;  %v854_v4 = vadd.f32 %v853_v23, %v791_v29  ;;  %v810_v23 = vmul.f32 %v1433_v15, %v1433_v15 }
 0x189   : > { %v728_v24 = vadd.f32 %v727_v30, %v1337_v55  ;;  %v855_v39 = vadd.f32 %v854_v4, %v792_v0  ;;  %v811_v4 = vmul.f32 %v1409_v9, %v1409_v9 }
 0x18b   : > { %v729_v28 = vadd.f32 %v1313_v49, %v728_v24  ;;  %v856_v31 = vadd.f32 %v855_v39, %v793_v25  ;;  %v812_v39 = vmul.f32 %v1425_v13, %v1425_v13 }
 0x18d   : > { %v730_v34 = vadd.f32 %v1329_v53, %v729_v28  ;;  %v857_v14 = vadd.f32 %v856_v31, %v794_v48 }
 0x18f   : > { %v731_v38 = vadd.f32 %v730_v34, %v1353_v59  ;;  %v858_v27 = vadd.f32 %v857_v14, %v795_v10 }
 0x191   : > { %v732_v32 = vadd.f32 %v731_v38, %v1369_v63  ;;  %v859_v58 = vadd.f32 %v858_v27, %v796_v52  ;;  %v1781_v63 = vld [vmem:[#allocation3_spill] sm:$0xff] }
 0x192   : > { %v813_v31 = vmul.f32 %v1781_v63, %v1781_v63 }
 0x193   : > { %v733_v36 = vadd.f32 %v1345_v57, %v732_v32  ;;  %v860_v12 = vadd.f32 %v859_v58, %v797_v19  ;;  %v1782_v57 = vld [vmem:[#allocation5_spill] sm:$0xff]  ;;  %v1791_v58 = vld [vmem:[#allocation10_spill] sm:$0xff] }
 0x194   : > { %v814_v14 = vmul.f32 %v1782_v57, %v1782_v57 }
 0x195   : > { %v734_v43 = vadd.f32 %v1361_v61, %v733_v36  ;;  %v861_v62 = vadd.f32 %v860_v12, %v798_v8  ;;  %v1783_v61 = vld [vmem:[#allocation2_spill] sm:$0xff] }
 0x196   : > { %v815_v27 = vmul.f32 %v1783_v61, %v1783_v61 }
 0x197   : > { %v735_v47 = vadd.f32 %v734_v43, %v1385_v3  ;;  %v862_v21 = vadd.f32 %v861_v62, %v799_v42  ;;  %v1784_v3 = vld [vmem:[#allocation4_spill] sm:$0xff] }
 0x198   : > { %v1792_v62 = vld [vmem:[#allocation12_spill] sm:$0xff] }
 0x199   : > { %v736_v41 = vadd.f32 %v735_v47, %v1401_v7  ;;  %v863_v22 = vadd.f32 %v862_v21, %v800_v46  ;;  %v1785_v7 = vld [vmem:[#allocation7_spill] sm:$0xff] }
 0x19a   : > { %v817_v42 = vmul.f32 %v1785_v7, %v1785_v7 }
 0x19b   : > { %v737_v45 = vadd.f32 %v1377_v1, %v736_v41  ;;  %v864_v37 = vadd.f32 %v863_v22, %v801_v18  ;;  %v1786_v1 = vld [vmem:[#allocation9_spill] sm:$0xff] }
 0x19d   : > { %v738_v51 = vadd.f32 %v1393_v5, %v737_v45  ;;  %v865_v44 = vadd.f32 %v864_v37, %v802_v40  ;;  %v1787_v5 = vld [vmem:[#allocation6_spill] sm:$0xff]  ;;  %v818_v45 = vmul.f32 %v1786_v1, %v1786_v1 }
 0x19e   : > { %v819_v18 = vmul.f32 %v1787_v5, %v1787_v5 }
 0x19f   : > { %v739_v55 = vadd.f32 %v738_v51, %v1417_v11  ;;  %v866_v20 = vadd.f32 %v865_v44, %v803_v56  ;;  %v1788_v11 = vld [vmem:[#allocation8_spill] sm:$0xff]  ;;  %v823_v44 = vmul.f32 %v1791_v58, %v1791_v58 }
 0x1a1   : > { %v740_v49 = vadd.f32 %v739_v55, %v1433_v15  ;;  %v867_v26 = vadd.f32 %v866_v20, %v804_v16  ;;  %v1789_v15 = vld [vmem:[#allocation11_spill] sm:$0xff]  ;;  %v820_v55 = vmul.f32 %v1788_v11, %v1788_v11 }
 0x1a3   : > { %v741_v53 = vadd.f32 %v1409_v9, %v740_v49  ;;  %v868_v30 = vadd.f32 %v867_v26, %v805_v60  ;;  %v1790_v9 = vld [vmem:[#allocation13_spill] sm:$0xff]  ;;  %v821_v49 = vmul.f32 %v1789_v15, %v1789_v15  ;;  %v824_v60 = vmul.f32 %v1792_v62, %v1792_v62 }
 0x1a4   : > { %v822_v37 = vmul.f32 %v1790_v9, %v1790_v9 }
 0x1a5   : > { %v742_v59 = vadd.f32 %v1425_v13, %v741_v53  ;;  %v869_v24 = vadd.f32 %v868_v30, %v806_v33  ;;  %v816_v13 = vmul.f32 %v1784_v3, %v1784_v3 }
 0x1a7   : > { %v743_v17 = vadd.f32 %v742_v59, %v1781_v63  ;;  %v870_v28 = vadd.f32 %v869_v24, %v807_v50 }
 0x1a9   : > { %v744_v2 = vadd.f32 %v743_v17, %v1782_v57  ;;  %v871_v34 = vadd.f32 %v870_v28, %v808_v6 }
 0x1ab   : > { %v745_v35 = vadd.f32 %v1783_v61, %v744_v2  ;;  %v872_v38 = vadd.f32 %v871_v34, %v809_v54 }
 0x1ad   : > { %v746_v29 = vadd.f32 %v1784_v3, %v745_v35  ;;  %v873_v32 = vadd.f32 %v872_v38, %v810_v23  ;;  %v691_v3 = vld [vmem:[%s1744_s3] sm:$0xff] }
 0x1af   : > { %v747_v0 = vadd.f32 %v746_v29, %v1785_v7  ;;  %v874_v36 = vadd.f32 %v873_v32, %v811_v4 }
 0x1b1   : > { %v748_v25 = vadd.f32 %v747_v0, %v1786_v1  ;;  %v875_v43 = vadd.f32 %v874_v36, %v812_v39 }
 0x1b3   : > { %v749_v48 = vadd.f32 %v1787_v5, %v748_v25  ;;  %v876_v47 = vadd.f32 %v875_v43, %v813_v31 }
 0x1b5   : > { %v750_v10 = vadd.f32 %v1788_v11, %v749_v48  ;;  %v877_v8 = vadd.f32 %v876_v47, %v814_v14 }
 0x1b7   : > { %v751_v52 = vadd.f32 %v750_v10, %v1789_v15  ;;  %v878_v12 = vadd.f32 %v877_v8, %v815_v27 }
 0x1b9   : > { %v752_v19 = vadd.f32 %v751_v52, %v1790_v9  ;;  %v879_v46 = vadd.f32 %v878_v12, %v816_v13 }
 0x1bb   : > { %v753_v41 = vadd.f32 %v1791_v58, %v752_v19  ;;  %v880_v21 = vadd.f32 %v879_v46, %v817_v42 }
 0x1bd   : > { %v754_v51 = vadd.f32 %v1792_v62, %v753_v41  ;;  %v881_v40 = vadd.f32 %v880_v21, %v818_v45 }
 0x1bf   : > { %v755_v22 = vrot.slane %v754_v51, 4  ;;  %v882_v56 = vadd.f32 %v881_v40, %v819_v18 }
 0x1c1   : > { %v883_v53 = vadd.f32 %v882_v56, %v820_v55  ;;  %v756_v16 = vadd.f32 %v755_v22, %v754_v51 }
 0x1c3   : > { %v884_v59 = vadd.f32 %v883_v53, %v821_v49  ;;  %v757_v63 = vrot.slane %v756_v16, 2 }
 0x1c5   : > { %v885_v20 = vadd.f32 %v884_v59, %v822_v37  ;;  %v758_v26 = vadd.f32 %v757_v63, %v756_v16 }
 0x1c7   : > { %v886_v17 = vadd.f32 %v885_v20, %v823_v44  ;;  %v759_v50 = vrot.slane %v758_v26, 1 }
 0x1c9   : > { %v887_v33 = vadd.f32 %v886_v17, %v824_v60  ;;  %v760_v35 = vadd.f32 %v759_v50, %v758_v26 }
 0x1cb   : > { %v888_v57 = vrot.slane %v887_v33, 4 }
 0x1cd   : > { %v889_v2 = vadd.f32 %v888_v57, %v887_v33 }
 0x1cf   : > { %v890_v30 = vrot.slane %v889_v2, 2 }
 0x1d1   : > { %v891_v61 = vadd.f32 %v890_v30, %v889_v2 }
 0x1d3   : > { %v892_v6 = vrot.slane %v891_v61, 1 }
 0x1d5   : > { %v893_v24 = vadd.f32 %v892_v6, %v891_v61 }
 0x1d7   : > { %v895_v29 = vsel %vm894_vm0, %v760_v35, %v893_v24 }
 0x1d8   : > { %v897_v54 = vsel %vm896_vm1, %v895_v29, 0.0 }
 0x1d9   : > { %v898_v28 = vadd.f32 %v897_v54, %v691_v3 }
 0x1db   : > { %899 = vst [vmem:[%s1744_s3] sm:$0xff] %v898_v28 }
 0x1dc PF: > { %s14_s12 = sadd.s32 1, %s1141_s12  }
 0x1dd   : > { %p11_p5 = scmp.ge.s32.totalorder %s14_s12, 4  }
 0x1df   :  { %13 = sbr.rel (!%p11_p5) target bundleno = 1 (0x1), region = 70 }

// kernel: bottleneck_forward.7
= control target key start
LH: loop header
LB: loop body
LE: loop exit
PB: predicated region body
PF: predicated region fallthrough
CT: control target
= control target key end

     0   :  { %s809_s15 = smov 0   ;;  %s1170_s0 = inlined_call_operand.vmem [shape: f32[1024,128], index: 0, kind: input, shape index: {}]   ;;  %s1171_s1 = inlined_call_operand.vmem [shape: f32[1024,128], index: 1, kind: input, shape index: {}]   ;;  %s1172_s2 = inlined_call_operand.vmem [shape: f32[1,128], index: 2, kind: input, shape index: {}]   ;;  %s1173_s3 = inlined_call_operand.vmem [shape: f32[1,128], index: 3, kind: input, shape index: {}]   ;;  %s1174_s4 = inlined_call_operand.vmem [shape: f32[1024,128], index: 4, kind: output, shape index: {}]  }
   0x1 LB: > { %s753_s16 = sadd.s32 4294967295, %s782_s15   ;;  %p757_p0 = scmp.ge.s32.totalorder %s782_s15, 1  ;;  %s782_s15 = sphi %s809_s15, %s14_s15  }
   0x2   : > { %p174_p1 = scmp.lt.s32.totalorder %s782_s15, 3 }
   0x4   : > { %p175_p2 = pnand %p757_p0, %p174_p1 }
   0x5   : > { %s758_s17 = sshll.u32 (!%p175_p2), %s753_s16, 6  ;;  %v822_v0 = vld [vmem:[%s1172_s2] ss:$0 sm:$0xff] (!%p175_p2) }
   0x6   : > { %178 = sbr.rel (%p175_p2) target bundleno = 87 (0x57), region = 36  ;;  %p206_p3 = scmp.lt.s32.totalorder (!%p175_p2), %s758_s17, 127  ;;  %v840_v2 = vld [vmem:[%s1173_s3] ss:$0 sm:$0xff] (!%p175_p2) }
   0xd   : > { %s1176_s17 = smov (!%p206_p3, %s758_s17), 127 }
   0xe   : > { %s817_s18 = sshll.u32 %s1176_s17, 3 }
   0xf   : > { %s828_s23 = scalar_lea.vmem %s1170_s0, %s817_s18  ;;  %s834_s26 = scalar_lea.vmem %s1171_s1, %s817_s18 }
  0x10   : > { %v223_v1 = vld [vmem:[%s828_s23] sm:$0xff]  ;;  %v224_v3 = vld [vmem:[%s828_s23 + $0x8] sm:$0xff]  ;;  %v225_v7 = vld [vmem:[%s828_s23 + $0x10] sm:$0xff]  ;;  %s870_s5 = scalar_lea.vmem %s1174_s4, %s817_s18 }
  0x11   : > { %v294_v4 = vmul.f32 %v822_v0, %v223_v1  ;;  %v429_v5 = vld [vmem:[%s834_s26] sm:$0xff]  ;;  %v295_v6 = vmul.f32 %v822_v0, %v224_v3  ;;  %v430_v8 = vld [vmem:[%s834_s26 + $0x8] sm:$0xff]  ;;  %v296_v9 = vmul.f32 %v822_v0, %v225_v7  ;;  %v226_v10 = vld [vmem:[%s828_s23 + $0x18] sm:$0xff] }
  0x12   : > { %v227_v11 = vld [vmem:[%s828_s23 + $0x20] sm:$0xff]  ;;  %v431_v14 = vld [vmem:[%s834_s26 + $0x10] sm:$0xff]  ;;  %v297_v15 = vmul.f32 %v822_v0, %v226_v10  ;;  %v432_v16 = vld [vmem:[%s834_s26 + $0x18] sm:$0xff] }
  0x13   : > { %v365_v12 = vadd.f32 %v840_v2, %v294_v4  ;;  %v366_v13 = vadd.f32 %v840_v2, %v295_v6  ;;  %v298_v17 = vmul.f32 %v822_v0, %v227_v11  ;;  %v228_v18 = vld [vmem:[%s828_s23 + $0x28] sm:$0xff]  ;;  %v367_v19 = vadd.f32 %v840_v2, %v296_v9  ;;  %v433_v20 = vld [vmem:[%s834_s26 + $0x20] sm:$0xff]  ;;  %v229_v22 = vld [vmem:[%s828_s23 + $0x30] sm:$0xff] }
  0x14   : > { %v299_v21 = vmul.f32 %v822_v0, %v228_v18  ;;  %v230_v23 = vld [vmem:[%s828_s23 + $0x38] sm:$0xff]  ;;  %v368_v26 = vadd.f32 %v840_v2, %v297_v15  ;;  %v434_v28 = vld [vmem:[%s834_s26 + $0x28] sm:$0xff]  ;;  %v300_v31 = vmul.f32 %v822_v0, %v229_v22  ;;  %v231_v33 = vld [vmem:[%s828_s23 + $0x40] sm:$0xff] }
  0x15   : > { %v493_v24 = vadd.f32 %v429_v5, %v365_v12  ;;  %v494_v25 = vadd.f32 %v430_v8, %v366_v13  ;;  %v369_v27 = vadd.f32 %v840_v2, %v298_v17  ;;  %v495_v29 = vadd.f32 %v431_v14, %v367_v19  ;;  %v232_v34 = vld [vmem:[%s828_s23 + $0x48] sm:$0xff]  ;;  %v435_v39 = vld [vmem:[%s834_s26 + $0x30] sm:$0xff]  ;;  %v436_v40 = vld [vmem:[%s834_s26 + $0x38] sm:$0xff] }
  0x16   : > { %v370_v30 = vadd.f32 %v840_v2, %v299_v21  ;;  %v301_v32 = vmul.f32 %v822_v0, %v230_v23  ;;  %v496_v37 = vadd.f32 %v432_v16, %v368_v26  ;;  %v233_v41 = vld [vmem:[%s828_s23 + $0x50] sm:$0xff]  ;;  %v371_v44 = vadd.f32 %v840_v2, %v300_v31  ;;  %v234_v46 = vld [vmem:[%s828_s23 + $0x58] sm:$0xff]  ;;  %v235_v47 = vld [vmem:[%s828_s23 + $0x60] sm:$0xff] }
  0x17   : > { %v557_v35 = vmax.f32 %v493_v24, 0.0  ;;  %v558_v36 = vmax.f32 %v494_v25, 0.0  ;;  %v497_v38 = vadd.f32 %v433_v20, %v369_v27  ;;  %v559_v42 = vmax.f32 %v495_v29, 0.0  ;;  %v236_v52 = vld [vmem:[%s828_s23 + $0x68] sm:$0xff]  ;;  %v437_v56 = vld [vmem:[%s834_s26 + $0x40] sm:$0xff]  ;;  %v439_v61 = vld [vmem:[%s834_s26 + $0x50] sm:$0xff] }
  0x18   : > { %v498_v43 = vadd.f32 %v434_v28, %v370_v30  ;;  %v372_v45 = vadd.f32 %v840_v2, %v301_v32  ;;  %v560_v48 = vmax.f32 %v496_v37, 0.0  ;;  %v302_v50 = vmul.f32 %v822_v0, %v231_v33  ;;  %v438_v57 = vld [vmem:[%s834_s26 + $0x48] sm:$0xff]  ;;  %v237_v1 = vld [vmem:[%s828_s23 + $0x70] sm:$0xff]  ;;  %v238_v3 = vld [vmem:[%s828_s23 + $0x78] sm:$0xff] }
  0x19   : > { %621 = vst [vmem:[%s870_s5] sm:$0xff] %v557_v35  ;;  %622 = vst [vmem:[%s870_s5 + $0x8] sm:$0xff] %v558_v36  ;;  %v561_v49 = vmax.f32 %v497_v38, 0.0  ;;  %v303_v51 = vmul.f32 %v822_v0, %v232_v34  ;;  %v499_v54 = vadd.f32 %v435_v39, %v371_v44  ;;  %v304_v58 = vmul.f32 %v822_v0, %v233_v41  ;;  %v440_v7 = vld [vmem:[%s834_s26 + $0x58] sm:$0xff]  ;;  %v441_v8 = vld [vmem:[%s834_s26 + $0x60] sm:$0xff] }
  0x1a   : > { %623 = vst [vmem:[%s870_s5 + $0x10] sm:$0xff] %v559_v42  ;;  %v562_v53 = vmax.f32 %v498_v43, 0.0  ;;  %v500_v55 = vadd.f32 %v436_v40, %v372_v45  ;;  %624 = vst [vmem:[%s870_s5 + $0x18] sm:$0xff] %v560_v48  ;;  %v373_v59 = vadd.f32 %v840_v2, %v302_v50  ;;  %v305_v62 = vmul.f32 %v822_v0, %v234_v46  ;;  %v442_v14 = vld [vmem:[%s834_s26 + $0x68] sm:$0xff]  ;;  %v239_v19 = vld [vmem:[%s828_s23 + $0x80] sm:$0xff] }
  0x1b   : > { %625 = vst [vmem:[%s870_s5 + $0x20] sm:$0xff] %v561_v49  ;;  %v374_v60 = vadd.f32 %v840_v2, %v303_v51  ;;  %v306_v63 = vmul.f32 %v822_v0, %v235_v47  ;;  %v563_v4 = vmax.f32 %v499_v54, 0.0  ;;  %v375_v6 = vadd.f32 %v840_v2, %v304_v58  ;;  %v240_v20 = vld [vmem:[%s828_s23 + $0x88] sm:$0xff]  ;;  %v443_v25 = vld [vmem:[%s834_s26 + $0x70] sm:$0xff]  ;;  %v444_v26 = vld [vmem:[%s834_s26 + $0x78] sm:$0xff] }
  0x1c   : > { %626 = vst [vmem:[%s870_s5 + $0x28] sm:$0xff] %v562_v53  ;;  %v564_v5 = vmax.f32 %v500_v55, 0.0  ;;  %v307_v9 = vmul.f32 %v822_v0, %v236_v52  ;;  %v501_v10 = vadd.f32 %v437_v56, %v373_v59  ;;  %v376_v12 = vadd.f32 %v840_v2, %v305_v62  ;;  %v241_v27 = vld [vmem:[%s828_s23 + $0x90] sm:$0xff]  ;;  %v242_v32 = vld [vmem:[%s828_s23 + $0x98] sm:$0xff]  ;;  %v243_v33 = vld [vmem:[%s828_s23 + $0xa0] sm:$0xff] }
  0x1d   : > { %v502_v11 = vadd.f32 %v438_v57, %v374_v60  ;;  %v377_v13 = vadd.f32 %v840_v2, %v306_v63  ;;  %627 = vst [vmem:[%s870_s5 + $0x30] sm:$0xff] %v563_v4  ;;  %v503_v15 = vadd.f32 %v439_v61, %v375_v6  ;;  %v308_v17 = vmul.f32 %v822_v0, %v237_v1  ;;  %v244_v38 = vld [vmem:[%s828_s23 + $0xa8] sm:$0xff]  ;;  %v445_v42 = vld [vmem:[%s834_s26 + $0x80] sm:$0xff]  ;;  %v447_v47 = vld [vmem:[%s834_s26 + $0x90] sm:$0xff] }
  0x1e   : > { %628 = vst [vmem:[%s870_s5 + $0x38] sm:$0xff] %v564_v5  ;;  %v378_v16 = vadd.f32 %v840_v2, %v307_v9  ;;  %v309_v18 = vmul.f32 %v822_v0, %v238_v3  ;;  %v565_v21 = vmax.f32 %v501_v10, 0.0  ;;  %v504_v23 = vadd.f32 %v440_v7, %v376_v12  ;;  %v446_v43 = vld [vmem:[%s834_s26 + $0x88] sm:$0xff]  ;;  %v245_v50 = vld [vmem:[%s828_s23 + $0xb0] sm:$0xff]  ;;  %v246_v51 = vld [vmem:[%s828_s23 + $0xb8] sm:$0xff] }
  0x1f   : > { %v566_v22 = vmax.f32 %v502_v11, 0.0  ;;  %v505_v24 = vadd.f32 %v441_v8, %v377_v13  ;;  %v567_v28 = vmax.f32 %v503_v15, 0.0  ;;  %v379_v30 = vadd.f32 %v840_v2, %v308_v17  ;;  %v448_v55 = vld [vmem:[%s834_s26 + $0x98] sm:$0xff]  ;;  %v449_v56 = vld [vmem:[%s834_s26 + $0xa0] sm:$0xff]  ;;  %v450_v62 = vld [vmem:[%s834_s26 + $0xa8] sm:$0xff] }
  0x20   : > { %v506_v29 = vadd.f32 %v442_v14, %v378_v16  ;;  %v380_v31 = vadd.f32 %v840_v2, %v309_v18  ;;  %629 = vst [vmem:[%s870_s5 + $0x40] sm:$0xff] %v565_v21  ;;  %v568_v34 = vmax.f32 %v504_v23, 0.0  ;;  %v310_v36 = vmul.f32 %v822_v0, %v239_v19  ;;  %v247_v5 = vld [vmem:[%s828_s23 + $0xc0] sm:$0xff]  ;;  %v248_v6 = vld [vmem:[%s828_s23 + $0xc8] sm:$0xff]  ;;  %v451_v11 = vld [vmem:[%s834_s26 + $0xb0] sm:$0xff] }
  0x21   : > { %630 = vst [vmem:[%s870_s5 + $0x48] sm:$0xff] %v566_v22  ;;  %v569_v35 = vmax.f32 %v505_v24, 0.0  ;;  %v311_v37 = vmul.f32 %v822_v0, %v240_v20  ;;  %631 = vst [vmem:[%s870_s5 + $0x50] sm:$0xff] %v567_v28  ;;  %v507_v40 = vadd.f32 %v443_v25, %v379_v30  ;;  %v312_v44 = vmul.f32 %v822_v0, %v241_v27  ;;  %v452_v12 = vld [vmem:[%s834_s26 + $0xb8] sm:$0xff]  ;;  %v249_v13 = vld [vmem:[%s828_s23 + $0xd0] sm:$0xff] }
  0x22   : > { %v570_v39 = vmax.f32 %v506_v29, 0.0  ;;  %v508_v41 = vadd.f32 %v444_v26, %v380_v31  ;;  %632 = vst [vmem:[%s870_s5 + $0x58] sm:$0xff] %v568_v34  ;;  %v381_v45 = vadd.f32 %v840_v2, %v310_v36  ;;  %v313_v48 = vmul.f32 %v822_v0, %v242_v32  ;;  %v250_v18 = vld [vmem:[%s828_s23 + $0xd8] sm:$0xff]  ;;  %v251_v19 = vld [vmem:[%s828_s23 + $0xe0] sm:$0xff]  ;;  %v252_v24 = vld [vmem:[%s828_s23 + $0xe8] sm:$0xff] }
  0x23   : > { %633 = vst [vmem:[%s870_s5 + $0x60] sm:$0xff] %v569_v35  ;;  %v382_v46 = vadd.f32 %v840_v2, %v311_v37  ;;  %v314_v49 = vmul.f32 %v822_v0, %v243_v33  ;;  %v571_v52 = vmax.f32 %v507_v40, 0.0  ;;  %v383_v54 = vadd.f32 %v840_v2, %v312_v44  ;;  %v453_v28 = vld [vmem:[%s834_s26 + $0xc0] sm:$0xff]  ;;  %v454_v29 = vld [vmem:[%s834_s26 + $0xc8] sm:$0xff]  ;;  %v455_v33 = vld [vmem:[%s834_s26 + $0xd0] sm:$0xff] }
  0x24   : > { %634 = vst [vmem:[%s870_s5 + $0x68] sm:$0xff] %v570_v39  ;;  %v572_v53 = vmax.f32 %v508_v41, 0.0  ;;  %v315_v57 = vmul.f32 %v822_v0, %v244_v38  ;;  %v509_v58 = vadd.f32 %v445_v42, %v381_v45  ;;  %v384_v60 = vadd.f32 %v840_v2, %v313_v48  ;;  %v253_v36 = vld [vmem:[%s828_s23 + $0xf0] sm:$0xff]  ;;  %v254_v37 = vld [vmem:[%s828_s23 + $0xf8] sm:$0xff]  ;;  %v457_v42 = vld [vmem:[%s834_s26 + $0xe0] sm:$0xff] }
  0x25   : > { %v510_v59 = vadd.f32 %v446_v43, %v382_v46  ;;  %v385_v61 = vadd.f32 %v840_v2, %v314_v49  ;;  %635 = vst [vmem:[%s870_s5 + $0x70] sm:$0xff] %v571_v52  ;;  %v511_v63 = vadd.f32 %v447_v47, %v383_v54  ;;  %v316_v3 = vmul.f32 %v822_v0, %v245_v50  ;;  %v456_v41 = vld [vmem:[%s834_s26 + $0xd8] sm:$0xff]  ;;  %v458_v48 = vld [vmem:[%s834_s26 + $0xe8] sm:$0xff] }
  0x26   : > { %636 = vst [vmem:[%s870_s5 + $0x78] sm:$0xff] %v572_v53  ;;  %v386_v1 = vadd.f32 %v840_v2, %v315_v57  ;;  %v317_v4 = vmul.f32 %v822_v0, %v246_v51  ;;  %v573_v7 = vmax.f32 %v509_v58, 0.0  ;;  %v512_v9 = vadd.f32 %v448_v55, %v384_v60  ;;  %v255_v53 = vld [vmem:[%s828_s23 + $0x100] sm:$0xff]  ;;  %v256_v54 = vld [vmem:[%s828_s23 + $0x108] sm:$0xff]  ;;  %v460_v60 = vld [vmem:[%s834_s26 + $0xf8] sm:$0xff] }
  0x27   : > { %v574_v8 = vmax.f32 %v510_v59, 0.0  ;;  %v513_v10 = vadd.f32 %v449_v56, %v385_v61  ;;  %v575_v14 = vmax.f32 %v511_v63, 0.0  ;;  %v387_v16 = vadd.f32 %v840_v2, %v316_v3  ;;  %v459_v59 = vld [vmem:[%s834_s26 + $0xf0] sm:$0xff] }
  0x28   : > { %v514_v15 = vadd.f32 %v450_v62, %v386_v1  ;;  %v388_v17 = vadd.f32 %v840_v2, %v317_v4  ;;  %637 = vst [vmem:[%s870_s5 + $0x80] sm:$0xff] %v573_v7  ;;  %v576_v20 = vmax.f32 %v512_v9, 0.0  ;;  %v318_v22 = vmul.f32 %v822_v0, %v247_v5  ;;  %v257_v61 = vld [vmem:[%s828_s23 + $0x110] sm:$0xff]  ;;  %v258_v4 = vld [vmem:[%s828_s23 + $0x118] sm:$0xff]  ;;  %v259_v5 = vld [vmem:[%s828_s23 + $0x120] sm:$0xff] }
  0x29   : > { %638 = vst [vmem:[%s870_s5 + $0x88] sm:$0xff] %v574_v8  ;;  %v577_v21 = vmax.f32 %v513_v10, 0.0  ;;  %v319_v23 = vmul.f32 %v822_v0, %v248_v6  ;;  %639 = vst [vmem:[%s870_s5 + $0x90] sm:$0xff] %v575_v14  ;;  %v515_v26 = vadd.f32 %v451_v11, %v387_v16  ;;  %v320_v30 = vmul.f32 %v822_v0, %v249_v13  ;;  %v260_v10 = vld [vmem:[%s828_s23 + $0x128] sm:$0xff]  ;;  %v461_v14 = vld [vmem:[%s834_s26 + $0x100] sm:$0xff] }
  0x2a   : > { %v578_v25 = vmax.f32 %v514_v15, 0.0  ;;  %v516_v27 = vadd.f32 %v452_v12, %v388_v17  ;;  %640 = vst [vmem:[%s870_s5 + $0x98] sm:$0xff] %v576_v20  ;;  %v389_v31 = vadd.f32 %v840_v2, %v318_v22  ;;  %v321_v34 = vmul.f32 %v822_v0, %v250_v18  ;;  %v462_v15 = vld [vmem:[%s834_s26 + $0x108] sm:$0xff]  ;;  %v261_v22 = vld [vmem:[%s828_s23 + $0x130] sm:$0xff] }
  0x2b   : > { %641 = vst [vmem:[%s870_s5 + $0xa0] sm:$0xff] %v577_v21  ;;  %v390_v32 = vadd.f32 %v840_v2, %v319_v23  ;;  %v322_v35 = vmul.f32 %v822_v0, %v251_v19  ;;  %v579_v38 = vmax.f32 %v515_v26, 0.0  ;;  %v391_v40 = vadd.f32 %v840_v2, %v320_v30  ;;  %v463_v19 = vld [vmem:[%s834_s26 + $0x110] sm:$0xff]  ;;  %v262_v23 = vld [vmem:[%s828_s23 + $0x138] sm:$0xff] }
  0x2c   : > { %642 = vst [vmem:[%s870_s5 + $0xa8] sm:$0xff] %v578_v25  ;;  %v580_v39 = vmax.f32 %v516_v27, 0.0  ;;  %v323_v43 = vmul.f32 %v822_v0, %v252_v24  ;;  %v517_v44 = vadd.f32 %v453_v28, %v389_v31  ;;  %v392_v46 = vadd.f32 %v840_v2, %v321_v34  ;;  %v464_v27 = vld [vmem:[%s834_s26 + $0x118] sm:$0xff]  ;;  %v465_v28 = vld [vmem:[%s834_s26 + $0x120] sm:$0xff]  ;;  %v466_v34 = vld [vmem:[%s834_s26 + $0x128] sm:$0xff] }
  0x2d   : > { %v518_v45 = vadd.f32 %v454_v29, %v390_v32  ;;  %v393_v47 = vadd.f32 %v840_v2, %v322_v35  ;;  %643 = vst [vmem:[%s870_s5 + $0xb0] sm:$0xff] %v579_v38  ;;  %v519_v49 = vadd.f32 %v455_v33, %v391_v40  ;;  %v324_v51 = vmul.f32 %v822_v0, %v253_v36  ;;  %v264_v40 = vld [vmem:[%s828_s23 + $0x148] sm:$0xff] }
  0x2e   : > { %644 = vst [vmem:[%s870_s5 + $0xb8] sm:$0xff] %v580_v39  ;;  %v394_v50 = vadd.f32 %v840_v2, %v323_v43  ;;  %v325_v52 = vmul.f32 %v822_v0, %v254_v37  ;;  %v581_v55 = vmax.f32 %v517_v44, 0.0  ;;  %v520_v57 = vadd.f32 %v456_v41, %v392_v46  ;;  %v263_v39 = vld [vmem:[%s828_s23 + $0x140] sm:$0xff]  ;;  %v468_v46 = vld [vmem:[%s834_s26 + $0x138] sm:$0xff] }
  0x2f   : > { %v582_v56 = vmax.f32 %v518_v45, 0.0  ;;  %v521_v58 = vadd.f32 %v457_v42, %v393_v47  ;;  %v583_v62 = vmax.f32 %v519_v49, 0.0  ;;  %v395_v1 = vadd.f32 %v840_v2, %v324_v51  ;;  %v467_v45 = vld [vmem:[%s834_s26 + $0x130] sm:$0xff] }
  0x30   : > { %v522_v63 = vadd.f32 %v458_v48, %v394_v50  ;;  %v396_v3 = vadd.f32 %v840_v2, %v325_v52  ;;  %645 = vst [vmem:[%s870_s5 + $0xc0] sm:$0xff] %v581_v55  ;;  %v584_v6 = vmax.f32 %v520_v57, 0.0  ;;  %v326_v8 = vmul.f32 %v822_v0, %v255_v53  ;;  %v265_v47 = vld [vmem:[%s828_s23 + $0x150] sm:$0xff]  ;;  %v266_v52 = vld [vmem:[%s828_s23 + $0x158] sm:$0xff]  ;;  %v267_v53 = vld [vmem:[%s828_s23 + $0x160] sm:$0xff] }
  0x31   : > { %646 = vst [vmem:[%s870_s5 + $0xc8] sm:$0xff] %v582_v56  ;;  %v585_v7 = vmax.f32 %v521_v58, 0.0  ;;  %v327_v9 = vmul.f32 %v822_v0, %v256_v54  ;;  %647 = vst [vmem:[%s870_s5 + $0xd0] sm:$0xff] %v583_v62  ;;  %v523_v12 = vadd.f32 %v459_v59, %v395_v1  ;;  %v328_v16 = vmul.f32 %v822_v0, %v257_v61  ;;  %v268_v58 = vld [vmem:[%s828_s23 + $0x168] sm:$0xff]  ;;  %v469_v62 = vld [vmem:[%s834_s26 + $0x140] sm:$0xff] }
  0x32   : > { %v586_v11 = vmax.f32 %v522_v63, 0.0  ;;  %v524_v13 = vadd.f32 %v460_v60, %v396_v3  ;;  %648 = vst [vmem:[%s870_s5 + $0xd8] sm:$0xff] %v584_v6  ;;  %v397_v17 = vadd.f32 %v840_v2, %v326_v8  ;;  %v329_v20 = vmul.f32 %v822_v0, %v258_v4  ;;  %v470_v63 = vld [vmem:[%s834_s26 + $0x148] sm:$0xff]  ;;  %v269_v8 = vld [vmem:[%s828_s23 + $0x170] sm:$0xff] }
  0x33   : > { %649 = vst [vmem:[%s870_s5 + $0xe0] sm:$0xff] %v585_v7  ;;  %v398_v18 = vadd.f32 %v840_v2, %v327_v9  ;;  %v330_v21 = vmul.f32 %v822_v0, %v259_v5  ;;  %v587_v24 = vmax.f32 %v523_v12, 0.0  ;;  %v399_v26 = vadd.f32 %v840_v2, %v328_v16  ;;  %v471_v5 = vld [vmem:[%s834_s26 + $0x150] sm:$0xff]  ;;  %v270_v9 = vld [vmem:[%s828_s23 + $0x178] sm:$0xff] }
  0x34   : > { %650 = vst [vmem:[%s870_s5 + $0xe8] sm:$0xff] %v586_v11  ;;  %v588_v25 = vmax.f32 %v524_v13, 0.0  ;;  %v331_v29 = vmul.f32 %v822_v0, %v260_v10  ;;  %v525_v30 = vadd.f32 %v461_v14, %v397_v17  ;;  %v400_v32 = vadd.f32 %v840_v2, %v329_v20  ;;  %v472_v13 = vld [vmem:[%s834_s26 + $0x158] sm:$0xff]  ;;  %v473_v14 = vld [vmem:[%s834_s26 + $0x160] sm:$0xff]  ;;  %v474_v20 = vld [vmem:[%s834_s26 + $0x168] sm:$0xff] }
  0x35   : > { %v526_v31 = vadd.f32 %v462_v15, %v398_v18  ;;  %v401_v33 = vadd.f32 %v840_v2, %v330_v21  ;;  %651 = vst [vmem:[%s870_s5 + $0xf0] sm:$0xff] %v587_v24  ;;  %v527_v35 = vadd.f32 %v463_v19, %v399_v26  ;;  %v332_v37 = vmul.f32 %v822_v0, %v261_v22  ;;  %v272_v26 = vld [vmem:[%s828_s23 + $0x188] sm:$0xff] }
  0x36   : > { %652 = vst [vmem:[%s870_s5 + $0xf8] sm:$0xff] %v588_v25  ;;  %v402_v36 = vadd.f32 %v840_v2, %v331_v29  ;;  %v333_v38 = vmul.f32 %v822_v0, %v262_v23  ;;  %v589_v41 = vmax.f32 %v525_v30, 0.0  ;;  %v528_v43 = vadd.f32 %v464_v27, %v400_v32  ;;  %v271_v25 = vld [vmem:[%s828_s23 + $0x180] sm:$0xff]  ;;  %v476_v32 = vld [vmem:[%s834_s26 + $0x178] sm:$0xff] }
  0x37   : > { %v590_v42 = vmax.f32 %v526_v31, 0.0  ;;  %v529_v44 = vadd.f32 %v465_v28, %v401_v33  ;;  %v591_v48 = vmax.f32 %v527_v35, 0.0  ;;  %v403_v50 = vadd.f32 %v840_v2, %v332_v37  ;;  %v475_v31 = vld [vmem:[%s834_s26 + $0x170] sm:$0xff] }
  0x38   : > { %v530_v49 = vadd.f32 %v466_v34, %v402_v36  ;;  %v404_v51 = vadd.f32 %v840_v2, %v333_v38  ;;  %653 = vst [vmem:[%s870_s5 + $0x100] sm:$0xff] %v589_v41  ;;  %v592_v54 = vmax.f32 %v528_v43, 0.0  ;;  %v334_v56 = vmul.f32 %v822_v0, %v263_v39  ;;  %v273_v33 = vld [vmem:[%s828_s23 + $0x190] sm:$0xff]  ;;  %v274_v38 = vld [vmem:[%s828_s23 + $0x198] sm:$0xff]  ;;  %v275_v39 = vld [vmem:[%s828_s23 + $0x1a0] sm:$0xff] }
  0x39   : > { %654 = vst [vmem:[%s870_s5 + $0x108] sm:$0xff] %v590_v42  ;;  %v593_v55 = vmax.f32 %v529_v44, 0.0  ;;  %v335_v57 = vmul.f32 %v822_v0, %v264_v40  ;;  %655 = vst [vmem:[%s870_s5 + $0x110] sm:$0xff] %v591_v48  ;;  %v531_v60 = vadd.f32 %v467_v45, %v403_v50  ;;  %v336_v1 = vmul.f32 %v822_v0, %v265_v47  ;;  %v276_v44 = vld [vmem:[%s828_s23 + $0x1a8] sm:$0xff]  ;;  %v477_v48 = vld [vmem:[%s834_s26 + $0x180] sm:$0xff] }
  0x3a   : > { %v594_v59 = vmax.f32 %v530_v49, 0.0  ;;  %v532_v61 = vadd.f32 %v468_v46, %v404_v51  ;;  %656 = vst [vmem:[%s870_s5 + $0x118] sm:$0xff] %v592_v54  ;;  %v405_v3 = vadd.f32 %v840_v2, %v334_v56  ;;  %v337_v6 = vmul.f32 %v822_v0, %v266_v52  ;;  %v478_v49 = vld [vmem:[%s834_s26 + $0x188] sm:$0xff]  ;;  %v277_v56 = vld [vmem:[%s828_s23 + $0x1b0] sm:$0xff] }
  0x3b   : > { %657 = vst [vmem:[%s870_s5 + $0x120] sm:$0xff] %v593_v55  ;;  %v406_v4 = vadd.f32 %v840_v2, %v335_v57  ;;  %v338_v7 = vmul.f32 %v822_v0, %v267_v53  ;;  %v595_v10 = vmax.f32 %v531_v60, 0.0  ;;  %v407_v12 = vadd.f32 %v840_v2, %v336_v1  ;;  %v479_v53 = vld [vmem:[%s834_s26 + $0x190] sm:$0xff]  ;;  %v278_v57 = vld [vmem:[%s828_s23 + $0x1b8] sm:$0xff] }
  0x3c   : > { %658 = vst [vmem:[%s870_s5 + $0x128] sm:$0xff] %v594_v59  ;;  %v596_v11 = vmax.f32 %v532_v61, 0.0  ;;  %v339_v15 = vmul.f32 %v822_v0, %v268_v58  ;;  %v533_v16 = vadd.f32 %v469_v62, %v405_v3  ;;  %v408_v18 = vadd.f32 %v840_v2, %v337_v6  ;;  %v480_v61 = vld [vmem:[%s834_s26 + $0x198] sm:$0xff]  ;;  %v481_v62 = vld [vmem:[%s834_s26 + $0x1a0] sm:$0xff]  ;;  %v482_v6 = vld [vmem:[%s834_s26 + $0x1a8] sm:$0xff] }
  0x3d   : > { %v534_v17 = vadd.f32 %v470_v63, %v406_v4  ;;  %v409_v19 = vadd.f32 %v840_v2, %v338_v7  ;;  %659 = vst [vmem:[%s870_s5 + $0x130] sm:$0xff] %v595_v10  ;;  %v535_v21 = vadd.f32 %v471_v5, %v407_v12  ;;  %v340_v23 = vmul.f32 %v822_v0, %v269_v8  ;;  %v280_v12 = vld [vmem:[%s828_s23 + $0x1c8] sm:$0xff] }
  0x3e   : > { %660 = vst [vmem:[%s870_s5 + $0x138] sm:$0xff] %v596_v11  ;;  %v410_v22 = vadd.f32 %v840_v2, %v339_v15  ;;  %v341_v24 = vmul.f32 %v822_v0, %v270_v9  ;;  %v597_v27 = vmax.f32 %v533_v16, 0.0  ;;  %v536_v29 = vadd.f32 %v472_v13, %v408_v18  ;;  %v279_v11 = vld [vmem:[%s828_s23 + $0x1c0] sm:$0xff]  ;;  %v484_v18 = vld [vmem:[%s834_s26 + $0x1b8] sm:$0xff] }
  0x3f   : > { %v598_v28 = vmax.f32 %v534_v17, 0.0  ;;  %v537_v30 = vadd.f32 %v473_v14, %v409_v19  ;;  %v599_v34 = vmax.f32 %v535_v21, 0.0  ;;  %v411_v36 = vadd.f32 %v840_v2, %v340_v23  ;;  %v483_v17 = vld [vmem:[%s834_s26 + $0x1b0] sm:$0xff] }
  0x40   : > { %v538_v35 = vadd.f32 %v474_v20, %v410_v22  ;;  %v412_v37 = vadd.f32 %v840_v2, %v341_v24  ;;  %661 = vst [vmem:[%s870_s5 + $0x140] sm:$0xff] %v597_v27  ;;  %v600_v40 = vmax.f32 %v536_v29, 0.0  ;;  %v342_v42 = vmul.f32 %v822_v0, %v271_v25  ;;  %v281_v19 = vld [vmem:[%s828_s23 + $0x1d0] sm:$0xff]  ;;  %v282_v24 = vld [vmem:[%s828_s23 + $0x1d8] sm:$0xff]  ;;  %v283_v25 = vld [vmem:[%s828_s23 + $0x1e0] sm:$0xff] }
  0x41   : > { %662 = vst [vmem:[%s870_s5 + $0x148] sm:$0xff] %v598_v28  ;;  %v601_v41 = vmax.f32 %v537_v30, 0.0  ;;  %v343_v43 = vmul.f32 %v822_v0, %v272_v26  ;;  %663 = vst [vmem:[%s870_s5 + $0x150] sm:$0xff] %v599_v34  ;;  %v539_v46 = vadd.f32 %v475_v31, %v411_v36  ;;  %v344_v50 = vmul.f32 %v822_v0, %v273_v33  ;;  %v284_v30 = vld [vmem:[%s828_s23 + $0x1e8] sm:$0xff]  ;;  %v485_v34 = vld [vmem:[%s834_s26 + $0x1c0] sm:$0xff] }
  0x42   : > { %v602_v45 = vmax.f32 %v538_v35, 0.0  ;;  %v540_v47 = vadd.f32 %v476_v32, %v412_v37  ;;  %664 = vst [vmem:[%s870_s5 + $0x158] sm:$0xff] %v600_v40  ;;  %v413_v51 = vadd.f32 %v840_v2, %v342_v42  ;;  %v345_v54 = vmul.f32 %v822_v0, %v274_v38  ;;  %v486_v35 = vld [vmem:[%s834_s26 + $0x1c8] sm:$0xff]  ;;  %v285_v42 = vld [vmem:[%s828_s23 + $0x1f0] sm:$0xff] }
  0x43   : > { %665 = vst [vmem:[%s870_s5 + $0x160] sm:$0xff] %v601_v41  ;;  %v414_v52 = vadd.f32 %v840_v2, %v343_v43  ;;  %v346_v55 = vmul.f32 %v822_v0, %v275_v39  ;;  %v603_v58 = vmax.f32 %v539_v46, 0.0  ;;  %v415_v60 = vadd.f32 %v840_v2, %v344_v50  ;;  %v487_v39 = vld [vmem:[%s834_s26 + $0x1d0] sm:$0xff]  ;;  %v286_v43 = vld [vmem:[%s828_s23 + $0x1f8] sm:$0xff] }
  0x44   : > { %666 = vst [vmem:[%s870_s5 + $0x168] sm:$0xff] %v602_v45  ;;  %v604_v59 = vmax.f32 %v540_v47, 0.0  ;;  %v347_v63 = vmul.f32 %v822_v0, %v276_v44  ;;  %v541_v1 = vadd.f32 %v477_v48, %v413_v51  ;;  %v416_v4 = vadd.f32 %v840_v2, %v345_v54  ;;  %v488_v47 = vld [vmem:[%s834_s26 + $0x1d8] sm:$0xff]  ;;  %v489_v48 = vld [vmem:[%s834_s26 + $0x1e0] sm:$0xff]  ;;  %v490_v54 = vld [vmem:[%s834_s26 + $0x1e8] sm:$0xff] }
  0x45   : > { %v542_v3 = vadd.f32 %v478_v49, %v414_v52  ;;  %v417_v5 = vadd.f32 %v840_v2, %v346_v55  ;;  %667 = vst [vmem:[%s870_s5 + $0x170] sm:$0xff] %v603_v58  ;;  %v543_v7 = vadd.f32 %v479_v53, %v415_v60  ;;  %v348_v9 = vmul.f32 %v822_v0, %v277_v56 }
  0x46   : > { %668 = vst [vmem:[%s870_s5 + $0x178] sm:$0xff] %v604_v59  ;;  %v418_v8 = vadd.f32 %v840_v2, %v347_v63  ;;  %v349_v10 = vmul.f32 %v822_v0, %v278_v57  ;;  %v605_v13 = vmax.f32 %v541_v1, 0.0  ;;  %v544_v15 = vadd.f32 %v480_v61, %v416_v4  ;;  %v491_v63 = vld [vmem:[%s834_s26 + $0x1f0] sm:$0xff]  ;;  %v492_v1 = vld [vmem:[%s834_s26 + $0x1f8] sm:$0xff] }
  0x47   : > { %v606_v14 = vmax.f32 %v542_v3, 0.0  ;;  %v545_v16 = vadd.f32 %v481_v62, %v417_v5  ;;  %v607_v20 = vmax.f32 %v543_v7, 0.0  ;;  %v419_v22 = vadd.f32 %v840_v2, %v348_v9 }
  0x48   : > { %v546_v21 = vadd.f32 %v482_v6, %v418_v8  ;;  %v420_v23 = vadd.f32 %v840_v2, %v349_v10  ;;  %669 = vst [vmem:[%s870_s5 + $0x180] sm:$0xff] %v605_v13  ;;  %v608_v26 = vmax.f32 %v544_v15, 0.0  ;;  %v350_v28 = vmul.f32 %v822_v0, %v279_v11 }
  0x49   : > { %670 = vst [vmem:[%s870_s5 + $0x188] sm:$0xff] %v606_v14  ;;  %v609_v27 = vmax.f32 %v545_v16, 0.0  ;;  %v351_v29 = vmul.f32 %v822_v0, %v280_v12  ;;  %671 = vst [vmem:[%s870_s5 + $0x190] sm:$0xff] %v607_v20  ;;  %v547_v32 = vadd.f32 %v483_v17, %v419_v22  ;;  %v352_v36 = vmul.f32 %v822_v0, %v281_v19 }
  0x4a   : > { %v610_v31 = vmax.f32 %v546_v21, 0.0  ;;  %v548_v33 = vadd.f32 %v484_v18, %v420_v23  ;;  %672 = vst [vmem:[%s870_s5 + $0x198] sm:$0xff] %v608_v26  ;;  %v421_v37 = vadd.f32 %v840_v2, %v350_v28  ;;  %v353_v40 = vmul.f32 %v822_v0, %v282_v24 }
  0x4b   : > { %673 = vst [vmem:[%s870_s5 + $0x1a0] sm:$0xff] %v609_v27  ;;  %v422_v38 = vadd.f32 %v840_v2, %v351_v29  ;;  %v354_v41 = vmul.f32 %v822_v0, %v283_v25  ;;  %v611_v44 = vmax.f32 %v547_v32, 0.0  ;;  %v423_v46 = vadd.f32 %v840_v2, %v352_v36 }
  0x4c   : > { %674 = vst [vmem:[%s870_s5 + $0x1a8] sm:$0xff] %v610_v31  ;;  %v612_v45 = vmax.f32 %v548_v33, 0.0  ;;  %v355_v49 = vmul.f32 %v822_v0, %v284_v30  ;;  %v549_v50 = vadd.f32 %v485_v34, %v421_v37  ;;  %v424_v52 = vadd.f32 %v840_v2, %v353_v40 }
  0x4d   : > { %v550_v51 = vadd.f32 %v486_v35, %v422_v38  ;;  %v425_v53 = vadd.f32 %v840_v2, %v354_v41  ;;  %675 = vst [vmem:[%s870_s5 + $0x1b0] sm:$0xff] %v611_v44  ;;  %v551_v55 = vadd.f32 %v487_v39, %v423_v46  ;;  %v356_v57 = vmul.f32 %v822_v0, %v285_v42 }
  0x4e   : > { %676 = vst [vmem:[%s870_s5 + $0x1b8] sm:$0xff] %v612_v45  ;;  %v426_v56 = vadd.f32 %v840_v2, %v355_v49  ;;  %v357_v58 = vmul.f32 %v822_v0, %v286_v43  ;;  %v613_v59 = vmax.f32 %v549_v50, 0.0  ;;  %v552_v61 = vadd.f32 %v488_v47, %v424_v52 }
  0x4f   : > { %v614_v60 = vmax.f32 %v550_v51, 0.0  ;;  %v553_v62 = vadd.f32 %v489_v48, %v425_v53  ;;  %v615_v3 = vmax.f32 %v551_v55, 0.0  ;;  %v427_v5 = vadd.f32 %v840_v2, %v356_v57 }
  0x50   : > { %v554_v4 = vadd.f32 %v490_v54, %v426_v56  ;;  %v428_v6 = vadd.f32 %v840_v2, %v357_v58  ;;  %677 = vst [vmem:[%s870_s5 + $0x1c0] sm:$0xff] %v613_v59  ;;  %v616_v0 = vmax.f32 %v552_v61, 0.0 }
  0x51   : > { %678 = vst [vmem:[%s870_s5 + $0x1c8] sm:$0xff] %v614_v60  ;;  %v617_v7 = vmax.f32 %v553_v62, 0.0  ;;  %679 = vst [vmem:[%s870_s5 + $0x1d0] sm:$0xff] %v615_v3  ;;  %v555_v9 = vadd.f32 %v491_v63, %v427_v5 }
  0x52   : > { %v618_v8 = vmax.f32 %v554_v4, 0.0  ;;  %v556_v10 = vadd.f32 %v492_v1, %v428_v6  ;;  %680 = vst [vmem:[%s870_s5 + $0x1d8] sm:$0xff] %v616_v0 }
  0x53   : > { %681 = vst [vmem:[%s870_s5 + $0x1e0] sm:$0xff] %v617_v7  ;;  %v619_v11 = vmax.f32 %v555_v9, 0.0 }
  0x54   : > { %682 = vst [vmem:[%s870_s5 + $0x1e8] sm:$0xff] %v618_v8  ;;  %v620_v12 = vmax.f32 %v556_v10, 0.0 }
  0x55   : > { %683 = vst [vmem:[%s870_s5 + $0x1f0] sm:$0xff] %v619_v11 }
  0x56   : > { %684 = vst [vmem:[%s870_s5 + $0x1f8] sm:$0xff] %v620_v12 }
  0x57 PF: > { %s14_s15 = sadd.s32 1, %s782_s15  }
  0x58   : > { %p11_p4 = scmp.ge.s32.totalorder %s14_s15, 4  }
  0x5a   :  { %13 = sbr.rel (!%p11_p4) target bundleno = 1 (0x1), region = 69 }

// kernel: bottleneck_forward.6
= control target key start
LH: loop header
LB: loop body
LE: loop exit
PB: predicated region body
PF: predicated region fallthrough
CT: control target
= control target key end

     0   :  { %s1436_s18 = smov 0   ;;  %s2192_s0 = inlined_call_operand.vmem [shape: f32[1024,128], index: 0, kind: input, shape index: {}]   ;;  %s2193_s1 = inlined_call_operand.vmem [shape: f32[1,128], index: 1, kind: input, shape index: {}]   ;;  %s2194_s2 = inlined_call_operand.vmem [shape: f32[1,128], index: 2, kind: input, shape index: {}]   ;;  %s2195_s3 = inlined_call_operand.vmem [shape: bf16[128,128], index: 3, kind: input, shape index: {}]   ;;  %s2196_s4 = inlined_call_operand.vmem [shape: f32[1024,128], index: 4, kind: output, shape index: {0}]   ;;  %s2197_s5 = inlined_call_operand.vmem [shape: f32[8,128], index: 5, kind: output, shape index: {1}]  }
   0x1 LB: > { %s1222_s19 = sadd.s32 4294967295, %s1403_s18   ;;  %p1226_p0 = scmp.ge.s32.totalorder %s1403_s18, 1  ;;  %s1403_s18 = sphi %s1436_s18, %s16_s18  }
   0x2   : > { %p186_p1 = scmp.lt.s32.totalorder %s1403_s18, 3 }
   0x4   : > { %p187_p2 = pnand %p1226_p0, %p186_p1 }
   0x6   : > { %190 = sbr.rel (%p187_p2) target bundleno = 476 (0x1dc), region = 36 }
   0xd   : > { %v1389_v0 = vld [vmem:[%s2195_s3] sm:$0xff]   ;;  %s1227_s22 = sshll.u32 %s1222_s19, 6  ;;  %v1390_v1 = vld [vmem:[%s2195_s3 + $0x8] sm:$0xff]   ;;  %v1391_v2 = vld [vmem:[%s2195_s3 + $0x10] sm:$0xff]   ;;  %p1241_p4 = scmp.ne.s32.totalorder %s1222_s19, 0 }
   0xe   : > { %p215_p3 = scmp.lt.s32.totalorder %s1227_s22, 127  ;;  %1284 = vmatprep.subr.bf16.mxu0 %v1389_v0  ;;  %1364 = vmatprep.subr.bf16.mxu1 %v1389_v0  ;;  %v1392_v3 = vld [vmem:[%s2195_s3 + $0x18] sm:$0xff]   ;;  %v1473_v6 = vld [vmem:[%s2193_s1] ss:$0 sm:$0xff]  ;;  %v1394_v39 = vld [vmem:[%s2195_s3 + $0x28] sm:$0xff]  }
   0xf   : > { %1285 = vmatpush3.bf16.msra.mxu0 %v1389_v0  ;;  %1372 = vmatpush3.bf16.msra.mxu1 %v1389_v0  ;;  %v1480_v9 = vld [vmem:[%s2194_s2] ss:$0 sm:$0xff]  ;;  %v1395_v56 = vld [vmem:[%s2195_s3 + $0x30] sm:$0xff]  }
  0x10   : > { %s2247_s22 = smov (!%p215_p3, %s1227_s22), 127  ;;  %1286 = vmatprep.subr.bf16.mxu0 %v1390_v1  ;;  %1365 = vmatprep.subr.bf16.mxu1 %v1390_v1  ;;  %v1393_v21 = vld [vmem:[%s2195_s3 + $0x20] sm:$0xff]  }
  0x11   : > { %s1228_s27 = sshll.u32 %s2247_s22, 3 }
  0x12   : > { %s1463_s30 = scalar_lea.vmem %s2192_s0, %s1228_s27  ;;  %s1728_s25 = scalar_lea.vmem %s2196_s4, %s1228_s27 }
  0x13   : > { %1287 = vmatpush3.bf16.msra.mxu0 %v1390_v1  ;;  %1373 = vmatpush3.bf16.msra.mxu1 %v1390_v1  ;;  %v227_v4 = vld [vmem:[%s1463_s30] sm:$0xff]  ;;  %v228_v5 = vld [vmem:[%s1463_s30 + $0x8] sm:$0xff]  ;;  %v229_v14 = vld [vmem:[%s1463_s30 + $0x10] sm:$0xff] }
  0x14   : > { %1288 = vmatprep.subr.bf16.mxu0 %v1391_v2  ;;  %1366 = vmatprep.subr.bf16.mxu1 %v1391_v2  ;;  %v298_v7 = vmul.f32 %v1473_v6, %v227_v4  ;;  %v299_v8 = vmul.f32 %v1473_v6, %v228_v5  ;;  %v259_v10 = vld [vmem:[%s1463_s30 + $0x100] sm:$0xff]  ;;  %v260_v11 = vld [vmem:[%s1463_s30 + $0x108] sm:$0xff]  ;;  %v230_v15 = vld [vmem:[%s1463_s30 + $0x18] sm:$0xff]  ;;  %v300_v19 = vmul.f32 %v1473_v6, %v229_v14 }
  0x15   : > { %v330_v12 = vmul.f32 %v1473_v6, %v259_v10  ;;  %v331_v13 = vmul.f32 %v1473_v6, %v260_v11  ;;  %v261_v16 = vld [vmem:[%s1463_s30 + $0x110] sm:$0xff]  ;;  %v262_v20 = vld [vmem:[%s1463_s30 + $0x118] sm:$0xff]  ;;  %v301_v24 = vmul.f32 %v1473_v6, %v230_v15  ;;  %v231_v25 = vld [vmem:[%s1463_s30 + $0x20] sm:$0xff] }
  0x16   : > { %v369_v17 = vadd.f32 %v1480_v9, %v298_v7  ;;  %v370_v18 = vadd.f32 %v1480_v9, %v299_v8  ;;  %v332_v28 = vmul.f32 %v1473_v6, %v261_v16  ;;  %v232_v29 = vld [vmem:[%s1463_s30 + $0x28] sm:$0xff]  ;;  %v333_v32 = vmul.f32 %v1473_v6, %v262_v20  ;;  %v263_v33 = vld [vmem:[%s1463_s30 + $0x120] sm:$0xff]  ;;  %v233_v38 = vld [vmem:[%s1463_s30 + $0x30] sm:$0xff] }
  0x17   : > { %1289 = vmatpush3.bf16.msra.mxu0 %v1391_v2  ;;  %1374 = vmatpush3.bf16.msra.mxu1 %v1391_v2  ;;  %v401_v22 = vadd.f32 %v1480_v9, %v330_v12  ;;  %v402_v23 = vadd.f32 %v1480_v9, %v331_v13  ;;  %v264_v34 = vld [vmem:[%s1463_s30 + $0x128] sm:$0xff]  ;;  %v371_v36 = vadd.f32 %v1480_v9, %v300_v19  ;;  %v234_v43 = vld [vmem:[%s1463_s30 + $0x38] sm:$0xff]  ;;  %v265_v47 = vld [vmem:[%s1463_s30 + $0x130] sm:$0xff] }
  0x18   : > { %1290 = vmatprep.subr.bf16.mxu0 %v1392_v3  ;;  %1367 = vmatprep.subr.bf16.mxu1 %v1392_v3  ;;  %v433_v26 = vmax.f32 %v369_v17, 0.0  ;;  %v434_v27 = vmax.f32 %v370_v18, 0.0  ;;  %v302_v37 = vmul.f32 %v1473_v6, %v231_v25  ;;  %v372_v41 = vadd.f32 %v1480_v9, %v301_v24  ;;  %v266_v52 = vld [vmem:[%s1463_s30 + $0x138] sm:$0xff]  ;;  %v235_v61 = vld [vmem:[%s1463_s30 + $0x40] sm:$0xff]  ;;  %v236_v1 = vld [vmem:[%s1463_s30 + $0x48] sm:$0xff] }
  0x19   : > { %v465_v30 = vmax.f32 %v401_v22, 0.0  ;;  %v466_v31 = vmax.f32 %v402_v23, 0.0  ;;  %v303_v42 = vmul.f32 %v1473_v6, %v232_v29  ;;  %v403_v44 = vadd.f32 %v1480_v9, %v332_v28  ;;  %v267_v7 = vld [vmem:[%s1463_s30 + $0x140] sm:$0xff]  ;;  %v268_v8 = vld [vmem:[%s1463_s30 + $0x148] sm:$0xff]  ;;  %v237_v14 = vld [vmem:[%s1463_s30 + $0x50] sm:$0xff] }
  0x1a   : > { %v497_v35 = vpack.c.bf16 %v434_v27, %v433_v26  ;;  %v334_v45 = vmul.f32 %v1473_v6, %v263_v33  ;;  %v335_v46 = vmul.f32 %v1473_v6, %v264_v34  ;;  %v404_v48 = vadd.f32 %v1480_v9, %v333_v32  ;;  %v238_v15 = vld [vmem:[%s1463_s30 + $0x58] sm:$0xff] }
  0x1b   : > { %1291 = vmatpush3.bf16.msra.mxu0 %v1392_v3  ;;  %1375 = vmatpush3.bf16.msra.mxu1 %v1392_v3  ;;  %v513_v40 = vpack.c.bf16 %v466_v31, %v465_v30  ;;  %v373_v49 = vadd.f32 %v1480_v9, %v302_v37  ;;  %v374_v50 = vadd.f32 %v1480_v9, %v303_v42  ;;  %v435_v57 = vmax.f32 %v371_v36, 0.0  ;;  %v1396_v16 = vld [vmem:[%s2195_s3 + $0x38] sm:$0xff]   ;;  %v239_v31 = vld [vmem:[%s1463_s30 + $0x60] sm:$0xff] }
  0x1c   : > { %1292 = vmatprep.subr.bf16.mxu0 %v1393_v21  ;;  %1368 = vmatprep.subr.bf16.mxu1 %v1393_v21  ;;  %v304_v51 = vmul.f32 %v1473_v6, %v233_v38  ;;  %v405_v53 = vadd.f32 %v1480_v9, %v334_v45  ;;  %v406_v54 = vadd.f32 %v1480_v9, %v335_v46  ;;  %v436_v58 = vmax.f32 %v372_v41, 0.0  ;;  %v270_v26 = vld [vmem:[%s1463_s30 + $0x158] sm:$0xff]  ;;  %v241_v45 = vld [vmem:[%s1463_s30 + $0x70] sm:$0xff] }
  0x1d   : > { %1300 = vmatprep.mubr.bf16.mxu0 %v497_v35  ;;  %1332 = vmatprep.mubr.bf16.mxu1 %v513_v40  ;;  %v305_v55 = vmul.f32 %v1473_v6, %v234_v43  ;;  %v336_v60 = vmul.f32 %v1473_v6, %v265_v47  ;;  %v467_v62 = vmax.f32 %v403_v44, 0.0  ;;  %v337_v0 = vmul.f32 %v1473_v6, %v266_v52  ;;  %v240_v35 = vld [vmem:[%s1463_s30 + $0x68] sm:$0xff] }
  0x1e   : > { %v375_v59 = vadd.f32 %v1480_v9, %v304_v51  ;;  %v468_v2 = vmax.f32 %v404_v48, 0.0  ;;  %v437_v3 = vmax.f32 %v373_v49, 0.0  ;;  %v438_v4 = vmax.f32 %v374_v50, 0.0  ;;  %v272_v40 = vld [vmem:[%s1463_s30 + $0x168] sm:$0xff]  ;;  %v242_v50 = vld [vmem:[%s1463_s30 + $0x78] sm:$0xff] }
  0x1f   : > { %1293 = vmatpush3.bf16.msra.mxu0 %v1393_v21  ;;  %1376 = vmatpush3.bf16.msra.mxu1 %v1393_v21  ;;  %v376_v63 = vadd.f32 %v1480_v9, %v305_v55  ;;  %v407_v5 = vadd.f32 %v1480_v9, %v336_v60  ;;  %v469_v10 = vmax.f32 %v405_v53, 0.0  ;;  %v470_v11 = vmax.f32 %v406_v54, 0.0  ;;  %v269_v21 = vld [vmem:[%s1463_s30 + $0x150] sm:$0xff] }
  0x20   : > { %1294 = vmatprep.subr.bf16.mxu0 %v1394_v39  ;;  %1369 = vmatprep.subr.bf16.mxu1 %v1394_v39  ;;  %v408_v12 = vadd.f32 %v1480_v9, %v337_v0  ;;  %v306_v13 = vmul.f32 %v1473_v6, %v235_v61  ;;  %v498_v17 = vpack.c.bf16 %v436_v58, %v435_v57  ;;  %v439_v18 = vmax.f32 %v375_v59, 0.0  ;;  %v273_v59 = vld [vmem:[%s1463_s30 + $0x170] sm:$0xff] }
  0x21   : > { %v440_v19 = vmax.f32 %v376_v63, 0.0  ;;  %v307_v20 = vmul.f32 %v1473_v6, %v236_v1  ;;  %v471_v22 = vmax.f32 %v407_v5, 0.0  ;;  %v338_v24 = vmul.f32 %v1473_v6, %v267_v7  ;;  %v243_v5 = vld [vmem:[%s1463_s30 + $0x80] sm:$0xff] }
  0x22   : > { %v472_v23 = vmax.f32 %v408_v12, 0.0  ;;  %v339_v25 = vmul.f32 %v1473_v6, %v268_v8  ;;  %v514_v27 = vpack.c.bf16 %v468_v2, %v467_v62  ;;  %v499_v28 = vpack.c.bf16 %v438_v4, %v437_v3  ;;  %v274_v4 = vld [vmem:[%s1463_s30 + $0x178] sm:$0xff]  ;;  %v244_v12 = vld [vmem:[%s1463_s30 + $0x88] sm:$0xff] }
  0x23   : > { %1295 = vmatpush3.bf16.msra.mxu0 %v1394_v39  ;;  %1377 = vmatpush3.bf16.msra.mxu1 %v1394_v39  ;;  %v308_v29 = vmul.f32 %v1473_v6, %v237_v14  ;;  %v309_v30 = vmul.f32 %v1473_v6, %v238_v15  ;;  %v515_v32 = vpack.c.bf16 %v470_v11, %v469_v10  ;;  %v271_v39 = vld [vmem:[%s1463_s30 + $0x160] sm:$0xff] }
  0x24   : > { %1296 = vmatprep.subr.bf16.mxu0 %v1395_v56  ;;  %1370 = vmatprep.subr.bf16.mxu1 %v1395_v56  ;;  %v1554_v33 = vadd.f32 %v1480_v9, %v306_v13  ;;  %v340_v34 = vmul.f32 %v1473_v6, %v269_v21  ;;  %v1558_v36 = vpack.c.bf16 %v440_v19, %v439_v18  ;;  %v275_v13 = vld [vmem:[%s1463_s30 + $0x180] sm:$0xff]  ;;  %v276_v18 = vld [vmem:[%s1463_s30 + $0x188] sm:$0xff]  ;;  %v245_v19 = vld [vmem:[%s1463_s30 + $0x90] sm:$0xff] }
  0x25   : > { %v378_v37 = vadd.f32 %v1480_v9, %v307_v20  ;;  %v341_v38 = vmul.f32 %v1473_v6, %v270_v26  ;;  %v1564_v41 = vpack.c.bf16 %v472_v23, %v471_v22  ;;  %v409_v42 = vadd.f32 %v1480_v9, %v338_v24  ;;  %v246_v24 = vld [vmem:[%s1463_s30 + $0x98] sm:$0xff] }
  0x26   : > { %v410_v43 = vadd.f32 %v1480_v9, %v339_v25  ;;  %v310_v44 = vmul.f32 %v1473_v6, %v239_v31  ;;  %v379_v46 = vadd.f32 %v1480_v9, %v308_v29  ;;  %v380_v47 = vadd.f32 %v1480_v9, %v309_v30  ;;  %v277_v29 = vld [vmem:[%s1463_s30 + $0x190] sm:$0xff] }
  0x27   : > { %1297 = vmatpush3.bf16.msra.mxu0 %v1395_v56  ;;  %1378 = vmatpush3.bf16.msra.mxu1 %v1395_v56  ;;  %v411_v48 = vadd.f32 %v1480_v9, %v340_v34  ;;  %v311_v49 = vmul.f32 %v1473_v6, %v240_v35  ;;  %v441_v51 = vmax.f32 %v1554_v33, 0.0  ;;  %v412_v52 = vadd.f32 %v1480_v9, %v341_v38  ;;  %v278_v34 = vld [vmem:[%s1463_s30 + $0x198] sm:$0xff] }
  0x28   : > { %1298 = vmatprep.subr.bf16.mxu0 %v1396_v16  ;;  %1371 = vmatprep.subr.bf16.mxu1 %v1396_v16  ;;  %v342_v53 = vmul.f32 %v1473_v6, %v271_v39  ;;  %v343_v54 = vmul.f32 %v1473_v6, %v272_v40  ;;  %v442_v55 = vmax.f32 %v378_v37, 0.0  ;;  %v381_v56 = vadd.f32 %v1480_v9, %v310_v44  ;;  %v247_v40 = vld [vmem:[%s1463_s30 + $0xa0] sm:$0xff] }
  0x29   : > { %v382_v57 = vadd.f32 %v1480_v9, %v311_v49  ;;  %v312_v58 = vmul.f32 %v1473_v6, %v241_v45  ;;  %v473_v60 = vmax.f32 %v409_v42, 0.0  ;;  %v313_v63 = vmul.f32 %v1473_v6, %v242_v50  ;;  %v279_v50 = vld [vmem:[%s1463_s30 + $0x1a0] sm:$0xff] }
  0x2a   : > { %v413_v61 = vadd.f32 %v1480_v9, %v342_v53  ;;  %v414_v62 = vadd.f32 %v1480_v9, %v343_v54  ;;  %v474_v0 = vmax.f32 %v410_v43, 0.0  ;;  %v443_v1 = vmax.f32 %v379_v46, 0.0  ;;  %v248_v46 = vld [vmem:[%s1463_s30 + $0xa8] sm:$0xff] }
  0x2b   : > { %1299 = vmatpush3.bf16.msra.mxu0 %v1396_v16  ;;  %1379 = vmatpush3.bf16.msra.mxu1 %v1396_v16  ;;  %v444_v2 = vmax.f32 %v380_v47, 0.0  ;;  %v383_v3 = vadd.f32 %v1480_v9, %v312_v58  ;;  %v475_v7 = vmax.f32 %v411_v48, 0.0  ;;  %v476_v8 = vmax.f32 %v412_v52, 0.0 }
  0x2c   : > { %v384_v10 = vadd.f32 %v1480_v9, %v313_v63  ;;  %v344_v11 = vmul.f32 %v1473_v6, %v273_v59  ;;  %v445_v14 = vmax.f32 %v381_v56, 0.0  ;;  %v446_v15 = vmax.f32 %v382_v57, 0.0 }
  0x2d   : > { %v477_v16 = vmax.f32 %v413_v61, 0.0  ;;  %v447_v20 = vmax.f32 %v383_v3, 0.0  ;;  %v345_v22 = vmul.f32 %v1473_v6, %v274_v4  ;;  %v314_v23 = vmul.f32 %v1473_v6, %v243_v5 }
  0x2e   : > { %1301 = vmatmul.mubr.bf16.vlgmr.msra.gmra.mrb[0].mxu0 %v498_v17  ;;  %1333 = vmatmul.mubr.bf16.vlgmr.msra.gmra.mrb[0].mxu1 %v514_v27  ;;  %v478_v17 = vmax.f32 %v414_v62, 0.0  ;;  %v448_v21 = vmax.f32 %v384_v10, 0.0  ;;  %v501_v25 = vpack.c.bf16 %v442_v55, %v441_v51  ;;  %v517_v26 = vpack.c.bf16 %v474_v0, %v473_v60  ;;  %v280_v51 = vld [vmem:[%s1463_s30 + $0x1a8] sm:$0xff]  ;;  %v249_v55 = vld [vmem:[%s1463_s30 + $0xb0] sm:$0xff] }
  0x2f   : > { %1304 = vmatprep.mubr.bf16.mxu0 %v499_v28  ;;  %1336 = vmatprep.mubr.bf16.mxu1 %v515_v32  ;;  %v315_v27 = vmul.f32 %v1473_v6, %v244_v12  ;;  %v346_v28 = vmul.f32 %v1473_v6, %v275_v13  ;;  %v502_v30 = vpack.c.bf16 %v444_v2, %v443_v1  ;;  %v250_v2 = vld [vmem:[%s1463_s30 + $0xb8] sm:$0xff]  ;;  %v281_v10 = vld [vmem:[%s1463_s30 + $0x1b0] sm:$0xff] }
  0x30   : > { %v415_v31 = vadd.f32 %v1480_v9, %v344_v11  ;;  %v347_v32 = vmul.f32 %v1473_v6, %v276_v18  ;;  %v316_v33 = vmul.f32 %v1473_v6, %v245_v19  ;;  %v518_v35 = vpack.c.bf16 %v476_v8, %v475_v7 }
  0x31   : > { %v503_v37 = vpack.c.bf16 %v446_v15, %v445_v14  ;;  %v519_v38 = vpack.c.bf16 %v478_v17, %v477_v16  ;;  %v317_v39 = vmul.f32 %v1473_v6, %v246_v24  ;;  %v1607_v42 = vpack.c.bf16 %v448_v21, %v447_v20  ;;  %v282_v15 = vld [vmem:[%s1463_s30 + $0x1b8] sm:$0xff]  ;;  %v251_v20 = vld [vmem:[%s1463_s30 + $0xc0] sm:$0xff]  ;;  %v252_v21 = vld [vmem:[%s1463_s30 + $0xc8] sm:$0xff] }
  0x32   : > { %v416_v43 = vadd.f32 %v1480_v9, %v345_v22  ;;  %v385_v44 = vadd.f32 %v1480_v9, %v314_v23  ;;  %v348_v45 = vmul.f32 %v1473_v6, %v277_v29  ;;  %v386_v47 = vadd.f32 %v1480_v9, %v315_v27 }
  0x33   : > { %v417_v48 = vadd.f32 %v1480_v9, %v346_v28  ;;  %v349_v49 = vmul.f32 %v1473_v6, %v278_v34  ;;  %v479_v52 = vmax.f32 %v415_v31, 0.0  ;;  %v418_v53 = vadd.f32 %v1480_v9, %v347_v32  ;;  %v284_v32 = vld [vmem:[%s1463_s30 + $0x1c8] sm:$0xff] }
  0x34   : > { %v387_v54 = vadd.f32 %v1480_v9, %v316_v33  ;;  %v419_v56 = vadd.f32 %v1480_v9, %v348_v45  ;;  %v319_v58 = vmul.f32 %v1473_v6, %v248_v46  ;;  %v480_v59 = vmax.f32 %v416_v43, 0.0  ;;  %v286_v45 = vld [vmem:[%s1463_s30 + $0x1d8] sm:$0xff] }
  0x35   : > { %v420_v57 = vadd.f32 %v1480_v9, %v349_v49  ;;  %v350_v61 = vmul.f32 %v1473_v6, %v279_v50  ;;  %v351_v62 = vmul.f32 %v1473_v6, %v280_v51  ;;  %v449_v63 = vmax.f32 %v385_v44, 0.0  ;;  %v255_v50 = vld [vmem:[%s1463_s30 + $0xe0] sm:$0xff] }
  0x36   : > { %1305 = vmatmul.mubr.bf16.gmra.mrb[4].mxu0 %v1558_v36  ;;  %1337 = vmatmul.mubr.bf16.gmra.mrb[4].mxu1 %v1564_v41  ;;  %v318_v36 = vmul.f32 %v1473_v6, %v247_v40  ;;  %v388_v41 = vadd.f32 %v1480_v9, %v317_v39  ;;  %v450_v0 = vmax.f32 %v386_v47, 0.0  ;;  %v390_v1 = vadd.f32 %v1480_v9, %v319_v58  ;;  %v287_v58 = vld [vmem:[%s1463_s30 + $0x1e0] sm:$0xff] }
  0x37   : > { %1308 = vmatprep.mubr.bf16.mxu0 %v501_v25  ;;  %1340 = vmatprep.mubr.bf16.mxu1 %v517_v26  ;;  %v320_v3 = vmul.f32 %v1473_v6, %v249_v55  ;;  %v481_v4 = vmax.f32 %v417_v48, 0.0  ;;  %v482_v5 = vmax.f32 %v418_v53, 0.0  ;;  %v421_v7 = vadd.f32 %v1480_v9, %v350_v61  ;;  %v283_v25 = vld [vmem:[%s1463_s30 + $0x1c0] sm:$0xff]  ;;  %v253_v26 = vld [vmem:[%s1463_s30 + $0xd0] sm:$0xff] }
  0x38   : > { %v389_v60 = vadd.f32 %v1480_v9, %v318_v36  ;;  %v422_v8 = vadd.f32 %v1480_v9, %v351_v62  ;;  %v451_v11 = vmax.f32 %v387_v54, 0.0  ;;  %v452_v12 = vmax.f32 %v388_v41, 0.0  ;;  %v256_v36 = vld [vmem:[%s1463_s30 + $0xe8] sm:$0xff] }
  0x39   : > { %v483_v13 = vmax.f32 %v419_v56, 0.0  ;;  %v484_v14 = vmax.f32 %v420_v57, 0.0  ;;  %v520_v16 = vpack.c.bf16 %v480_v59, %v479_v52  ;;  %v454_v18 = vmax.f32 %v390_v1, 0.0  ;;  %v288_v59 = vld [vmem:[%s1463_s30 + $0x1e8] sm:$0xff] }
  0x3a   : > { %v453_v17 = vmax.f32 %v389_v60, 0.0  ;;  %v321_v19 = vmul.f32 %v1473_v6, %v250_v2  ;;  %v505_v22 = vpack.c.bf16 %v450_v0, %v449_v63  ;;  %v1642_v23 = vadd.f32 %v1480_v9, %v320_v3  ;;  %v257_v0 = vld [vmem:[%s1463_s30 + $0xf0] sm:$0xff] }
  0x3b   : > { %v352_v24 = vmul.f32 %v1473_v6, %v281_v10  ;;  %v521_v27 = vpack.c.bf16 %v482_v5, %v481_v4  ;;  %v485_v28 = vmax.f32 %v421_v7, 0.0  ;;  %v486_v29 = vmax.f32 %v422_v8, 0.0  ;;  %v258_v5 = vld [vmem:[%s1463_s30 + $0xf8] sm:$0xff] }
  0x3c   : > { %v353_v31 = vmul.f32 %v1473_v6, %v282_v15  ;;  %v1650_v33 = vpack.c.bf16 %v452_v12, %v451_v11  ;;  %v1652_v34 = vpack.c.bf16 %v484_v14, %v483_v13  ;;  %v323_v39 = vmul.f32 %v1473_v6, %v252_v21 }
  0x3d   : > { %v1660_v40 = vadd.f32 %v1480_v9, %v321_v19  ;;  %v354_v43 = vmul.f32 %v1473_v6, %v283_v25  ;;  %v324_v44 = vmul.f32 %v1473_v6, %v253_v26  ;;  %v455_v46 = vmax.f32 %v1642_v23, 0.0 }
  0x3e   : > { %1309 = vmatmul.mubr.bf16.gmra.mrb[8].mxu0 %v502_v30  ;;  %1341 = vmatmul.mubr.bf16.gmra.mrb[8].mxu1 %v518_v35  ;;  %v254_v30 = vld [vmem:[%s1463_s30 + $0xd8] sm:$0xff]  ;;  %v322_v35 = vmul.f32 %v1473_v6, %v251_v20  ;;  %v1667_v47 = vadd.f32 %v1480_v9, %v352_v24  ;;  %v355_v48 = vmul.f32 %v1473_v6, %v284_v32 }
  0x3f   : > { %1312 = vmatprep.mubr.bf16.mxu0 %v503_v37  ;;  %1344 = vmatprep.mubr.bf16.mxu1 %v519_v38  ;;  %v285_v37 = vld [vmem:[%s1463_s30 + $0x1d0] sm:$0xff]  ;;  %v1657_v38 = vpack.c.bf16 %v454_v18, %v453_v17  ;;  %v325_v49 = vmul.f32 %v1473_v6, %v254_v30  ;;  %v523_v51 = vpack.c.bf16 %v486_v29, %v485_v28 }
  0x40   : > { %v1673_v52 = vadd.f32 %v1480_v9, %v353_v31  ;;  %v395_v53 = vadd.f32 %v1480_v9, %v324_v44  ;;  %v356_v54 = vmul.f32 %v1473_v6, %v285_v37  ;;  %v1679_v55 = vadd.f32 %v1480_v9, %v322_v35 }
  0x41   : > { %v1682_v41 = vadd.f32 %v1480_v9, %v323_v39  ;;  %v396_v56 = vadd.f32 %v1480_v9, %v325_v49  ;;  %v357_v57 = vmul.f32 %v1473_v6, %v286_v45  ;;  %v425_v60 = vadd.f32 %v1480_v9, %v354_v43 }
  0x42   : > { %v459_v61 = vmax.f32 %v395_v53, 0.0  ;;  %v427_v62 = vadd.f32 %v1480_v9, %v356_v54  ;;  %v326_v63 = vmul.f32 %v1473_v6, %v255_v50  ;;  %v426_v1 = vadd.f32 %v1480_v9, %v355_v48 }
  0x43   : > { %v460_v2 = vmax.f32 %v396_v56, 0.0  ;;  %v428_v3 = vadd.f32 %v1480_v9, %v357_v57  ;;  %v327_v4 = vmul.f32 %v1473_v6, %v256_v36  ;;  %v358_v10 = vmul.f32 %v1473_v6, %v287_v58 }
  0x44   : > { %v491_v7 = vmax.f32 %v427_v62, 0.0  ;;  %v397_v8 = vadd.f32 %v1480_v9, %v326_v63  ;;  %v359_v11 = vmul.f32 %v1473_v6, %v288_v59  ;;  %v328_v15 = vmul.f32 %v1473_v6, %v257_v0 }
  0x45   : > { %v510_v12 = vpack.c.bf16 %v460_v2, %v459_v61  ;;  %v492_v13 = vmax.f32 %v428_v3, 0.0  ;;  %v398_v14 = vadd.f32 %v1480_v9, %v327_v4  ;;  %v429_v18 = vadd.f32 %v1480_v9, %v358_v10 }
  0x46   : > { %1313 = vmatmul.mubr.bf16.gmra.mrb[12].mxu0 %v1607_v42  ;;  %1345 = vmatmul.mubr.bf16.gmra.mrb[12].mxu1 %v520_v16  ;;  %v289_v42 = vld [vmem:[%s1463_s30 + $0x1f0] sm:$0xff]  ;;  %v290_v16 = vld [vmem:[%s1463_s30 + $0x1f8] sm:$0xff]  ;;  %v461_v17 = vmax.f32 %v397_v8, 0.0  ;;  %v430_v19 = vadd.f32 %v1480_v9, %v359_v11  ;;  %v329_v20 = vmul.f32 %v1473_v6, %v258_v5  ;;  %v399_v24 = vadd.f32 %v1480_v9, %v328_v15 }
  0x47   : > { %1316 = vmatprep.mubr.bf16.mxu0 %v505_v22  ;;  %1348 = vmatprep.mubr.bf16.mxu1 %v521_v27  ;;  %v526_v21 = vpack.c.bf16 %v492_v13, %v491_v7  ;;  %v462_v22 = vmax.f32 %v398_v14, 0.0  ;;  %v360_v25 = vmul.f32 %v1473_v6, %v289_v42  ;;  %v493_v26 = vmax.f32 %v429_v18, 0.0 }
  0x48   : > { %v494_v27 = vmax.f32 %v430_v19, 0.0  ;;  %v400_v28 = vadd.f32 %v1480_v9, %v329_v20  ;;  %v361_v29 = vmul.f32 %v1473_v6, %v290_v16  ;;  %v456_v31 = vmax.f32 %v1660_v40, 0.0 }
  0x49   : > { %v511_v32 = vpack.c.bf16 %v462_v22, %v461_v17  ;;  %v463_v30 = vmax.f32 %v399_v24, 0.0  ;;  %v431_v35 = vadd.f32 %v1480_v9, %v360_v25  ;;  %v487_v39 = vmax.f32 %v1667_v47, 0.0 }
  0x4a   : > { %v527_v37 = vpack.c.bf16 %v494_v27, %v493_v26  ;;  %v464_v43 = vmax.f32 %v400_v28, 0.0  ;;  %v432_v44 = vadd.f32 %v1480_v9, %v361_v29  ;;  %v488_v45 = vmax.f32 %v1673_v52, 0.0 }
  0x4b   : > { %v457_v6 = vmax.f32 %v1679_v55, 0.0  ;;  %v458_v40 = vmax.f32 %v1682_v41, 0.0  ;;  %v495_v48 = vmax.f32 %v431_v35, 0.0  ;;  %v489_v49 = vmax.f32 %v425_v60, 0.0 }
  0x4c   : > { %v490_v47 = vmax.f32 %v426_v1, 0.0  ;;  %v512_v50 = vpack.c.bf16 %v464_v43, %v463_v30  ;;  %v496_v53 = vmax.f32 %v432_v44, 0.0 }
  0x4d   : > { %v509_v54 = vpack.c.bf16 %v458_v40, %v457_v6 }
  0x4e   : > { %1317 = vmatmul.mubr.bf16.gmra.mrb[16].mxu0 %v1650_v33  ;;  %1349 = vmatmul.mubr.bf16.gmra.mrb[16].mxu1 %v1652_v34  ;;  %v528_v9 = vpack.c.bf16 %v496_v53, %v495_v48  ;;  %v508_v33 = vpack.c.bf16 %v456_v31, %v455_v46  ;;  %v524_v34 = vpack.c.bf16 %v488_v45, %v487_v39 }
  0x4f   : > { %1320 = vmatprep.mubr.bf16.mxu0 %v1657_v38  ;;  %1352 = vmatprep.mubr.bf16.mxu1 %v523_v51  ;;  %v525_v52 = vpack.c.bf16 %v490_v47, %v489_v49 }
  0x56   : > { %1321 = vmatmul.mubr.bf16.gmra.mrb[20].mxu0 %v508_v33  ;;  %1353 = vmatmul.mubr.bf16.gmra.mrb[20].mxu1 %v524_v34 }
  0x57   : > { %1324 = vmatprep.mubr.bf16.mxu0 %v509_v54  ;;  %1356 = vmatprep.mubr.bf16.mxu1 %v525_v52 }
  0x5e   : > { %1325 = vmatmul.mubr.bf16.gmra.mrb[24].mxu0 %v510_v12  ;;  %1357 = vmatmul.mubr.bf16.gmra.mrb[24].mxu1 %v526_v21 }
  0x5f   : > { %1328 = vmatprep.mubr.bf16.mxu0 %v511_v32  ;;  %1360 = vmatprep.mubr.bf16.mxu1 %v527_v37 }
  0x66   : > { %1329 = vmatmul.mubr.bf16.gmra.mrb[28].mxu0 %v512_v50  ;;  %1361 = vmatmul.mubr.bf16.gmra.mrb[28].mxu1 %v528_v9 }
 0x101   : > { %v1730_v23 = vpop.f32.mrb[0].mxu0  ;;  %v1732_v38 = vpop.f32.mrb[0].mxu1 }
 0x102   : > { %884 = vst [vmem:[%s1728_s25 + $0x10] sm:$0xff] %v1730_v23  ;;  %916 = vst [vmem:[%s1728_s25 + $0x110] sm:$0xff] %v1732_v38  ;;  %v1738_v46 = vpop.f32.mrb[1].mxu0  ;;  %v1740_v51 = vpop.f32.mrb[1].mxu1 }
 0x103   : > { %882 = vst [vmem:[%s1728_s25] sm:$0xff] %v1738_v46  ;;  %914 = vst [vmem:[%s1728_s25 + $0x100] sm:$0xff] %v1740_v51  ;;  %v1746_v36 = vpop.f32.mrb[2].mxu0  ;;  %v1748_v55 = vpop.f32.mrb[2].mxu1 }
 0x104   : > { %885 = vst [vmem:[%s1728_s25 + $0x18] sm:$0xff] %v1746_v36  ;;  %917 = vst [vmem:[%s1728_s25 + $0x118] sm:$0xff] %v1748_v55  ;;  %v1754_v41 = vpop.f32.mrb[3].mxu0  ;;  %v1756_v56 = vpop.f32.mrb[3].mxu1 }
 0x105   : > { %883 = vst [vmem:[%s1728_s25 + $0x8] sm:$0xff] %v1754_v41  ;;  %915 = vst [vmem:[%s1728_s25 + $0x108] sm:$0xff] %v1756_v56 }
 0x109   : > { %v1762_v57 = vpop.f32.mrb[4].mxu0  ;;  %v1764_v58 = vpop.f32.mrb[4].mxu1 }
 0x10a   : > { %888 = vst [vmem:[%s1728_s25 + $0x30] sm:$0xff] %v1762_v57  ;;  %920 = vst [vmem:[%s1728_s25 + $0x130] sm:$0xff] %v1764_v58  ;;  %v1770_v59 = vpop.f32.mrb[5].mxu0  ;;  %v1772_v60 = vpop.f32.mrb[5].mxu1 }
 0x10b   : > { %886 = vst [vmem:[%s1728_s25 + $0x20] sm:$0xff] %v1770_v59  ;;  %918 = vst [vmem:[%s1728_s25 + $0x120] sm:$0xff] %v1772_v60  ;;  %v1778_v61 = vpop.f32.mrb[6].mxu0  ;;  %v1780_v62 = vpop.f32.mrb[6].mxu1 }
 0x10c   : > { %889 = vst [vmem:[%s1728_s25 + $0x38] sm:$0xff] %v1778_v61  ;;  %921 = vst [vmem:[%s1728_s25 + $0x138] sm:$0xff] %v1780_v62  ;;  %v1786_v63 = vpop.f32.mrb[7].mxu0  ;;  %v1788_v0 = vpop.f32.mrb[7].mxu1 }
 0x10d   : > { %887 = vst [vmem:[%s1728_s25 + $0x28] sm:$0xff] %v1786_v63  ;;  %919 = vst [vmem:[%s1728_s25 + $0x128] sm:$0xff] %v1788_v0 }
 0x111   : > { %v1794_v1 = vpop.f32.mrb[8].mxu0  ;;  %v1796_v2 = vpop.f32.mrb[8].mxu1 }
 0x112   : > { %892 = vst [vmem:[%s1728_s25 + $0x50] sm:$0xff] %v1794_v1  ;;  %924 = vst [vmem:[%s1728_s25 + $0x150] sm:$0xff] %v1796_v2  ;;  %v1802_v3 = vpop.f32.mrb[9].mxu0  ;;  %v1804_v4 = vpop.f32.mrb[9].mxu1 }
 0x113   : > { %890 = vst [vmem:[%s1728_s25 + $0x40] sm:$0xff] %v1802_v3  ;;  %922 = vst [vmem:[%s1728_s25 + $0x140] sm:$0xff] %v1804_v4  ;;  %v1810_v5 = vpop.f32.mrb[10].mxu0  ;;  %v1812_v7 = vpop.f32.mrb[10].mxu1 }
 0x114   : > { %893 = vst [vmem:[%s1728_s25 + $0x58] sm:$0xff] %v1810_v5  ;;  %925 = vst [vmem:[%s1728_s25 + $0x158] sm:$0xff] %v1812_v7  ;;  %v1818_v8 = vpop.f32.mrb[11].mxu0  ;;  %v1820_v10 = vpop.f32.mrb[11].mxu1 }
 0x115   : > { %891 = vst [vmem:[%s1728_s25 + $0x48] sm:$0xff] %v1818_v8  ;;  %923 = vst [vmem:[%s1728_s25 + $0x148] sm:$0xff] %v1820_v10 }
 0x119   : > { %v1826_v11 = vpop.f32.mrb[12].mxu0  ;;  %v1828_v42 = vpop.f32.mrb[12].mxu1 }
 0x11a   : > { %896 = vst [vmem:[%s1728_s25 + $0x70] sm:$0xff] %v1826_v11  ;;  %928 = vst [vmem:[%s1728_s25 + $0x170] sm:$0xff] %v1828_v42  ;;  %v1834_v12 = vpop.f32.mrb[13].mxu0  ;;  %v1836_v13 = vpop.f32.mrb[13].mxu1 }
 0x11b   : > { %894 = vst [vmem:[%s1728_s25 + $0x60] sm:$0xff] %v1834_v12  ;;  %926 = vst [vmem:[%s1728_s25 + $0x160] sm:$0xff] %v1836_v13  ;;  %v1842_v14 = vpop.f32.mrb[14].mxu0  ;;  %v1844_v15 = vpop.f32.mrb[14].mxu1 }
 0x11c   : > { %897 = vst [vmem:[%s1728_s25 + $0x78] sm:$0xff] %v1842_v14  ;;  %929 = vst [vmem:[%s1728_s25 + $0x178] sm:$0xff] %v1844_v15  ;;  %v1850_v16 = vpop.f32.mrb[15].mxu0  ;;  %v1852_v17 = vpop.f32.mrb[15].mxu1 }
 0x11d   : > { %895 = vst [vmem:[%s1728_s25 + $0x68] sm:$0xff] %v1850_v16  ;;  %927 = vst [vmem:[%s1728_s25 + $0x168] sm:$0xff] %v1852_v17 }
 0x121   : > { %v1858_v18 = vpop.f32.mrb[16].mxu0  ;;  %v1860_v19 = vpop.f32.mrb[16].mxu1 }
 0x122   : > { %900 = vst [vmem:[%s1728_s25 + $0x90] sm:$0xff] %v1858_v18  ;;  %932 = vst [vmem:[%s1728_s25 + $0x190] sm:$0xff] %v1860_v19  ;;  %v1866_v20 = vpop.f32.mrb[17].mxu0  ;;  %v1868_v21 = vpop.f32.mrb[17].mxu1 }
 0x123   : > { %898 = vst [vmem:[%s1728_s25 + $0x80] sm:$0xff] %v1866_v20  ;;  %930 = vst [vmem:[%s1728_s25 + $0x180] sm:$0xff] %v1868_v21  ;;  %v1874_v22 = vpop.f32.mrb[18].mxu0  ;;  %v1876_v24 = vpop.f32.mrb[18].mxu1 }
 0x124   : > { %901 = vst [vmem:[%s1728_s25 + $0x98] sm:$0xff] %v1874_v22  ;;  %933 = vst [vmem:[%s1728_s25 + $0x198] sm:$0xff] %v1876_v24  ;;  %v1882_v25 = vpop.f32.mrb[19].mxu0  ;;  %v1884_v26 = vpop.f32.mrb[19].mxu1 }
 0x125   : > { %899 = vst [vmem:[%s1728_s25 + $0x88] sm:$0xff] %v1882_v25  ;;  %931 = vst [vmem:[%s1728_s25 + $0x188] sm:$0xff] %v1884_v26 }
 0x129   : > { %v1890_v27 = vpop.f32.mrb[20].mxu0  ;;  %v1892_v28 = vpop.f32.mrb[20].mxu1 }
 0x12a   : > { %2222 = vst [vmem:[#allocation2_spill] sm:$0xff] %v1892_v28  ;;  %904 = vst [vmem:[%s1728_s25 + $0xb0] sm:$0xff] %v1890_v27  ;;  %v1898_v29 = vpop.f32.mrb[21].mxu0  ;;  %v1900_v31 = vpop.f32.mrb[21].mxu1 }
 0x12b   : > { %936 = vst [vmem:[%s1728_s25 + $0x1b0] sm:$0xff] %v1892_v28  ;;  %2223 = vst [vmem:[#allocation3_spill] sm:$0xff] %v1900_v31  ;;  %v1906_v32 = vpop.f32.mrb[22].mxu0  ;;  %v1908_v30 = vpop.f32.mrb[22].mxu1 }
 0x12c   : > { %902 = vst [vmem:[%s1728_s25 + $0xa0] sm:$0xff] %v1898_v29  ;;  %934 = vst [vmem:[%s1728_s25 + $0x1a0] sm:$0xff] %v1900_v31  ;;  %v1914_v35 = vpop.f32.mrb[23].mxu0  ;;  %v1916_v39 = vpop.f32.mrb[23].mxu1 }
 0x12d   : > { %2224 = vst [vmem:[#allocation4_spill] sm:$0xff] %v1908_v30  ;;  %905 = vst [vmem:[%s1728_s25 + $0xb8] sm:$0xff] %v1906_v32 }
 0x12e   : > { %937 = vst [vmem:[%s1728_s25 + $0x1b8] sm:$0xff] %v1908_v30  ;;  %2225 = vst [vmem:[#allocation5_spill] sm:$0xff] %v1916_v39 }
 0x12f   : > { %903 = vst [vmem:[%s1728_s25 + $0xa8] sm:$0xff] %v1914_v35  ;;  %935 = vst [vmem:[%s1728_s25 + $0x1a8] sm:$0xff] %v1916_v39 }
 0x131   : > { %v1922_v37 = vpop.f32.mrb[24].mxu0  ;;  %v1924_v43 = vpop.f32.mrb[24].mxu1 }
 0x132   : > { %2226 = vst [vmem:[#allocation6_spill] sm:$0xff] %v1924_v43  ;;  %908 = vst [vmem:[%s1728_s25 + $0xd0] sm:$0xff] %v1922_v37  ;;  %v1930_v44 = vpop.f32.mrb[25].mxu0  ;;  %v1932_v45 = vpop.f32.mrb[25].mxu1 }
 0x133   : > { %940 = vst [vmem:[%s1728_s25 + $0x1d0] sm:$0xff] %v1924_v43  ;;  %2227 = vst [vmem:[#allocation7_spill] sm:$0xff] %v1932_v45  ;;  %v1938_v6 = vpop.f32.mrb[26].mxu0  ;;  %v1940_v40 = vpop.f32.mrb[26].mxu1 }
 0x134   : > { %906 = vst [vmem:[%s1728_s25 + $0xc0] sm:$0xff] %v1930_v44  ;;  %938 = vst [vmem:[%s1728_s25 + $0x1c0] sm:$0xff] %v1932_v45  ;;  %v1946_v48 = vpop.f32.mrb[27].mxu0  ;;  %v1948_v49 = vpop.f32.mrb[27].mxu1 }
 0x135   : > { %2228 = vst [vmem:[#allocation8_spill] sm:$0xff] %v1940_v40  ;;  %909 = vst [vmem:[%s1728_s25 + $0xd8] sm:$0xff] %v1938_v6 }
 0x136   : > { %941 = vst [vmem:[%s1728_s25 + $0x1d8] sm:$0xff] %v1940_v40  ;;  %2229 = vst [vmem:[#allocation9_spill] sm:$0xff] %v1948_v49 }
 0x137   : > { %907 = vst [vmem:[%s1728_s25 + $0xc8] sm:$0xff] %v1946_v48  ;;  %939 = vst [vmem:[%s1728_s25 + $0x1c8] sm:$0xff] %v1948_v49 }
 0x139   : > { %v1954_v47 = vpop.f32.mrb[28].mxu0  ;;  %v1956_v50 = vpop.f32.mrb[28].mxu1  ;;  %949 = sbr.rel (%p1241_p4) target bundleno = 321 (0x141), region = 40 }
 0x13a   : > { %2230 = vst [vmem:[#allocation10_spill] sm:$0xff] %v1956_v50  ;;  %912 = vst [vmem:[%s1728_s25 + $0xf0] sm:$0xff] %v1954_v47  ;;  %v1962_v53 = vpop.f32.mrb[29].mxu0  ;;  %v1964_v9 = vpop.f32.mrb[29].mxu1 }
 0x13b   : > { %944 = vst [vmem:[%s1728_s25 + $0x1f0] sm:$0xff] %v1956_v50  ;;  %2231 = vst [vmem:[#allocation11_spill] sm:$0xff] %v1964_v9  ;;  %v1970_v33 = vpop.f32.mrb[30].mxu0  ;;  %v1972_v34 = vpop.f32.mrb[30].mxu1  ;;  %v1405_v50 = vmov (!%p1241_p4), 0.0  }
 0x13c   : > { %910 = vst [vmem:[%s1728_s25 + $0xe0] sm:$0xff] %v1962_v53  ;;  %942 = vst [vmem:[%s1728_s25 + $0x1e0] sm:$0xff] %v1964_v9  ;;  %v1978_v54 = vpop.f32.mrb[31].mxu0  ;;  %v1980_v52 = vpop.f32.mrb[31].mxu1 }
 0x13d   : > { %2232 = vst [vmem:[#allocation12_spill] sm:$0xff] %v1972_v34  ;;  %913 = vst [vmem:[%s1728_s25 + $0xf8] sm:$0xff] %v1970_v33 }
 0x13e   : > { %945 = vst [vmem:[%s1728_s25 + $0x1f8] sm:$0xff] %v1972_v34  ;;  %2233 = vst [vmem:[#allocation13_spill] sm:$0xff] %v1980_v52 }
 0x13f   : > { %911 = vst [vmem:[%s1728_s25 + $0xe8] sm:$0xff] %v1978_v54  ;;  %943 = vst [vmem:[%s1728_s25 + $0x1e8] sm:$0xff] %v1980_v52 }
 0x140   : > { %950 = vst [vmem:[%s2197_s5] sm:$0xff] %v1405_v50 }
 0x141 PF: > { %v952_v34 = vadd.f32 %v1754_v41, %v1738_v46  ;;  %v1021_v50 = vmul.f32 %v1738_v46, %v1738_v46  ;;  %v1022_v28 = vmul.f32 %v1754_v41, %v1754_v41  ;;  %v1026_v41 = vmul.f32 %v1786_v63, %v1786_v63 }
 0x142   : > { %vm1154_vm0 = vcmask 1040384   ;;  %vm1156_vm1 = vcmask 1041408  }
 0x143   : > { %v953_v9 = vadd.f32 %v1730_v23, %v952_v34 }
 0x145   : > { %v954_v40 = vadd.f32 %v1746_v36, %v953_v9  ;;  %v1023_v9 = vmul.f32 %v1730_v23, %v1730_v23 }
 0x147   : > { %v955_v43 = vadd.f32 %v954_v40, %v1770_v59 }
 0x149   : > { %v956_v52 = vadd.f32 %v955_v43, %v1786_v63  ;;  %v1024_v43 = vmul.f32 %v1746_v36, %v1746_v36 }
 0x14b   : > { %v957_v49 = vadd.f32 %v1762_v57, %v956_v52  ;;  %v1085_v52 = vadd.f32 %v1022_v28, %v1021_v50  ;;  %v1028_v28 = vmul.f32 %v1778_v61, %v1778_v61 }
 0x14d   : > { %v958_v45 = vadd.f32 %v1778_v61, %v957_v49  ;;  %v1086_v46 = vadd.f32 %v1085_v52, %v1023_v9  ;;  %v1029_v9 = vmul.f32 %v1802_v3, %v1802_v3  ;;  %v1031_v52 = vmul.f32 %v1794_v1, %v1794_v1 }
 0x14f   : > { %v959_v30 = vadd.f32 %v958_v45, %v1802_v3  ;;  %v1025_v45 = vmul.f32 %v1770_v59, %v1770_v59 }
 0x151   : > { %v960_v34 = vadd.f32 %v959_v30, %v1818_v8  ;;  %v1087_v30 = vadd.f32 %v1086_v46, %v1024_v43  ;;  %v1033_v46 = vmul.f32 %v1834_v12, %v1834_v12 }
 0x153   : > { %v961_v40 = vadd.f32 %v1794_v1, %v960_v34  ;;  %v1027_v34 = vmul.f32 %v1762_v57, %v1762_v57  ;;  %v1088_v31 = vadd.f32 %v1087_v30, %v1025_v45  ;;  %v1034_v30 = vmul.f32 %v1850_v16, %v1850_v16 }
 0x155   : > { %v962_v49 = vadd.f32 %v1810_v5, %v961_v40  ;;  %v1089_v50 = vadd.f32 %v1088_v31, %v1026_v41  ;;  %v1032_v31 = vmul.f32 %v1810_v5, %v1810_v5 }
 0x157   : > { %v963_v39 = vadd.f32 %v962_v49, %v1834_v12  ;;  %v1090_v40 = vadd.f32 %v1089_v50, %v1027_v34  ;;  %v1035_v34 = vmul.f32 %v1826_v11, %v1826_v11 }
 0x159   : > { %v964_v23 = vadd.f32 %v963_v39, %v1850_v16  ;;  %v1030_v39 = vmul.f32 %v1818_v8, %v1818_v8  ;;  %v1091_v43 = vadd.f32 %v1090_v40, %v1028_v28  ;;  %v1036_v28 = vmul.f32 %v1842_v14, %v1842_v14 }
 0x15a   : > { %v1038_v40 = vmul.f32 %v1882_v25, %v1882_v25 }
 0x15b   : > { %v965_v36 = vadd.f32 %v1826_v11, %v964_v23  ;;  %v1092_v49 = vadd.f32 %v1091_v43, %v1029_v9 }
 0x15d   : > { %v966_v59 = vadd.f32 %v1842_v14, %v965_v36  ;;  %v1093_v45 = vadd.f32 %v1092_v49, %v1030_v39  ;;  %v1039_v39 = vmul.f32 %v1858_v18, %v1858_v18  ;;  %v1041_v49 = vmul.f32 %v1898_v29, %v1898_v29 }
 0x15f   : > { %v967_v63 = vadd.f32 %v966_v59, %v1866_v20  ;;  %v1094_v41 = vadd.f32 %v1093_v45, %v1031_v52  ;;  %v1037_v59 = vmul.f32 %v1866_v20, %v1866_v20 }
 0x161   : > { %v968_v57 = vadd.f32 %v967_v63, %v1882_v25  ;;  %v1095_v23 = vadd.f32 %v1094_v41, %v1032_v31  ;;  %v1042_v31 = vmul.f32 %v1914_v35, %v1914_v35  ;;  %v1044_v41 = vmul.f32 %v1906_v32, %v1906_v32 }
 0x163   : > { %v969_v61 = vadd.f32 %v1858_v18, %v968_v57  ;;  %v1096_v36 = vadd.f32 %v1095_v23, %v1033_v46  ;;  %v1040_v57 = vmul.f32 %v1874_v22, %v1874_v22 }
 0x165   : > { %v970_v3 = vadd.f32 %v1874_v22, %v969_v61  ;;  %v1097_v50 = vadd.f32 %v1096_v36, %v1034_v30  ;;  %v1045_v30 = vmul.f32 %v1930_v44, %v1930_v44  ;;  %v1047_v36 = vmul.f32 %v1922_v37, %v1922_v37 }
 0x167   : > { %v971_v8 = vadd.f32 %v970_v3, %v1898_v29  ;;  %v1098_v9 = vadd.f32 %v1097_v50, %v1035_v34  ;;  %v1043_v3 = vmul.f32 %v1890_v27, %v1890_v27 }
 0x169   : > { %v972_v1 = vadd.f32 %v971_v8, %v1914_v35  ;;  %v1099_v63 = vadd.f32 %v1098_v9, %v1036_v28  ;;  %v1048_v28 = vmul.f32 %v1938_v6, %v1938_v6  ;;  %v1050_v9 = vmul.f32 %v1978_v54, %v1978_v54 }
 0x16b   : > { %v973_v5 = vadd.f32 %v1890_v27, %v972_v1  ;;  %v1100_v43 = vadd.f32 %v1099_v63, %v1037_v59  ;;  %v1046_v1 = vmul.f32 %v1946_v48, %v1946_v48 }
 0x16d   : > { %v974_v12 = vadd.f32 %v1906_v32, %v973_v5  ;;  %v1101_v52 = vadd.f32 %v1100_v43, %v1038_v40  ;;  %v1051_v40 = vmul.f32 %v1954_v47, %v1954_v47  ;;  %v1053_v43 = vmul.f32 %v1740_v51, %v1740_v51 }
 0x16f   : > { %v975_v16 = vadd.f32 %v974_v12, %v1930_v44  ;;  %v1102_v61 = vadd.f32 %v1101_v52, %v1039_v39  ;;  %v1049_v12 = vmul.f32 %v1962_v53, %v1962_v53 }
 0x171   : > { %v976_v11 = vadd.f32 %v975_v16, %v1946_v48  ;;  %v1103_v45 = vadd.f32 %v1102_v61, %v1040_v57  ;;  %v1054_v57 = vmul.f32 %v1756_v56, %v1756_v56  ;;  %v1056_v61 = vmul.f32 %v1748_v55, %v1748_v55 }
 0x173   : > { %v977_v14 = vadd.f32 %v1922_v37, %v976_v11  ;;  %v1104_v46 = vadd.f32 %v1103_v45, %v1041_v49  ;;  %v1052_v11 = vmul.f32 %v1970_v33, %v1970_v33 }
 0x175   : > { %v978_v20 = vadd.f32 %v1938_v6, %v977_v14  ;;  %v1105_v8 = vadd.f32 %v1104_v46, %v1042_v31  ;;  %v1057_v31 = vmul.f32 %v1772_v60, %v1772_v60  ;;  %v1059_v46 = vmul.f32 %v1764_v58, %v1764_v58 }
 0x177   : > { %v979_v25 = vadd.f32 %v978_v20, %v1962_v53  ;;  %v1106_v23 = vadd.f32 %v1105_v8, %v1043_v3  ;;  %v1055_v20 = vmul.f32 %v1732_v38, %v1732_v38 }
 0x179   : > { %v980_v18 = vadd.f32 %v979_v25, %v1978_v54  ;;  %v1107_v34 = vadd.f32 %v1106_v23, %v1044_v41  ;;  %v1060_v41 = vmul.f32 %v1780_v62, %v1780_v62  ;;  %v1062_v23 = vmul.f32 %v1820_v10, %v1820_v10 }
 0x17b   : > { %v981_v22 = vadd.f32 %v1954_v47, %v980_v18  ;;  %v1108_v5 = vadd.f32 %v1107_v34, %v1045_v30  ;;  %v1058_v18 = vmul.f32 %v1788_v0, %v1788_v0 }
 0x17d   : > { %v982_v29 = vadd.f32 %v1970_v33, %v981_v22  ;;  %v1109_v50 = vadd.f32 %v1108_v5, %v1046_v1  ;;  %v1063_v1 = vmul.f32 %v1796_v2, %v1796_v2  ;;  %v1065_v5 = vmul.f32 %v1836_v13, %v1836_v13 }
 0x17f   : > { %v983_v35 = vadd.f32 %v982_v29, %v1740_v51  ;;  %v1110_v59 = vadd.f32 %v1109_v50, %v1047_v36  ;;  %v1061_v29 = vmul.f32 %v1804_v4, %v1804_v4  ;;  %v1066_v50 = vmul.f32 %v1852_v17, %v1852_v17 }
 0x181   : > { %v984_v27 = vadd.f32 %v983_v35, %v1756_v56  ;;  %v1111_v16 = vadd.f32 %v1110_v59, %v1048_v28  ;;  %v1067_v59 = vmul.f32 %v1828_v42, %v1828_v42 }
 0x183   : > { %v985_v32 = vadd.f32 %v1732_v38, %v984_v27  ;;  %v1112_v63 = vadd.f32 %v1111_v16, %v1049_v12  ;;  %v1064_v27 = vmul.f32 %v1812_v7, %v1812_v7  ;;  %v1068_v16 = vmul.f32 %v1844_v15, %v1844_v15 }
 0x185   : > { %v986_v44 = vadd.f32 %v1748_v55, %v985_v32  ;;  %v1113_v39 = vadd.f32 %v1112_v63, %v1050_v9  ;;  %v1069_v63 = vmul.f32 %v1868_v21, %v1868_v21 }
 0x187   : > { %v987_v48 = vadd.f32 %v986_v44, %v1772_v60  ;;  %v1114_v14 = vadd.f32 %v1113_v39, %v1051_v40  ;;  %v1070_v39 = vmul.f32 %v1884_v26, %v1884_v26 }
 0x189   : > { %v988_v37 = vadd.f32 %v987_v48, %v1788_v0  ;;  %v1115_v52 = vadd.f32 %v1114_v14, %v1052_v11  ;;  %v1071_v14 = vmul.f32 %v1860_v19, %v1860_v19 }
 0x18b   : > { %v989_v6 = vadd.f32 %v1764_v58, %v988_v37  ;;  %v1116_v49 = vadd.f32 %v1115_v52, %v1053_v43  ;;  %v1072_v52 = vmul.f32 %v1876_v24, %v1876_v24 }
 0x18d   : > { %v990_v53 = vadd.f32 %v1780_v62, %v989_v6  ;;  %v1117_v25 = vadd.f32 %v1116_v49, %v1054_v57 }
 0x18f   : > { %v991_v54 = vadd.f32 %v990_v53, %v1804_v4  ;;  %v1118_v45 = vadd.f32 %v1117_v25, %v1055_v20 }
 0x191   : > { %v992_v47 = vadd.f32 %v991_v54, %v1820_v10  ;;  %v1119_v3 = vadd.f32 %v1118_v45, %v1056_v61  ;;  %v2234_v10 = vld [vmem:[#allocation3_spill] sm:$0xff] }
 0x192   : > { %v1073_v49 = vmul.f32 %v2234_v10, %v2234_v10 }
 0x193   : > { %v993_v33 = vadd.f32 %v1796_v2, %v992_v47  ;;  %v1120_v22 = vadd.f32 %v1119_v3, %v1057_v31  ;;  %v2235_v2 = vld [vmem:[#allocation5_spill] sm:$0xff]  ;;  %v2244_v3 = vld [vmem:[#allocation10_spill] sm:$0xff] }
 0x194   : > { %v1074_v25 = vmul.f32 %v2235_v2, %v2235_v2 }
 0x195   : > { %v994_v51 = vadd.f32 %v1812_v7, %v993_v33  ;;  %v1121_v8 = vadd.f32 %v1120_v22, %v1058_v18  ;;  %v2236_v7 = vld [vmem:[#allocation2_spill] sm:$0xff] }
 0x196   : > { %v1075_v45 = vmul.f32 %v2236_v7, %v2236_v7 }
 0x197   : > { %v995_v56 = vadd.f32 %v994_v51, %v1836_v13  ;;  %v1122_v30 = vadd.f32 %v1121_v8, %v1059_v46  ;;  %v2237_v13 = vld [vmem:[#allocation4_spill] sm:$0xff] }
 0x198   : > { %v2245_v8 = vld [vmem:[#allocation12_spill] sm:$0xff] }
 0x199   : > { %v996_v38 = vadd.f32 %v995_v56, %v1852_v17  ;;  %v1123_v35 = vadd.f32 %v1122_v30, %v1060_v41  ;;  %v2238_v17 = vld [vmem:[#allocation7_spill] sm:$0xff] }
 0x19a   : > { %v1077_v46 = vmul.f32 %v2238_v17, %v2238_v17 }
 0x19b   : > { %v997_v55 = vadd.f32 %v1828_v42, %v996_v38  ;;  %v1124_v34 = vadd.f32 %v1123_v35, %v1061_v29  ;;  %v2239_v42 = vld [vmem:[#allocation9_spill] sm:$0xff] }
 0x19d   : > { %v998_v60 = vadd.f32 %v1844_v15, %v997_v55  ;;  %v1125_v36 = vadd.f32 %v1124_v34, %v1062_v23  ;;  %v2240_v15 = vld [vmem:[#allocation6_spill] sm:$0xff]  ;;  %v1078_v55 = vmul.f32 %v2239_v42, %v2239_v42 }
 0x19e   : > { %v1079_v29 = vmul.f32 %v2240_v15, %v2240_v15 }
 0x19f   : > { %v999_v0 = vadd.f32 %v998_v60, %v1868_v21  ;;  %v1126_v32 = vadd.f32 %v1125_v36, %v1063_v1  ;;  %v2241_v21 = vld [vmem:[#allocation8_spill] sm:$0xff]  ;;  %v1083_v36 = vmul.f32 %v2244_v3, %v2244_v3 }
 0x1a1   : > { %v1000_v58 = vadd.f32 %v999_v0, %v1884_v26  ;;  %v1127_v44 = vadd.f32 %v1126_v32, %v1064_v27  ;;  %v2242_v26 = vld [vmem:[#allocation11_spill] sm:$0xff]  ;;  %v1080_v0 = vmul.f32 %v2241_v21, %v2241_v21 }
 0x1a3   : > { %v1001_v62 = vadd.f32 %v1860_v19, %v1000_v58  ;;  %v1128_v48 = vadd.f32 %v1127_v44, %v1065_v5  ;;  %v2243_v19 = vld [vmem:[#allocation13_spill] sm:$0xff]  ;;  %v1081_v58 = vmul.f32 %v2242_v26, %v2242_v26  ;;  %v1084_v5 = vmul.f32 %v2245_v8, %v2245_v8 }
 0x1a4   : > { %v1082_v34 = vmul.f32 %v2243_v19, %v2243_v19 }
 0x1a5   : > { %v1002_v4 = vadd.f32 %v1876_v24, %v1001_v62  ;;  %v1129_v37 = vadd.f32 %v1128_v48, %v1066_v50  ;;  %v1076_v24 = vmul.f32 %v2237_v13, %v2237_v13 }
 0x1a7   : > { %v1003_v28 = vadd.f32 %v1002_v4, %v2234_v10  ;;  %v1130_v6 = vadd.f32 %v1129_v37, %v1067_v59 }
 0x1a9   : > { %v1004_v12 = vadd.f32 %v1003_v28, %v2235_v2  ;;  %v1131_v53 = vadd.f32 %v1130_v6, %v1068_v16 }
 0x1ab   : > { %v1005_v9 = vadd.f32 %v2236_v7, %v1004_v12  ;;  %v1132_v54 = vadd.f32 %v1131_v53, %v1069_v63 }
 0x1ad   : > { %v1006_v40 = vadd.f32 %v2237_v13, %v1005_v9  ;;  %v1133_v47 = vadd.f32 %v1132_v54, %v1070_v39  ;;  %v951_v13 = vld [vmem:[%s2197_s5] sm:$0xff] }
 0x1af   : > { %v1007_v11 = vadd.f32 %v1006_v40, %v2238_v17  ;;  %v1134_v33 = vadd.f32 %v1133_v47, %v1071_v14 }
 0x1b1   : > { %v1008_v43 = vadd.f32 %v1007_v11, %v2239_v42  ;;  %v1135_v51 = vadd.f32 %v1134_v33, %v1072_v52 }
 0x1b3   : > { %v1009_v57 = vadd.f32 %v2240_v15, %v1008_v43  ;;  %v1136_v56 = vadd.f32 %v1135_v51, %v1073_v49 }
 0x1b5   : > { %v1010_v20 = vadd.f32 %v2241_v21, %v1009_v57  ;;  %v1137_v18 = vadd.f32 %v1136_v56, %v1074_v25 }
 0x1b7   : > { %v1011_v61 = vadd.f32 %v1010_v20, %v2242_v26  ;;  %v1138_v22 = vadd.f32 %v1137_v18, %v1075_v45 }
 0x1b9   : > { %v1012_v31 = vadd.f32 %v1011_v61, %v2243_v19  ;;  %v1139_v41 = vadd.f32 %v1138_v22, %v1076_v24 }
 0x1bb   : > { %v1013_v38 = vadd.f32 %v2244_v3, %v1012_v31  ;;  %v1140_v30 = vadd.f32 %v1139_v41, %v1077_v46 }
 0x1bd   : > { %v1014_v60 = vadd.f32 %v2245_v8, %v1013_v38  ;;  %v1141_v23 = vadd.f32 %v1140_v30, %v1078_v55 }
 0x1bf   : > { %v1015_v35 = vrot.slane %v1014_v60, 4  ;;  %v1142_v1 = vadd.f32 %v1141_v23, %v1079_v29 }
 0x1c1   : > { %v1143_v62 = vadd.f32 %v1142_v1, %v1080_v0  ;;  %v1016_v27 = vadd.f32 %v1015_v35, %v1014_v60 }
 0x1c3   : > { %v1144_v4 = vadd.f32 %v1143_v62, %v1081_v58  ;;  %v1017_v10 = vrot.slane %v1016_v27, 2 }
 0x1c5   : > { %v1145_v32 = vadd.f32 %v1144_v4, %v1082_v34  ;;  %v1018_v44 = vadd.f32 %v1017_v10, %v1016_v27 }
 0x1c7   : > { %v1146_v28 = vadd.f32 %v1145_v32, %v1083_v36  ;;  %v1019_v59 = vrot.slane %v1018_v44, 1 }
 0x1c9   : > { %v1147_v50 = vadd.f32 %v1146_v28, %v1084_v5  ;;  %v1020_v9 = vadd.f32 %v1019_v59, %v1018_v44 }
 0x1cb   : > { %v1148_v2 = vrot.slane %v1147_v50, 4 }
 0x1cd   : > { %v1149_v12 = vadd.f32 %v1148_v2, %v1147_v50 }
 0x1cf   : > { %v1150_v48 = vrot.slane %v1149_v12, 2 }
 0x1d1   : > { %v1151_v7 = vadd.f32 %v1150_v48, %v1149_v12 }
 0x1d3   : > { %v1152_v16 = vrot.slane %v1151_v7, 1 }
 0x1d5   : > { %v1153_v37 = vadd.f32 %v1152_v16, %v1151_v7 }
 0x1d7   : > { %v1155_v40 = vsel %vm1154_vm0, %v1020_v9, %v1153_v37 }
 0x1d8   : > { %v1157_v63 = vsel %vm1156_vm1, %v1155_v40, 0.0 }
 0x1d9   : > { %v1158_v6 = vadd.f32 %v1157_v63, %v951_v13 }
 0x1db   : > { %1159 = vst [vmem:[%s2197_s5] sm:$0xff] %v1158_v6 }
 0x1dc PF: > { %s16_s18 = sadd.s32 1, %s1403_s18  }
 0x1dd   : > { %p13_p5 = scmp.ge.s32.totalorder %s16_s18, 4  }
 0x1df   :  { %15 = sbr.rel (!%p13_p5) target bundleno = 1 (0x1), region = 78 }

// kernel: bottleneck_forward.5
= control target key start
LH: loop header
LB: loop body
LE: loop exit
PB: predicated region body
PF: predicated region fallthrough
CT: control target
= control target key end

     0   :  { %s4633_s18 = smov 0   ;;  %s5738_s0 = inlined_call_operand.vmem [shape: f32[4,16,16,128], index: 0, kind: input, shape index: {}]   ;;  %s5739_s1 = inlined_call_operand.vmem [shape: f32[1,128], index: 1, kind: input, shape index: {}]   ;;  %s5740_s2 = inlined_call_operand.vmem [shape: f32[1,128], index: 2, kind: input, shape index: {}]   ;;  %s5741_s3 = inlined_call_operand.vmem [shape: bf16[9,128,128], index: 3, kind: input, shape index: {}]   ;;  %s5742_s4 = inlined_call_operand.vmem [shape: f32[4,16,16,128], index: 4, kind: output, shape index: {0}]   ;;  %s5743_s5 = inlined_call_operand.vmem [shape: f32[8,128], index: 5, kind: output, shape index: {1}]  }
   0x1 LB: > { %s4639_s19 = sadd.s32 4294967295, %s4599_s18   ;;  %p3369_p0 = scmp.ge.s32.totalorder %s4599_s18, 1  ;;  %s4599_s18 = sphi %s4633_s18, %s16_s18  }
   0x2   : > { %p185_p1 = scmp.lt.s32.totalorder %s4599_s18, 5 }
   0x4   : > { %p186_p2 = pnand %p3369_p0, %p185_p1 }
   0x6   : > { %189 = sbr.rel (%p186_p2) target bundleno = 638 (0x27e), region = 36 }
   0xd   : > { %v4511_v0 = vld [vmem:[%s5741_s3 + $0x40] sm:$0xff]   ;;  %v4513_v2 = vld [vmem:[%s5741_s3 + $0x48] sm:$0xff]   ;;  %p213_p3 = scmp.lt.s32.totalorder %s4639_s19, 3  ;;  %v4515_v4 = vld [vmem:[%s5741_s3 + $0x50] sm:$0xff]   ;;  %v4601_v10 = vmov 0   ;;  %vm535_vm0 = vcmask 1040384  }
   0xe   : > { %v4512_v1 = vld [vmem:[%s5741_s3 + $0x100] sm:$0xff]   ;;  %3797 = vmatprep.subr.bf16.mxu1 %v4511_v0  ;;  %v4514_v3 = vld [vmem:[%s5741_s3 + $0x108] sm:$0xff]   ;;  %v4516_v5 = vld [vmem:[%s5741_s3 + $0x110] sm:$0xff]   ;;  %v385_v11 = vrot.slane %v4601_v10, 7  ;;  %vm536_vm1 = vsmask.f32 256 }
   0xf   : > { %3989 = vmatprep.subr.bf16.mxu0 %v4512_v1  ;;  %3798 = vmatpush3.bf16.msra.mxu1 %v4511_v0  ;;  %s4663_s7 = scalar_select %p213_p3, %s4639_s19, 3  ;;  %v4517_v6 = vld [vmem:[%s5741_s3 + $0x58] sm:$0xff]   ;;  %v4519_v8 = vld [vmem:[%s5741_s3 + $0x60] sm:$0xff]   ;;  %v4521_v12 = vld [vmem:[%s5741_s3 + $0x68] sm:$0xff]   ;;  %vm588_vm3 = vsmask.f32 7424 }
  0x10   : > { %3990 = vmatpush3.bf16.msra.mxu0 %v4512_v1  ;;  %3799 = vmatprep.subr.bf16.mxu1 %v4513_v2  ;;  %v4518_v7 = vld [vmem:[%s5741_s3 + $0x118] sm:$0xff]   ;;  %v4520_v9 = vld [vmem:[%s5741_s3 + $0x120] sm:$0xff]   ;;  %v4522_v13 = vld [vmem:[%s5741_s3 + $0x128] sm:$0xff]   ;;  %vm1264_vm4 = vcmask 1046528   ;;  %p3576_p4 = scmp.ne.s32.totalorder %s4639_s19, 0 }
  0x11   : > { %3991 = vmatprep.subr.bf16.mxu0 %v4514_v3  ;;  %s3579_s12 = sshll.u32 %s4663_s7, 8  ;;  %vm4694_vm2 = vmand %vm535_vm0, %vm536_vm1  ;;  %v4701_v17 = vld [vmem:[%s5739_s1] ss:$0 sm:$0xff]  ;;  %v4523_v23 = vld [vmem:[%s5741_s3 + $0x70] sm:$0xff]  }
  0x12   : > { %s4683_s21 = scalar_lea.vmem %s5738_s0, %s3579_s12  ;;  %v4706_v18 = vld [vmem:[%s5740_s2] ss:$0 sm:$0xff]  ;;  %v4710_v19 = vsel %vm4694_vm2, 0, %v385_v11  ;;  %v4714_v20 = vsel %vm4694_vm2, %v385_v11, 0  ;;  %v4524_v29 = vld [vmem:[%s5741_s3 + $0x130] sm:$0xff]   ;;  %v4525_v41 = vld [vmem:[%s5741_s3 + $0x78] sm:$0xff]   ;;  %s5498_s28 = scalar_lea.vmem %s5742_s4, %s3579_s12 }
  0x13   : > { %3800 = vmatpush3.bf16.msra.mxu1 %v4513_v2  ;;  %v224_v14 = vld [vmem:[%s4683_s21] sm:$0xff]  ;;  %v225_v15 = vld [vmem:[%s4683_s21 + $0x8] sm:$0xff]  ;;  %v590_v24 = vshrl.u32 %v4710_v19, 16  ;;  %v592_v25 = vshll.u32 %v4710_v19, 16  ;;  %v597_v26 = vshll.u32 %v4714_v20, 16  ;;  %v226_v27 = vld [vmem:[%s4683_s21 + $0x10] sm:$0xff] }
  0x14   : > { %3992 = vmatpush3.bf16.msra.mxu0 %v4514_v3  ;;  %3801 = vmatprep.subr.bf16.mxu1 %v4515_v4  ;;  %v263_v21 = vmul.f32 %v4701_v17, %v224_v14  ;;  %v264_v22 = vmul.f32 %v4701_v17, %v225_v15  ;;  %v227_v28 = vld [vmem:[%s4683_s21 + $0x18] sm:$0xff]  ;;  %v265_v32 = vmul.f32 %v4701_v17, %v226_v27  ;;  %v228_v39 = vld [vmem:[%s4683_s21 + $0x20] sm:$0xff]  ;;  %v229_v40 = vld [vmem:[%s4683_s21 + $0x28] sm:$0xff] }
  0x15   : > { %3993 = vmatprep.subr.bf16.mxu0 %v4516_v5  ;;  %v594_v33 = vrot.slane %v592_v25, 1  ;;  %v599_v34 = vrot.slane %v597_v26, 1  ;;  %v266_v35 = vmul.f32 %v4701_v17, %v227_v28  ;;  %v267_v44 = vmul.f32 %v4701_v17, %v228_v39  ;;  %v230_v48 = vld [vmem:[%s4683_s21 + $0x30] sm:$0xff]  ;;  %v231_v49 = vld [vmem:[%s4683_s21 + $0x38] sm:$0xff]  ;;  %v232_v59 = vld [vmem:[%s4683_s21 + $0x40] sm:$0xff] }
  0x16   : > { %v302_v30 = vadd.f32 %v4706_v18, %v263_v21  ;;  %v303_v31 = vadd.f32 %v4706_v18, %v264_v22  ;;  %v304_v38 = vadd.f32 %v4706_v18, %v265_v32  ;;  %v268_v45 = vmul.f32 %v4701_v17, %v229_v40  ;;  %v4526_v50 = vld [vmem:[%s5741_s3 + $0x138] sm:$0xff]   ;;  %v233_v63 = vld [vmem:[%s4683_s21 + $0x48] sm:$0xff]  ;;  %v4761_v2 = vld [vmem:[%s5741_s3] sm:$0xff]  }
  0x17   : > { %3802 = vmatpush3.bf16.msra.mxu1 %v4515_v4  ;;  %v595_v42 = vor.u32 %v594_v33, %v590_v24  ;;  %v305_v43 = vadd.f32 %v4706_v18, %v266_v35  ;;  %v306_v53 = vadd.f32 %v4706_v18, %v267_v44  ;;  %v269_v57 = vmul.f32 %v4701_v17, %v230_v48  ;;  %v4766_v3 = vld [vmem:[%s5741_s3 + $0x140] sm:$0xff]   ;;  %v234_v39 = vld [vmem:[%s4683_s21 + $0x50] sm:$0xff] }
  0x18   : > { %3994 = vmatpush3.bf16.msra.mxu0 %v4516_v5  ;;  %3803 = vmatprep.subr.bf16.mxu1 %v4517_v6  ;;  %v334_v36 = vmax.f32 %v302_v30, 0.0  ;;  %v335_v37 = vmax.f32 %v303_v31, 0.0  ;;  %v336_v47 = vmax.f32 %v304_v38, 0.0  ;;  %v307_v54 = vadd.f32 %v4706_v18, %v268_v45  ;;  %v4555_v16 = vld [vmem:[%s5741_s3 + $0xa0] sm:$0xff]  }
  0x19   : > { %3995 = vmatprep.subr.bf16.mxu0 %v4518_v7  ;;  %v4748_v51 = vsel %vm588_vm3, %v595_v42, %v599_v34  ;;  %v337_v52 = vmax.f32 %v305_v43, 0.0  ;;  %v270_v58 = vmul.f32 %v4701_v17, %v231_v49  ;;  %v338_v61 = vmax.f32 %v306_v53, 0.0  ;;  %v235_v53 = vld [vmem:[%s4683_s21 + $0x58] sm:$0xff] }
  0x1a   : > { %v366_v46 = vpack.c.bf16 %v335_v37, %v334_v36  ;;  %5757 = vst [vmem:[#allocation2_spill] sm:$0xff] %v4748_v51  ;;  %3813 = vmatprep.mubr.bf16.mxu1 %v4748_v51  ;;  %v339_v62 = vmax.f32 %v307_v54, 0.0  ;;  %v271_v0 = vmul.f32 %v4701_v17, %v232_v59  ;;  %v308_v4 = vadd.f32 %v4706_v18, %v269_v57 }
  0x1b   : > { %3804 = vmatpush3.bf16.msra.mxu1 %v4517_v6  ;;  %v367_v60 = vpack.c.bf16 %v337_v52, %v336_v47  ;;  %v309_v5 = vadd.f32 %v4706_v18, %v270_v58  ;;  %v272_v6 = vmul.f32 %v4701_v17, %v233_v63  ;;  %v4530_v47 = vld [vmem:[%s5741_s3 + $0x8] sm:$0xff]   ;;  %v273_v54 = vmul.f32 %v4701_v17, %v234_v39  ;;  %v4536_v39 = vld [vmem:[%s5741_s3 + $0x18] sm:$0xff]  }
  0x1c   : > { %3996 = vmatpush3.bf16.msra.mxu0 %v4518_v7  ;;  %3805 = vmatprep.subr.bf16.mxu1 %v4519_v8  ;;  %v390_v55 = vshrl.u32 %v366_v46, 16  ;;  %v393_v56 = vshll.u32 %v366_v46, 16  ;;  %v310_v10 = vadd.f32 %v4706_v18, %v271_v0  ;;  %v236_v0 = vld [vmem:[%s4683_s21 + $0x60] sm:$0xff] }
  0x1d   : > { %3997 = vmatprep.subr.bf16.mxu0 %v4520_v9  ;;  %v397_v7 = vshrl.u32 %v367_v60, 16  ;;  %v341_v14 = vmax.f32 %v309_v5, 0.0  ;;  %v311_v26 = vadd.f32 %v4706_v18, %v272_v6  ;;  %v274_v5 = vmul.f32 %v4701_v17, %v235_v53 }
  0x1e   : > { %v392_v1 = vrot.slane %v390_v55, 7  ;;  %v342_v30 = vmax.f32 %v310_v10, 0.0  ;;  %v312_v6 = vadd.f32 %v4706_v18, %v273_v54 }
  0x1f   : > { %3806 = vmatpush3.bf16.msra.mxu1 %v4519_v8  ;;  %v400_v8 = vshll.u32 %v367_v60, 16  ;;  %v399_v21 = vrot.slane %v397_v7, 7  ;;  %v343_v52 = vmax.f32 %v311_v26, 0.0  ;;  %v313_v26 = vadd.f32 %v4706_v18, %v274_v5 }
  0x20   : > { %3998 = vmatpush3.bf16.msra.mxu0 %v4520_v9  ;;  %3807 = vmatprep.subr.bf16.mxu1 %v4521_v12  ;;  %v368_v9 = vpack.c.bf16 %v339_v62, %v338_v61  ;;  %v395_v11 = vor.u32 %v393_v56, %v392_v1  ;;  %v4529_v56 = vld [vmem:[%s5741_s3 + $0x148] sm:$0xff]  }
  0x21   : > { %3999 = vmatprep.subr.bf16.mxu0 %v4522_v13  ;;  %v4788_v32 = vsel %vm4694_vm2, %v399_v21, 0  ;;  %v370_v63 = vpack.c.bf16 %v343_v52, %v342_v30  ;;  %v4532_v52 = vld [vmem:[%s5741_s3 + $0x158] sm:$0xff]  }
  0x22   : > { %v404_v22 = vshrl.u32 %v368_v9, 16  ;;  %v407_v24 = vshll.u32 %v368_v9, 16  ;;  %v621_v37 = vshll.u32 %v4788_v32, 16 }
  0x23   : > { %3808 = vmatpush3.bf16.msra.mxu1 %v4521_v12  ;;  %v4774_v12 = vsel %vm4694_vm2, %v392_v1, 0  ;;  %v418_v9 = vshrl.u32 %v370_v63, 16  ;;  %v421_v10 = vshll.u32 %v370_v63, 16  ;;  %v1272_v63 = vrot.slane %v4788_v32, 1 }
  0x24   : > { %4000 = vmatpush3.bf16.msra.mxu0 %v4522_v13  ;;  %3809 = vmatprep.subr.bf16.mxu1 %v4523_v23  ;;  %v340_v13 = vmax.f32 %v308_v4, 0.0  ;;  %v609_v15 = vshll.u32 %v4774_v12, 16  ;;  %v406_v33 = vrot.slane %v404_v22, 7  ;;  %v623_v45 = vrot.slane %v621_v37, 1 }
  0x25   : > { %4001 = vmatprep.subr.bf16.mxu0 %v4524_v29  ;;  %v345_v37 = vmax.f32 %v313_v26, 0.0 }
  0x26   : > { %v369_v25 = vpack.c.bf16 %v341_v14, %v340_v13  ;;  %v611_v31 = vrot.slane %v609_v15, 1  ;;  %v409_v42 = vor.u32 %v407_v24, %v406_v33  ;;  %v4800_v43 = vsel %vm4694_vm2, %v406_v33, 0  ;;  %v238_v13 = vld [vmem:[%s4683_s21 + $0x70] sm:$0xff]  ;;  %v239_v24 = vld [vmem:[%s4683_s21 + $0x78] sm:$0xff] }
  0x27   : > { %3810 = vmatpush3.bf16.msra.mxu1 %v4523_v23  ;;  %v4779_v23 = vsel %vm4694_vm2, 0, %v395_v11  ;;  %v633_v46 = vshll.u32 %v4800_v43, 16  ;;  %v237_v11 = vld [vmem:[%s4683_s21 + $0x68] sm:$0xff] }
  0x28   : > { %4002 = vmatpush3.bf16.msra.mxu0 %v4524_v29  ;;  %3811 = vmatprep.subr.bf16.mxu1 %v4525_v41  ;;  %v602_v27 = vshrl.u32 %v4779_v23, 16  ;;  %v604_v28 = vshll.u32 %v4779_v23, 16  ;;  %v402_v29 = vor.u32 %v400_v8, %v399_v21  ;;  %v411_v34 = vshrl.u32 %v369_v25, 16 }
  0x29   : > { %4003 = vmatprep.subr.bf16.mxu0 %v4526_v50  ;;  %v414_v38 = vshll.u32 %v369_v25, 16  ;;  %v635_v59 = vrot.slane %v633_v46, 1  ;;  %v420_v25 = vrot.slane %v418_v9, 7  ;;  %v276_v33 = vmul.f32 %v4701_v17, %v237_v11 }
  0x2a   : > { %v606_v35 = vrot.slane %v604_v28, 1  ;;  %v4792_v36 = vsel %vm4694_vm2, 0, %v402_v29  ;;  %v413_v48 = vrot.slane %v411_v34, 7  ;;  %v275_v28 = vmul.f32 %v4701_v17, %v236_v0 }
  0x2b   : > { %3812 = vmatpush3.bf16.msra.mxu1 %v4525_v41  ;;  %v614_v40 = vshrl.u32 %v4792_v36, 16  ;;  %v616_v41 = vshll.u32 %v4792_v36, 16  ;;  %v423_v34 = vor.u32 %v421_v10, %v420_v25 }
  0x2c   : > { %4004 = vmatpush3.bf16.msra.mxu0 %v4526_v50  ;;  %3845 = vmatprep.subr.bf16.mxu1 %v4761_v2  ;;  %v607_v44 = vor.u32 %v606_v35, %v602_v27  ;;  %v4808_v50 = vsel %vm4694_vm2, 0, %v409_v42  ;;  %v416_v61 = vor.u32 %v414_v38, %v413_v48  ;;  %v4820_v62 = vsel %vm4694_vm2, %v413_v48, 0 }
  0x2d   : > { %4037 = vmatprep.subr.bf16.mxu0 %v4766_v3  ;;  %v618_v49 = vrot.slane %v616_v41, 1  ;;  %v626_v57 = vshrl.u32 %v4808_v50, 16  ;;  %v628_v58 = vshll.u32 %v4808_v50, 16  ;;  %v645_v4 = vshll.u32 %v4820_v62, 16 }
  0x2e   : > { %v612_v55 = vsel %vm588_vm3, %v607_v44, %v611_v31  ;;  %v4832_v8 = vsel %vm4694_vm2, 0, %v416_v61  ;;  %v344_v27 = vmax.f32 %v312_v6, 0.0  ;;  %v4531_v31 = vld [vmem:[%s5741_s3 + $0x150] sm:$0xff]   ;;  %v4858_v35 = vsel %vm4694_vm2, %v420_v25, 0  ;;  %v4539_v61 = vld [vmem:[%s5741_s3 + $0x20] sm:$0xff]  }
  0x2f   : > { %4005 = vmatprep.mubr.bf16.mxu0 %v612_v55  ;;  %3814 = vmatmul.mubr.bf16.vlgmr.msra.gmra.mrb[0].mxu1 %v612_v55  ;;  %v619_v60 = vor.u32 %v618_v49, %v614_v40  ;;  %v630_v1 = vrot.slane %v628_v58, 1  ;;  %v638_v15 = vshrl.u32 %v4832_v8, 16  ;;  %v640_v21 = vshll.u32 %v4832_v8, 16  ;;  %v240_v55 = vld [vmem:[%s4683_s21 + $0x80] sm:$0xff] }
  0x30   : > { %3846 = vmatpush3.bf16.msra.mxu1 %v4761_v2  ;;  %v4533_v2 = vld [vmem:[%s5741_s3 + $0x10] sm:$0xff]   ;;  %v647_v22 = vrot.slane %v645_v4, 1  ;;  %v314_v38 = vadd.f32 %v4706_v18, %v275_v28  ;;  %v657_v41 = vshll.u32 %v4858_v35, 16  ;;  %v315_v42 = vadd.f32 %v4706_v18, %v276_v33  ;;  %v4534_v6 = vld [vmem:[%s5741_s3 + $0x160] sm:$0xff]   ;;  %v4535_v28 = vld [vmem:[%s5741_s3 + $0x168] sm:$0xff]  }
  0x31   : > { %v4828_v7 = vsel %vm588_vm3, %v619_v60, %v623_v45  ;;  %3847 = vmatprep.subr.bf16.mxu1 %v4530_v47  ;;  %v631_v14 = vor.u32 %v630_v1, %v626_v57  ;;  %v642_v30 = vrot.slane %v640_v21, 1  ;;  %v278_v44 = vmul.f32 %v4701_v17, %v239_v24  ;;  %v241_v60 = vld [vmem:[%s4683_s21 + $0x88] sm:$0xff]  ;;  %v243_v33 = vld [vmem:[%s4683_s21 + $0x98] sm:$0xff] }
  0x32   : > { %4006 = vmatmul.mubr.bf16.vlgmr.msra.gmra.mrb[0].mxu0 %v4828_v7  ;;  %3817 = vmatprep.mubr.bf16.mxu1 %v4828_v7  ;;  %v4870_v45 = vsel %vm4694_vm2, 0, %v423_v34  ;;  %v371_v46 = vpack.c.bf16 %v345_v37, %v344_v27  ;;  %v347_v58 = vmax.f32 %v315_v42, 0.0  ;;  %v659_v1 = vrot.slane %v657_v41, 1 }
  0x33   : > { %4038 = vmatpush3.bf16.msra.mxu0 %v4766_v3  ;;  %v4848_v29 = vsel %vm588_vm3, %v631_v14, %v635_v59  ;;  %v277_v3 = vmul.f32 %v4701_v17, %v238_v13  ;;  %v643_v40 = vor.u32 %v642_v30, %v638_v15  ;;  %v650_v53 = vshrl.u32 %v4870_v45, 16 }
  0x34   : > { %4039 = vmatprep.subr.bf16.mxu0 %v4529_v56  ;;  %3848 = vmatpush3.bf16.msra.mxu1 %v4530_v47  ;;  %v346_v47 = vmax.f32 %v314_v38, 0.0  ;;  %v652_v54 = vshll.u32 %v4870_v45, 16  ;;  %v428_v57 = vshll.u32 %v371_v46, 16  ;;  %v317_v59 = vadd.f32 %v4706_v18, %v278_v44 }
  0x35   : > { %4009 = vmatprep.mubr.bf16.mxu0 %v4848_v29  ;;  %3849 = vmatprep.subr.bf16.mxu1 %v4533_v2  ;;  %v316_v48 = vadd.f32 %v4706_v18, %v277_v3  ;;  %v4874_v49 = vsel %vm588_vm3, %v643_v40, %v647_v22  ;;  %v1268_v13 = vrot.slane %v4779_v23, 1  ;;  %v1269_v14 = vrot.slane %v4774_v12, 1  ;;  %v4541_v3 = vld [vmem:[%s5741_s3 + $0x28] sm:$0xff]  }
  0x36   : > { %v654_v0 = vrot.slane %v652_v54, 1  ;;  %v372_v9 = vpack.c.bf16 %v347_v58, %v346_v47  ;;  %v349_v10 = vmax.f32 %v317_v59, 0.0  ;;  %v280_v15 = vmul.f32 %v4701_v17, %v241_v60 }
  0x37   : > { %4040 = vmatpush3.bf16.msra.mxu0 %v4529_v56  ;;  %3818 = vmatmul.mubr.bf16.gmra.mrb[4].mxu1 %v4848_v29  ;;  %v425_v56 = vshrl.u32 %v371_v46, 16  ;;  %v348_v4 = vmax.f32 %v316_v48, 0.0  ;;  %v4936_v58 = vsel %vm1264_vm4, %v1268_v13, %v1269_v14  ;;  %v282_v60 = vmul.f32 %v4701_v17, %v243_v33 }
  0x38   : > { %4041 = vmatprep.subr.bf16.mxu0 %v4531_v31  ;;  %3850 = vmatpush3.bf16.msra.mxu1 %v4533_v2  ;;  %v279_v2 = vmul.f32 %v4701_v17, %v240_v55  ;;  %v655_v11 = vor.u32 %v654_v0, %v650_v53  ;;  %v432_v24 = vshrl.u32 %v372_v9, 16  ;;  %v435_v25 = vshll.u32 %v372_v9, 16  ;;  %v4537_v9 = vld [vmem:[%s5741_s3 + $0x170] sm:$0xff]  }
  0x39   : > { %3821 = vmatprep.mubr.bf16.mxu1 %v4874_v49  ;;  %3851 = vmatprep.subr.bf16.mxu1 %v4536_v39  ;;  %v427_v5 = vrot.slane %v425_v56, 7  ;;  %v373_v12 = vpack.c.bf16 %v349_v10, %v348_v4  ;;  %v319_v38 = vadd.f32 %v4706_v18, %v280_v15  ;;  %v321_v15 = vadd.f32 %v4706_v18, %v282_v60 }
  0x3a   : > { %4010 = vmatmul.mubr.bf16.gmra.mrb[4].mxu0 %v4874_v49  ;;  %v4902_v26 = vsel %vm588_vm3, %v655_v11, %v659_v1  ;;  %v318_v30 = vadd.f32 %v4706_v18, %v279_v2  ;;  %v434_v37 = vrot.slane %v432_v24, 7  ;;  %v4545_v24 = vld [vmem:[%s5741_s3 + $0x38] sm:$0xff]   ;;  %v1275_v60 = vrot.slane %v4800_v43, 1 }
  0x3b   : > { %4042 = vmatpush3.bf16.msra.mxu0 %v4531_v31  ;;  %v430_v21 = vor.u32 %v428_v57, %v427_v5  ;;  %v4899_v22 = vsel %vm4694_vm2, %v427_v5, 0  ;;  %v242_v31 = vld [vmem:[%s4683_s21 + $0x90] sm:$0xff]  ;;  %4013 = vmatprep.mubr.bf16.mxu0 %v4902_v26  ;;  %v439_v42 = vshrl.u32 %v373_v12, 16  ;;  %v442_v47 = vshll.u32 %v373_v12, 16 }
  0x3c   : > { %4043 = vmatprep.subr.bf16.mxu0 %v4532_v52  ;;  %3852 = vmatpush3.bf16.msra.mxu1 %v4536_v39  ;;  %v669_v27 = vshll.u32 %v4899_v22, 16  ;;  %v437_v44 = vor.u32 %v435_v25, %v434_v37  ;;  %v4925_v46 = vsel %vm4694_vm2, %v434_v37, 0  ;;  %v350_v48 = vmax.f32 %v318_v30, 0.0 }
  0x3d   : > { %3853 = vmatprep.subr.bf16.mxu1 %v4539_v61  ;;  %v4917_v34 = vsel %vm4694_vm2, 0, %v430_v21  ;;  %v681_v54 = vshll.u32 %v4925_v46, 16  ;;  %v441_v55 = vrot.slane %v439_v42, 7  ;;  %v351_v56 = vmax.f32 %v319_v38, 0.0  ;;  %v244_v21 = vld [vmem:[%s4683_s21 + $0xa0] sm:$0xff]  ;;  %v4538_v38 = vld [vmem:[%s5741_s3 + $0x178] sm:$0xff]  }
  0x3e   : > { %v662_v39 = vshrl.u32 %v4917_v34, 16  ;;  %v664_v40 = vshll.u32 %v4917_v34, 16  ;;  %v671_v41 = vrot.slane %v669_v27, 1  ;;  %v4933_v57 = vsel %vm4694_vm2, 0, %v437_v44 }
  0x3f   : > { %4044 = vmatpush3.bf16.msra.mxu0 %v4532_v52  ;;  %3822 = vmatmul.mubr.bf16.gmra.mrb[8].mxu1 %v4902_v26  ;;  %v4543_v52 = vld [vmem:[%s5741_s3 + $0x30] sm:$0xff]   ;;  %v281_v59 = vmul.f32 %v4701_v17, %v242_v31  ;;  %v674_v0 = vshrl.u32 %v4933_v57, 16  ;;  %v676_v1 = vshll.u32 %v4933_v57, 16  ;;  %v683_v4 = vrot.slane %v681_v54, 1  ;;  %v245_v31 = vld [vmem:[%s4683_s21 + $0xa8] sm:$0xff] }
  0x40   : > { %4045 = vmatprep.subr.bf16.mxu0 %v4534_v6  ;;  %3854 = vmatpush3.bf16.msra.mxu1 %v4539_v61  ;;  %v666_v53 = vrot.slane %v664_v40, 1  ;;  %v444_v5 = vor.u32 %v442_v47, %v441_v55  ;;  %v374_v10 = vpack.c.bf16 %v351_v56, %v350_v48  ;;  %v1274_v42 = vrot.slane %v4808_v50, 1  ;;  %v4992_v56 = vld [vmem:[%s5741_s3 + $0x180] sm:$0xff]  }
  0x41   : > { %3855 = vmatprep.subr.bf16.mxu1 %v4541_v3  ;;  %v320_v2 = vadd.f32 %v4706_v18, %v281_v59  ;;  %v678_v13 = vrot.slane %v676_v1, 1  ;;  %v283_v44 = vmul.f32 %v4701_v17, %v244_v21  ;;  %v284_v54 = vmul.f32 %v4701_v17, %v245_v31 }
  0x42   : > { %v667_v61 = vor.u32 %v666_v53, %v662_v39  ;;  %v4963_v25 = vsel %vm4694_vm2, 0, %v444_v5  ;;  %v446_v27 = vshrl.u32 %v374_v10, 16  ;;  %v449_v12 = vshll.u32 %v374_v10, 16  ;;  %v246_v5 = vld [vmem:[%s4683_s21 + $0xb0] sm:$0xff] }
  0x43   : > { %4046 = vmatpush3.bf16.msra.mxu0 %v4534_v6  ;;  %v4944_v6 = vsel %vm4694_vm2, %v441_v55, 0  ;;  %v352_v30 = vmax.f32 %v320_v2, 0.0  ;;  %v679_v33 = vor.u32 %v678_v13, %v674_v0  ;;  %v688_v37 = vshll.u32 %v4963_v25, 16 }
  0x44   : > { %4047 = vmatprep.subr.bf16.mxu0 %v4535_v28  ;;  %3856 = vmatpush3.bf16.msra.mxu1 %v4541_v3  ;;  %v4951_v11 = vsel %vm588_vm3, %v667_v61, %v671_v41  ;;  %v693_v14 = vshll.u32 %v4944_v6, 16  ;;  %v686_v3 = vshrl.u32 %v4963_v25, 16  ;;  %v1271_v39 = vrot.slane %v4792_v36, 1 }
  0x45   : > { %3857 = vmatprep.subr.bf16.mxu1 %v4543_v52  ;;  %4014 = vmatmul.mubr.bf16.gmra.mrb[8].mxu0 %v4951_v11  ;;  %v448_v40 = vrot.slane %v446_v27, 7  ;;  %v353_v41 = vmax.f32 %v321_v15, 0.0  ;;  %v4980_v47 = vsel %vm588_vm3, %v679_v33, %v683_v4  ;;  %v690_v48 = vrot.slane %v688_v37, 1  ;;  %v248_v37 = vld [vmem:[%s4683_s21 + $0xc0] sm:$0xff] }
  0x46   : > { %3825 = vmatprep.mubr.bf16.mxu1 %v4951_v11  ;;  %v695_v53 = vrot.slane %v693_v14, 1  ;;  %4017 = vmatprep.mubr.bf16.mxu0 %v4980_v47  ;;  %v322_v1 = vadd.f32 %v4706_v18, %v283_v44  ;;  %v323_v4 = vadd.f32 %v4706_v18, %v284_v54  ;;  %v5006_v2 = vsel %vm1264_vm4, %v1271_v39, %v1272_v63  ;;  %v249_v54 = vld [vmem:[%s4683_s21 + $0xc8] sm:$0xff] }
  0x47   : > { %4048 = vmatpush3.bf16.msra.mxu0 %v4535_v28  ;;  %v4977_v28 = vld [vmem:[%s5741_s3 + $0x80] sm:$0xff]   ;;  %3826 = vmatmul.mubr.bf16.gmra.mrb[12].mxu1 %v4980_v47  ;;  %v451_v55 = vor.u32 %v449_v12, %v448_v40  ;;  %v375_v59 = vpack.c.bf16 %v353_v41, %v352_v30  ;;  %v691_v61 = vor.u32 %v690_v48, %v686_v3  ;;  %v1277_v27 = vrot.slane %v4832_v8, 1 }
  0x48   : > { %4049 = vmatprep.subr.bf16.mxu0 %v4537_v9  ;;  %3858 = vmatpush3.bf16.msra.mxu1 %v4543_v52  ;;  %v4987_v52 = vsel %vm4694_vm2, %v448_v40, 0  ;;  %v5019_v63 = vsel %vm1264_vm4, %v1274_v42, %v1275_v60  ;;  %v355_v12 = vmax.f32 %v323_v4, 0.0  ;;  %v285_v33 = vmul.f32 %v4701_v17, %v246_v5 }
  0x49   : > { %3859 = vmatprep.subr.bf16.mxu1 %v4545_v24  ;;  %v705_v0 = vshll.u32 %v4987_v52, 16  ;;  %v5001_v10 = vsel %vm4694_vm2, 0, %v451_v55  ;;  %v453_v43 = vshrl.u32 %v375_v59, 16  ;;  %v456_v13 = vshll.u32 %v375_v59, 16 }
  0x4a   : > { %v5010_v14 = vsel %vm588_vm3, %v691_v61, %v695_v53  ;;  %v698_v15 = vshrl.u32 %v5001_v10, 16  ;;  %v700_v21 = vshll.u32 %v5001_v10, 16  ;;  %v324_v48 = vadd.f32 %v4706_v18, %v285_v33 }
  0x4b   : > { %4050 = vmatpush3.bf16.msra.mxu0 %v4537_v9  ;;  %v247_v9 = vld [vmem:[%s4683_s21 + $0xb8] sm:$0xff]  ;;  %3829 = vmatprep.mubr.bf16.mxu1 %v5010_v14  ;;  %v455_v32 = vrot.slane %v453_v43, 7  ;;  %v707_v31 = vrot.slane %v705_v0, 1  ;;  %v1280_v61 = vrot.slane %v4870_v45, 1  ;;  %v1281_v4 = vrot.slane %v4858_v35, 1  ;;  %v4542_v43 = vld [vmem:[%s5741_s3 + $0x188] sm:$0xff]  }
  0x4c   : > { %4051 = vmatprep.subr.bf16.mxu0 %v4538_v38  ;;  %3860 = vmatpush3.bf16.msra.mxu1 %v4545_v24  ;;  %v354_v24 = vmax.f32 %v322_v1, 0.0  ;;  %v702_v30 = vrot.slane %v700_v21, 1  ;;  %v286_v3 = vmul.f32 %v4701_v17, %v247_v9  ;;  %v288_v35 = vmul.f32 %v4701_v17, %v249_v54 }
  0x4d   : > { %3893 = vmatprep.subr.bf16.mxu1 %v4977_v28  ;;  %4018 = vmatmul.mubr.bf16.gmra.mrb[12].mxu0 %v5010_v14  ;;  %v458_v39 = vor.u32 %v456_v13, %v455_v32  ;;  %v5028_v40 = vsel %vm4694_vm2, %v455_v32, 0  ;;  %v356_v13 = vmax.f32 %v324_v48, 0.0 }
  0x4e   : > { %4053 = vmatprep.mubr.bf16.mxu0 %v4936_v58  ;;  %v376_v41 = vpack.c.bf16 %v355_v12, %v354_v24  ;;  %v703_v42 = vor.u32 %v702_v30, %v698_v15  ;;  %v717_v44 = vshll.u32 %v5028_v40, 16  ;;  %v325_v53 = vadd.f32 %v4706_v18, %v286_v3  ;;  %v250_v12 = vld [vmem:[%s4683_s21 + $0xd0] sm:$0xff] }
  0x4f   : > { %4052 = vmatpush3.bf16.msra.mxu0 %v4538_v38  ;;  %v1278_v38 = vrot.slane %v4820_v62, 1  ;;  %v5037_v55 = vsel %vm4694_vm2, 0, %v458_v39  ;;  %v287_v15 = vmul.f32 %v4701_v17, %v248_v37  ;;  %v4544_v37 = vld [vmem:[%s5741_s3 + $0x190] sm:$0xff]  }
  0x50   : > { %4085 = vmatprep.subr.bf16.mxu0 %v4992_v56  ;;  %v460_v59 = vshrl.u32 %v376_v41, 16  ;;  %v463_v60 = vshll.u32 %v376_v41, 16  ;;  %v5041_v0 = vsel %vm588_vm3, %v703_v42, %v707_v31  ;;  %v710_v62 = vshrl.u32 %v5037_v55, 16 }
  0x51   : > { %5758 = vst [vmem:[#allocation3_spill] sm:$0xff] %v5041_v0  ;;  %v712_v1 = vshll.u32 %v5037_v55, 16  ;;  %3830 = vmatmul.mubr.bf16.gmra.mrb[16].mxu1 %v5041_v0  ;;  %v357_v9 = vmax.f32 %v325_v53, 0.0  ;;  %v719_v32 = vrot.slane %v717_v44, 1  ;;  %v5052_v24 = vsel %vm1264_vm4, %v1277_v27, %v1278_v38  ;;  %v251_v27 = vld [vmem:[%s4683_s21 + $0xd8] sm:$0xff]  ;;  %v252_v44 = vld [vmem:[%s4683_s21 + $0xe0] sm:$0xff] }
  0x52   : > { %v462_v5 = vrot.slane %v460_v59, 7  ;;  %v326_v3 = vadd.f32 %v4706_v18, %v287_v15  ;;  %v5070_v38 = vsel %vm1264_vm4, %v1280_v61, %v1281_v4  ;;  %v327_v42 = vadd.f32 %v4706_v18, %v288_v35 }
  0x53   : > { %v714_v21 = vrot.slane %v712_v1, 1  ;;  %v377_v33 = vpack.c.bf16 %v357_v9, %v356_v13  ;;  %v290_v13 = vmul.f32 %v4701_v17, %v251_v27  ;;  %v291_v35 = vmul.f32 %v4701_v17, %v252_v44 }
  0x54   : > { %v465_v30 = vor.u32 %v463_v60, %v462_v5  ;;  %v5059_v31 = vsel %vm4694_vm2, %v462_v5, 0  ;;  %v359_v4 = vmax.f32 %v327_v42, 0.0  ;;  %v289_v5 = vmul.f32 %v4701_v17, %v250_v12  ;;  %v4546_v12 = vld [vmem:[%s5741_s3 + $0x198] sm:$0xff]  }
  0x55   : > { %4054 = vmatmul.mubr.bf16.vlgmr.msra.gmra.mrb[0].mxu0 %v5006_v2  ;;  %v715_v39 = vor.u32 %v714_v21, %v710_v62  ;;  %v729_v41 = vshll.u32 %v5059_v31, 16  ;;  %v467_v53 = vshrl.u32 %v377_v33, 16  ;;  %v470_v54 = vshll.u32 %v377_v33, 16 }
  0x56   : > { %4086 = vmatpush3.bf16.msra.mxu0 %v4992_v56  ;;  %4057 = vmatprep.mubr.bf16.mxu0 %v5019_v63  ;;  %v5076_v48 = vsel %vm4694_vm2, 0, %v465_v30  ;;  %v358_v56 = vmax.f32 %v326_v3, 0.0  ;;  %v1283_v62 = vrot.slane %v4917_v34, 1  ;;  %v1284_v21 = vrot.slane %v4899_v22, 1 }
  0x57   : > { %4087 = vmatprep.subr.bf16.mxu0 %v4542_v43  ;;  %v5079_v59 = vsel %vm588_vm3, %v715_v39, %v719_v32  ;;  %v722_v60 = vshrl.u32 %v5076_v48, 16  ;;  %v724_v61 = vshll.u32 %v5076_v48, 16  ;;  %v469_v1 = vrot.slane %v467_v53, 7  ;;  %v253_v32 = vld [vmem:[%s4683_s21 + $0xe8] sm:$0xff] }
  0x58   : > { %5759 = vst [vmem:[#allocation4_spill] sm:$0xff] %v5079_v59  ;;  %3833 = vmatprep.mubr.bf16.mxu1 %v5079_v59  ;;  %v731_v15 = vrot.slane %v729_v41, 1  ;;  %v378_v3 = vpack.c.bf16 %v359_v4, %v358_v56  ;;  %v328_v39 = vadd.f32 %v4706_v18, %v289_v5  ;;  %v329_v22 = vadd.f32 %v4706_v18, %v290_v13  ;;  %v4548_v4 = vld [vmem:[%s5741_s3 + $0x1a0] sm:$0xff]  }
  0x59   : > { %v726_v9 = vrot.slane %v724_v61, 1  ;;  %v472_v30 = vor.u32 %v470_v54, %v469_v1  ;;  %v5092_v33 = vsel %vm4694_vm2, %v469_v1, 0  ;;  %v1286_v41 = vrot.slane %v4933_v57, 1 }
  0x5a   : > { %4088 = vmatpush3.bf16.msra.mxu0 %v4542_v43  ;;  %v741_v43 = vshll.u32 %v5092_v33, 16  ;;  %v474_v44 = vshrl.u32 %v378_v3, 16  ;;  %v477_v53 = vshll.u32 %v378_v3, 16  ;;  %v360_v54 = vmax.f32 %v328_v39, 0.0 }
  0x5b   : > { %4089 = vmatprep.subr.bf16.mxu0 %v4544_v37  ;;  %v727_v27 = vor.u32 %v726_v9, %v722_v60  ;;  %v5104_v42 = vsel %vm4694_vm2, 0, %v472_v30  ;;  %v1287_v1 = vrot.slane %v4925_v46, 1  ;;  %v361_v13 = vmax.f32 %v329_v22, 0.0  ;;  %v5129_v22 = vld [vmem:[%s5740_s2] ss:$0 sm:$0xff] }
  0x5c   : > { %v734_v60 = vshrl.u32 %v5104_v42, 16  ;;  %v736_v61 = vshll.u32 %v5104_v42, 16  ;;  %v476_v5 = vrot.slane %v474_v44, 7  ;;  %v292_v9 = vmul.f32 %v4701_v17, %v253_v32 }
  0x5d   : > { %4058 = vmatmul.mubr.bf16.gmra.mrb[4].mxu0 %v5052_v24  ;;  %v5107_v56 = vsel %vm588_vm3, %v727_v27, %v731_v15  ;;  %v330_v15 = vadd.f32 %v4706_v18, %v291_v35  ;;  %v743_v3 = vrot.slane %v741_v43, 1  ;;  %v5120_v39 = vsel %vm1264_vm4, %v1283_v62, %v1284_v21  ;;  %v4550_v18 = vld [vmem:[%s5741_s3 + $0x1a8] sm:$0xff]  }
  0x5e   : > { %5760 = vst [vmem:[#allocation5_spill] sm:$0xff] %v5107_v56  ;;  %4061 = vmatprep.mubr.bf16.mxu0 %v5070_v38  ;;  %4090 = vmatpush3.bf16.msra.mxu0 %v4544_v37  ;;  %v738_v30 = vrot.slane %v736_v61, 1  ;;  %v479_v37 = vor.u32 %v477_v53, %v476_v5  ;;  %v5124_v46 = vsel %vm4694_vm2, %v476_v5, 0  ;;  %v379_v27 = vpack.c.bf16 %v361_v13, %v360_v54 }
  0x5f   : > { %3834 = vmatmul.mubr.bf16.gmra.mrb[20].mxu1 %v5107_v56  ;;  %4091 = vmatprep.subr.bf16.mxu0 %v4546_v12  ;;  %v331_v17 = vadd.f32 %v5129_v22, %v292_v9  ;;  %v753_v62 = vshll.u32 %v5124_v46, 16  ;;  %v5137_v21 = vsel %vm1264_vm4, %v1286_v41, %v1287_v1  ;;  %v362_v35 = vmax.f32 %v330_v15, 0.0 }
  0x60   : > { %v739_v32 = vor.u32 %v738_v30, %v734_v60  ;;  %v5141_v43 = vsel %vm4694_vm2, 0, %v479_v37  ;;  %v481_v44 = vshrl.u32 %v379_v27, 16  ;;  %v484_v53 = vshll.u32 %v379_v27, 16 }
  0x61   : > { %v363_v54 = vmax.f32 %v331_v17, 0.0  ;;  %v746_v60 = vshrl.u32 %v5141_v43, 16  ;;  %v748_v5 = vshll.u32 %v5141_v43, 16  ;;  %v1289_v1 = vrot.slane %v4963_v25, 1 }
  0x62   : > { %4092 = vmatpush3.bf16.msra.mxu0 %v4546_v12  ;;  %v5144_v61 = vsel %vm588_vm3, %v739_v32, %v743_v3  ;;  %v483_v12 = vrot.slane %v481_v44, 7  ;;  %v1290_v13 = vrot.slane %v4944_v6, 1  ;;  %v755_v15 = vrot.slane %v753_v62, 1  ;;  %v4552_v6 = vld [vmem:[%s5741_s3 + $0x1b0] sm:$0xff]  }
  0x63   : > { %4093 = vmatprep.subr.bf16.mxu0 %v4548_v4  ;;  %5761 = vst [vmem:[#allocation6_spill] sm:$0xff] %v5144_v61  ;;  %3837 = vmatprep.mubr.bf16.mxu1 %v5144_v61  ;;  %v380_v41 = vpack.c.bf16 %v363_v54, %v362_v35  ;;  %v750_v9 = vrot.slane %v748_v5, 1  ;;  %v1292_v30 = vrot.slane %v5001_v10, 1  ;;  %v1293_v3 = vrot.slane %v4987_v52, 1 }
  0x64   : > { %v486_v37 = vor.u32 %v484_v53, %v483_v12  ;;  %v5157_v27 = vsel %vm4694_vm2, %v483_v12, 0  ;;  %v5173_v5 = vsel %vm1264_vm4, %v1289_v1, %v1290_v13 }
  0x65   : > { %4062 = vmatmul.mubr.bf16.gmra.mrb[8].mxu0 %v5120_v39  ;;  %v488_v17 = vshrl.u32 %v380_v41, 16  ;;  %v491_v32 = vshll.u32 %v380_v41, 16  ;;  %v751_v62 = vor.u32 %v750_v9, %v746_v60  ;;  %v765_v35 = vshll.u32 %v5157_v27, 16  ;;  %v4554_v9 = vld [vmem:[%s5741_s3 + $0x1b8] sm:$0xff]  }
  0x66   : > { %4065 = vmatprep.mubr.bf16.mxu0 %v5137_v21  ;;  %4094 = vmatpush3.bf16.msra.mxu0 %v4548_v4  ;;  %v5165_v44 = vsel %vm4694_vm2, 0, %v486_v37  ;;  %v5181_v41 = vsel %vm1264_vm4, %v1292_v30, %v1293_v3  ;;  %v255_v30 = vld [vmem:[%s4683_s21 + $0xf8] sm:$0xff] }
  0x67   : > { %4095 = vmatprep.subr.bf16.mxu0 %v4550_v18  ;;  %v490_v52 = vrot.slane %v488_v17, 7  ;;  %v5168_v4 = vsel %vm588_vm3, %v751_v62, %v755_v15  ;;  %v758_v53 = vshrl.u32 %v5165_v44, 16  ;;  %v760_v54 = vshll.u32 %v5165_v44, 16 }
  0x68   : > { %5762 = vst [vmem:[#allocation7_spill] sm:$0xff] %v5168_v4  ;;  %3838 = vmatmul.mubr.bf16.gmra.mrb[24].mxu1 %v5168_v4  ;;  %v767_v37 = vrot.slane %v765_v35, 1  ;;  %v1295_v17 = vrot.slane %v5037_v55, 1  ;;  %v1296_v35 = vrot.slane %v5028_v40, 1 }
  0x69   : > { %v493_v60 = vor.u32 %v491_v32, %v490_v52  ;;  %v5178_v12 = vsel %vm4694_vm2, %v490_v52, 0  ;;  %v762_v15 = vrot.slane %v760_v54, 1  ;;  %v5202_v52 = vld [vmem:[%s5741_s3 + $0x1c0] sm:$0xff]   ;;  %v1298_v54 = vrot.slane %v5076_v48, 1 }
  0x6a   : > { %4096 = vmatpush3.bf16.msra.mxu0 %v4550_v18  ;;  %v777_v1 = vshll.u32 %v5178_v12, 16  ;;  %v254_v18 = vld [vmem:[%s4683_s21 + $0xf0] sm:$0xff]  ;;  %v5215_v59 = vsel %vm1264_vm4, %v1295_v17, %v1296_v35  ;;  %v1305_v17 = vrot.slane %v5124_v46, 1 }
  0x6b   : > { %4097 = vmatprep.subr.bf16.mxu0 %v4552_v6  ;;  %v5190_v13 = vsel %vm4694_vm2, 0, %v493_v60  ;;  %v763_v3 = vor.u32 %v762_v15, %v758_v53  ;;  %v1299_v60 = vrot.slane %v5059_v31, 1  ;;  %v4584_v53 = vld [vmem:[%s5739_s1] ss:$0 sm:$0xff]  ;;  %v4551_v46 = vld [vmem:[%s5741_s3 + $0x90] sm:$0xff]  }
  0x6c   : > { %v770_v32 = vshrl.u32 %v5190_v13, 16  ;;  %v772_v62 = vshll.u32 %v5190_v13, 16  ;;  %v293_v15 = vmul.f32 %v4584_v53, %v254_v18  ;;  %v294_v4 = vmul.f32 %v4584_v53, %v255_v30 }
  0x6d   : > { %4066 = vmatmul.mubr.bf16.gmra.mrb[12].mxu0 %v5173_v5  ;;  %v5210_v51 = vsel %vm588_vm3, %v763_v3, %v767_v37  ;;  %v5219_v18 = vsel %vm1264_vm4, %v1298_v54, %v1299_v60  ;;  %v4549_v3 = vld [vmem:[%s5741_s3 + $0x88] sm:$0xff]   ;;  %v1310_v60 = vrot.slane %v5190_v13, 1  ;;  %v1311_v53 = vrot.slane %v5178_v12, 1 }
  0x6e   : > { %4069 = vmatprep.mubr.bf16.mxu0 %v5181_v41  ;;  %4098 = vmatpush3.bf16.msra.mxu0 %v4552_v6  ;;  %v774_v40 = vrot.slane %v772_v62, 1  ;;  %v779_v6 = vrot.slane %v777_v1, 1  ;;  %v332_v61 = vadd.f32 %v5129_v22, %v293_v15  ;;  %v333_v31 = vadd.f32 %v5129_v22, %v294_v4 }
  0x6f   : > { %4099 = vmatprep.subr.bf16.mxu0 %v4554_v9  ;;  %3841 = vmatprep.mubr.bf16.mxu1 %v5210_v51  ;;  %v1301_v22 = vrot.slane %v5104_v42, 1  ;;  %v1302_v4 = vrot.slane %v5092_v33, 1  ;;  %v1308_v33 = vrot.slane %v5157_v27, 1  ;;  %v4553_v27 = vld [vmem:[%s5741_s3 + $0x98] sm:$0xff]  }
  0x70   : > { %v775_v56 = vor.u32 %v774_v40, %v770_v32  ;;  %v364_v0 = vmax.f32 %v332_v61, 0.0  ;;  %v365_v1 = vmax.f32 %v333_v31, 0.0  ;;  %v1304_v61 = vrot.slane %v5141_v43, 1 }
  0x71   : > { %v5234_v30 = vsel %vm1264_vm4, %v1301_v22, %v1302_v4  ;;  %v4557_v22 = vld [vmem:[%s5741_s3 + $0xa8] sm:$0xff]   ;;  %v4559_v4 = vld [vmem:[%s5741_s3 + $0xb0] sm:$0xff]  }
  0x72   : > { %4100 = vmatpush3.bf16.msra.mxu0 %v4554_v9  ;;  %v5223_v37 = vsel %vm588_vm3, %v775_v56, %v779_v6  ;;  %v381_v9 = vpack.c.bf16 %v365_v1, %v364_v0  ;;  %v5240_v35 = vsel %vm1264_vm4, %v1304_v61, %v1305_v17  ;;  %v1307_v0 = vrot.slane %v5165_v44, 1  ;;  %v4561_v61 = vld [vmem:[%s5741_s3 + $0xb8] sm:$0xff]   ;;  %v4560_v17 = vld [vmem:[%s5741_s3 + $0x1d0] sm:$0xff]  }
  0x73   : > { %4133 = vmatprep.subr.bf16.mxu0 %v5202_v52  ;;  %3842 = vmatmul.mubr.bf16.gmra.mrb[28].mxu1 %v5223_v37  ;;  %v5269_v6 = vsel %vm1264_vm4, %v1310_v60, %v1311_v53  ;;  %v4567_v53 = vld [vmem:[%s5741_s3 + $0xd0] sm:$0xff]  }
  0x74   : > { %3861 = vmatprep.mubr.bf16.mxu1 %v4710_v19  ;;  %v495_v56 = vshrl.u32 %v381_v9, 16  ;;  %v498_v62 = vshll.u32 %v381_v9, 16  ;;  %v4558_v9 = vld [vmem:[%s5741_s3 + $0x1c8] sm:$0xff]  }
  0x75   : > { %4070 = vmatmul.mubr.bf16.gmra.mrb[16].mxu0 %v5215_v59 }
  0x76   : > { %4073 = vmatprep.mubr.bf16.mxu0 %v5219_v18  ;;  %v497_v32 = vrot.slane %v495_v56, 7  ;;  %v4563_v56 = vld [vmem:[%s5741_s3 + $0xc0] sm:$0xff]  }
  0x78   : > { %v500_v54 = vor.u32 %v498_v62, %v497_v32  ;;  %v5266_v40 = vsel %vm4694_vm2, %v497_v32, 0  ;;  %v4566_v32 = vld [vmem:[%s5741_s3 + $0x1e8] sm:$0xff]   ;;  %v4568_v62 = vld [vmem:[%s5741_s3 + $0x1f0] sm:$0xff]  }
  0x79   : > { %v2119_v31 = vrot.slane %v5266_v40, 1 }
  0x7a   : > { %v5262_v15 = vsel %vm4694_vm2, 0, %v500_v54  ;;  %v4572_v54 = vld [vmem:[%s5741_s3 + $0x200] sm:$0xff]  }
  0x7b   : > { %3862 = vmatmul.mubr.bf16.vlgmr.msra.gmra.mrb[0].mxu1 %v4779_v23  ;;  %v2118_v12 = vrot.slane %v5262_v15, 1 }
  0x7c   : > { %3894 = vmatpush3.bf16.msra.mxu1 %v4977_v28  ;;  %3865 = vmatprep.mubr.bf16.mxu1 %v4792_v36  ;;  %v5255_v28 = vsel %vm1264_vm4, %v1307_v0, %v1308_v33  ;;  %v4570_v0 = vld [vmem:[%s5741_s3 + $0x1f8] sm:$0xff]   ;;  %v1265_v33 = vrot.slane %v4710_v19, 1 }
  0x7d   : > { %4074 = vmatmul.mubr.bf16.gmra.mrb[20].mxu0 %v5234_v30  ;;  %3895 = vmatprep.subr.bf16.mxu1 %v4549_v3  ;;  %v5281_v1 = vsel %vm1264_vm4, %v2118_v12, %v2119_v31  ;;  %v4573_v12 = vld [vmem:[%s5741_s3 + $0xe8] sm:$0xff]   ;;  %v4575_v31 = vld [vmem:[%s5741_s3 + $0xf0] sm:$0xff]  }
  0x7e   : > { %4077 = vmatprep.mubr.bf16.mxu0 %v5240_v35 }
  0x80   : > { %3896 = vmatpush3.bf16.msra.mxu1 %v4549_v3  ;;  %v4562_v3 = vld [vmem:[%s5741_s3 + $0x1d8] sm:$0xff]  }
  0x81   : > { %3897 = vmatprep.subr.bf16.mxu1 %v4551_v46 }
  0x83   : > { %3866 = vmatmul.mubr.bf16.gmra.mrb[4].mxu1 %v4808_v50 }
  0x84   : > { %3869 = vmatprep.mubr.bf16.mxu1 %v4832_v8  ;;  %3898 = vmatpush3.bf16.msra.mxu1 %v4551_v46  ;;  %v1266_v46 = vrot.slane %v4714_v20, 1  ;;  %v4565_v20 = vld [vmem:[%s5741_s3 + $0xc8] sm:$0xff]  }
  0x85   : > { %4078 = vmatmul.mubr.bf16.gmra.mrb[24].mxu0 %v5255_v28  ;;  %3899 = vmatprep.subr.bf16.mxu1 %v4553_v27 }
  0x86   : > { %4081 = vmatprep.mubr.bf16.mxu0 %v5269_v6  ;;  %v5343_v60 = vsel %vm1264_vm4, %v1265_v33, %v1266_v46  ;;  %v4589_v33 = vld [vmem:[%s5741_s3 + $0x120] sm:$0xff]   ;;  %v4591_v46 = vld [vmem:[%s5741_s3 + $0x130] sm:$0xff]  }
  0x88   : > { %3900 = vmatpush3.bf16.msra.mxu1 %v4553_v27  ;;  %v4569_v27 = vld [vmem:[%s5741_s3 + $0xd8] sm:$0xff]  }
  0x89   : > { %3901 = vmatprep.subr.bf16.mxu1 %v4555_v16 }
  0x8b   : > { %3870 = vmatmul.mubr.bf16.gmra.mrb[8].mxu1 %v4870_v45 }
  0x8c   : > { %3873 = vmatprep.mubr.bf16.mxu1 %v4917_v34  ;;  %3902 = vmatpush3.bf16.msra.mxu1 %v4555_v16  ;;  %v4574_v16 = vld [vmem:[%s5741_s3 + $0x208] sm:$0xff]  }
  0x8d   : > { %4082 = vmatmul.mubr.bf16.gmra.mrb[28].mxu0 %v5281_v1  ;;  %3903 = vmatprep.subr.bf16.mxu1 %v4557_v22 }
  0x8e   : > { %4101 = vmatprep.mubr.bf16.mxu0 %v4792_v36 }
  0x90   : > { %3904 = vmatpush3.bf16.msra.mxu1 %v4557_v22  ;;  %v4579_v22 = vld [vmem:[%s5741_s3 + $0x220] sm:$0xff]  }
  0x91   : > { %3905 = vmatprep.subr.bf16.mxu1 %v4559_v4 }
  0x93   : > { %3874 = vmatmul.mubr.bf16.gmra.mrb[12].mxu1 %v4933_v57 }
  0x94   : > { %3877 = vmatprep.mubr.bf16.mxu1 %v4963_v25  ;;  %3906 = vmatpush3.bf16.msra.mxu1 %v4559_v4  ;;  %v4582_v4 = vld [vmem:[%s5741_s3 + $0x238] sm:$0xff]  }
  0x95   : > { %4102 = vmatmul.mubr.bf16.vlgmr.msra.gmra.mrb[0].mxu0 %v4808_v50  ;;  %3907 = vmatprep.subr.bf16.mxu1 %v4561_v61 }
  0x96   : > { %4134 = vmatpush3.bf16.msra.mxu0 %v5202_v52  ;;  %4105 = vmatprep.mubr.bf16.mxu0 %v4832_v8  ;;  %v4564_v52 = vld [vmem:[%s5741_s3 + $0x1e0] sm:$0xff]  }
  0x97   : > { %4135 = vmatprep.subr.bf16.mxu0 %v4558_v9 }
  0x98   : > { %3908 = vmatpush3.bf16.msra.mxu1 %v4561_v61  ;;  %v5766_v61 = vld [vmem:[#allocation6_spill] sm:$0xff] }
  0x99   : > { %3941 = vmatprep.subr.bf16.mxu1 %v4563_v56 }
  0x9a   : > { %4136 = vmatpush3.bf16.msra.mxu0 %v4558_v9  ;;  %v5763_v9 = vld [vmem:[#allocation3_spill] sm:$0xff] }
  0x9b   : > { %4137 = vmatprep.subr.bf16.mxu0 %v4560_v17  ;;  %3878 = vmatmul.mubr.bf16.gmra.mrb[16].mxu1 %v5001_v10 }
  0x9c   : > { %3881 = vmatprep.mubr.bf16.mxu1 %v5037_v55 }
  0x9d   : > { %4106 = vmatmul.mubr.bf16.gmra.mrb[4].mxu0 %v4870_v45 }
  0x9e   : > { %4109 = vmatprep.mubr.bf16.mxu0 %v4917_v34  ;;  %4138 = vmatpush3.bf16.msra.mxu0 %v4560_v17  ;;  %v1848_v17 = vshll.u32 %v5262_v15, 16 }
  0x9f   : > { %4139 = vmatprep.subr.bf16.mxu0 %v4562_v3 }
  0xa2   : > { %4140 = vmatpush3.bf16.msra.mxu0 %v4562_v3  ;;  %v1850_v3 = vrot.slane %v1848_v17, 1 }
  0xa3   : > { %4141 = vmatprep.subr.bf16.mxu0 %v4564_v52  ;;  %3882 = vmatmul.mubr.bf16.gmra.mrb[20].mxu1 %v5076_v48 }
  0xa4   : > { %3885 = vmatprep.mubr.bf16.mxu1 %v5104_v42 }
  0xa5   : > { %4110 = vmatmul.mubr.bf16.gmra.mrb[8].mxu0 %v4933_v57 }
  0xa6   : > { %4113 = vmatprep.mubr.bf16.mxu0 %v4963_v25  ;;  %4142 = vmatpush3.bf16.msra.mxu0 %v4564_v52  ;;  %v1853_v52 = vshll.u32 %v5266_v40, 16  ;;  %v4587_v40 = vld [vmem:[%s5741_s3 + $0x110] sm:$0xff]  }
  0xa7   : > { %4143 = vmatprep.subr.bf16.mxu0 %v4566_v32 }
  0xaa   : > { %4144 = vmatpush3.bf16.msra.mxu0 %v4566_v32  ;;  %v5767_v32 = vld [vmem:[#allocation7_spill] sm:$0xff] }
  0xab   : > { %4145 = vmatprep.subr.bf16.mxu0 %v4568_v62  ;;  %3886 = vmatmul.mubr.bf16.gmra.mrb[24].mxu1 %v5141_v43 }
  0xac   : > { %3889 = vmatprep.mubr.bf16.mxu1 %v5165_v44 }
  0xad   : > { %4114 = vmatmul.mubr.bf16.gmra.mrb[12].mxu0 %v5001_v10 }
  0xae   : > { %4117 = vmatprep.mubr.bf16.mxu0 %v5037_v55  ;;  %4146 = vmatpush3.bf16.msra.mxu0 %v4568_v62 }
  0xaf   : > { %4147 = vmatprep.subr.bf16.mxu0 %v4570_v0 }
  0xb2   : > { %4148 = vmatpush3.bf16.msra.mxu0 %v4570_v0  ;;  %v1855_v0 = vrot.slane %v1853_v52, 1 }
  0xb3   : > { %4181 = vmatprep.subr.bf16.mxu0 %v4572_v54  ;;  %3890 = vmatmul.mubr.bf16.gmra.mrb[28].mxu1 %v5190_v13 }
  0xb4   : > { %3909 = vmatprep.mubr.bf16.mxu1 %v5343_v60 }
  0xb5   : > { %4118 = vmatmul.mubr.bf16.gmra.mrb[16].mxu0 %v5076_v48 }
  0xb6   : > { %4121 = vmatprep.mubr.bf16.mxu0 %v5104_v42 }
  0xbb   : > { %3910 = vmatmul.mubr.bf16.vlgmr.msra.gmra.mrb[0].mxu1 %v4936_v58  ;;  %v4571_v58 = vld [vmem:[%s5741_s3 + $0xe0] sm:$0xff]  }
  0xbc   : > { %3942 = vmatpush3.bf16.msra.mxu1 %v4563_v56  ;;  %3913 = vmatprep.mubr.bf16.mxu1 %v5006_v2  ;;  %v1846_v56 = vshrl.u32 %v5262_v15, 16 }
  0xbd   : > { %4122 = vmatmul.mubr.bf16.gmra.mrb[20].mxu0 %v5141_v43  ;;  %3943 = vmatprep.subr.bf16.mxu1 %v4565_v20 }
  0xbe   : > { %4125 = vmatprep.mubr.bf16.mxu0 %v5165_v44  ;;  %v1851_v62 = vor.u32 %v1850_v3, %v1846_v56 }
  0xc0   : > { %3944 = vmatpush3.bf16.msra.mxu1 %v4565_v20 }
  0xc1   : > { %3945 = vmatprep.subr.bf16.mxu1 %v4567_v53 }
  0xc3   : > { %3914 = vmatmul.mubr.bf16.gmra.mrb[4].mxu1 %v5019_v63 }
  0xc4   : > { %3917 = vmatprep.mubr.bf16.mxu1 %v5052_v24  ;;  %3946 = vmatpush3.bf16.msra.mxu1 %v4567_v53 }
  0xc5   : > { %4126 = vmatmul.mubr.bf16.gmra.mrb[24].mxu0 %v5190_v13  ;;  %3947 = vmatprep.subr.bf16.mxu1 %v4569_v27 }
  0xc6   : > { %4129 = vmatprep.mubr.bf16.mxu0 %v5262_v15 }
  0xc8   : > { %3948 = vmatpush3.bf16.msra.mxu1 %v4569_v27 }
  0xc9   : > { %3949 = vmatprep.subr.bf16.mxu1 %v4571_v58 }
  0xcb   : > { %3918 = vmatmul.mubr.bf16.gmra.mrb[8].mxu1 %v5070_v38 }
  0xcc   : > { %3921 = vmatprep.mubr.bf16.mxu1 %v5120_v39  ;;  %3950 = vmatpush3.bf16.msra.mxu1 %v4571_v58 }
  0xcd   : > { %4130 = vmatmul.mubr.bf16.gmra.mrb[28].mxu0 %v4710_v19  ;;  %3951 = vmatprep.subr.bf16.mxu1 %v4573_v12  ;;  %v4577_v19 = vld [vmem:[%s5741_s3 + $0xf8] sm:$0xff]  }
  0xce   : > { %4149 = vmatprep.mubr.bf16.mxu0 %v4828_v7  ;;  %v4576_v7 = vld [vmem:[%s5741_s3 + $0x210] sm:$0xff]  }
  0xd0   : > { %3952 = vmatpush3.bf16.msra.mxu1 %v4573_v12 }
  0xd1   : > { %3953 = vmatprep.subr.bf16.mxu1 %v4575_v31 }
  0xd3   : > { %3922 = vmatmul.mubr.bf16.gmra.mrb[12].mxu1 %v5137_v21 }
  0xd4   : > { %3925 = vmatprep.mubr.bf16.mxu1 %v5173_v5  ;;  %3954 = vmatpush3.bf16.msra.mxu1 %v4575_v31 }
  0xd5   : > { %4150 = vmatmul.mubr.bf16.vlgmr.msra.gmra.mrb[0].mxu0 %v4848_v29  ;;  %3955 = vmatprep.subr.bf16.mxu1 %v4577_v19  ;;  %v4578_v29 = vld [vmem:[%s5741_s3 + $0x218] sm:$0xff]  }
  0xd6   : > { %4182 = vmatpush3.bf16.msra.mxu0 %v4572_v54  ;;  %4153 = vmatprep.mubr.bf16.mxu0 %v4874_v49  ;;  %v4585_v49 = vld [vmem:[%s5741_s3 + $0x100] sm:$0xff]  }
  0xd7   : > { %4183 = vmatprep.subr.bf16.mxu0 %v4574_v16 }
  0xd8   : > { %3956 = vmatpush3.bf16.msra.mxu1 %v4577_v19 }
  0xd9   : > { %4229 = vmatprep.subr.bf16.mxu1 %v4585_v49 }
  0xda   : > { %4184 = vmatpush3.bf16.msra.mxu0 %v4574_v16 }
  0xdb   : > { %4185 = vmatprep.subr.bf16.mxu0 %v4576_v7  ;;  %3926 = vmatmul.mubr.bf16.gmra.mrb[16].mxu1 %v5181_v41 }
  0xdc   : > { %3929 = vmatprep.mubr.bf16.mxu1 %v5215_v59 }
  0xdd   : > { %4154 = vmatmul.mubr.bf16.gmra.mrb[4].mxu0 %v4902_v26  ;;  %v4580_v26 = vld [vmem:[%s5741_s3 + $0x228] sm:$0xff]  }
  0xde   : > { %4157 = vmatprep.mubr.bf16.mxu0 %v4951_v11  ;;  %4186 = vmatpush3.bf16.msra.mxu0 %v4576_v7  ;;  %v4581_v11 = vld [vmem:[%s5741_s3 + $0x230] sm:$0xff]  }
  0xdf   : > { %4187 = vmatprep.subr.bf16.mxu0 %v4578_v29 }
  0xe2   : > { %4188 = vmatpush3.bf16.msra.mxu0 %v4578_v29 }
  0xe3   : > { %4189 = vmatprep.subr.bf16.mxu0 %v4579_v22  ;;  %3930 = vmatmul.mubr.bf16.gmra.mrb[20].mxu1 %v5219_v18 }
  0xe4   : > { %3933 = vmatprep.mubr.bf16.mxu1 %v5234_v30 }
  0xe5   : > { %4158 = vmatmul.mubr.bf16.gmra.mrb[8].mxu0 %v4980_v47  ;;  %v5764_v47 = vld [vmem:[#allocation4_spill] sm:$0xff] }
  0xe6   : > { %4161 = vmatprep.mubr.bf16.mxu0 %v5010_v14  ;;  %4190 = vmatpush3.bf16.msra.mxu0 %v4579_v22  ;;  %v5765_v14 = vld [vmem:[#allocation5_spill] sm:$0xff] }
  0xe7   : > { %4191 = vmatprep.subr.bf16.mxu0 %v4580_v26 }
  0xea   : > { %4192 = vmatpush3.bf16.msra.mxu0 %v4580_v26 }
  0xeb   : > { %4193 = vmatprep.subr.bf16.mxu0 %v4581_v11  ;;  %3934 = vmatmul.mubr.bf16.gmra.mrb[24].mxu1 %v5240_v35 }
  0xec   : > { %3937 = vmatprep.mubr.bf16.mxu1 %v5255_v28 }
  0xed   : > { %4162 = vmatmul.mubr.bf16.gmra.mrb[12].mxu0 %v5763_v9 }
  0xee   : > { %4165 = vmatprep.mubr.bf16.mxu0 %v5764_v47  ;;  %4194 = vmatpush3.bf16.msra.mxu0 %v4581_v11 }
  0xef   : > { %4195 = vmatprep.subr.bf16.mxu0 %v4582_v4 }
  0xf2   : > { %4196 = vmatpush3.bf16.msra.mxu0 %v4582_v4 }
  0xf3   : > { %3938 = vmatmul.mubr.bf16.gmra.mrb[28].mxu1 %v5269_v6 }
  0xf4   : > { %3957 = vmatprep.mubr.bf16.mxu1 %v4779_v23  ;;  %v4586_v23 = vld [vmem:[%s5741_s3 + $0x108] sm:$0xff]  }
  0xf5   : > { %4166 = vmatmul.mubr.bf16.gmra.mrb[16].mxu0 %v5765_v14 }
  0xf6   : > { %4169 = vmatprep.mubr.bf16.mxu0 %v5766_v61 }
  0xfb   : > { %3958 = vmatmul.mubr.bf16.vlgmr.msra.gmra.mrb[0].mxu1 %v4792_v36  ;;  %v1856_v36 = vsel %vm588_vm3, %v1851_v62, %v1855_v0 }
  0xfc   : > { %4237 = vmatpush3.bf16.msra.mxu1 %v4585_v49  ;;  %3961 = vmatprep.mubr.bf16.mxu1 %v4808_v50  ;;  %v4588_v50 = vld [vmem:[%s5741_s3 + $0x118] sm:$0xff]  }
  0xfd   : > { %4170 = vmatmul.mubr.bf16.gmra.mrb[20].mxu0 %v5767_v32  ;;  %4230 = vmatprep.subr.bf16.mxu1 %v4586_v23 }
  0xfe   : > { %4173 = vmatprep.mubr.bf16.mxu0 %v5210_v51 }
 0x100   : > { %4238 = vmatpush3.bf16.msra.mxu1 %v4586_v23 }
 0x101   : > { %4231 = vmatprep.subr.bf16.mxu1 %v4587_v40 }
 0x103   : > { %3962 = vmatmul.mubr.bf16.gmra.mrb[4].mxu1 %v4832_v8  ;;  %v5768_v8 = vld [vmem:[#allocation2_spill] sm:$0xff] }
 0x104   : > { %3965 = vmatprep.mubr.bf16.mxu1 %v4870_v45  ;;  %4239 = vmatpush3.bf16.msra.mxu1 %v4587_v40  ;;  %v4590_v45 = vld [vmem:[%s5741_s3 + $0x128] sm:$0xff]  }
 0x105   : > { %4174 = vmatmul.mubr.bf16.gmra.mrb[24].mxu0 %v5223_v37  ;;  %4232 = vmatprep.subr.bf16.mxu1 %v4588_v50 }
 0x106   : > { %4177 = vmatprep.mubr.bf16.mxu0 %v1856_v36 }
 0x108   : > { %4240 = vmatpush3.bf16.msra.mxu1 %v4588_v50 }
 0x109   : > { %4233 = vmatprep.subr.bf16.mxu1 %v4589_v33 }
 0x10b   : > { %3966 = vmatmul.mubr.bf16.gmra.mrb[8].mxu1 %v4917_v34  ;;  %v4592_v34 = vld [vmem:[%s5741_s3 + $0x138] sm:$0xff]  }
 0x10c   : > { %3969 = vmatprep.mubr.bf16.mxu1 %v4933_v57  ;;  %4241 = vmatpush3.bf16.msra.mxu1 %v4589_v33 }
 0x10d   : > { %4178 = vmatmul.mubr.bf16.gmra.mrb[28].mxu0 %v5768_v8  ;;  %4234 = vmatprep.subr.bf16.mxu1 %v4590_v45 }
 0x10e   : > { %4197 = vmatprep.mubr.bf16.mxu0 %v5006_v2 }
 0x110   : > { %4242 = vmatpush3.bf16.msra.mxu1 %v4590_v45 }
 0x111   : > { %4235 = vmatprep.subr.bf16.mxu1 %v4591_v46 }
 0x113   : > { %3970 = vmatmul.mubr.bf16.gmra.mrb[12].mxu1 %v4963_v25 }
 0x114   : > { %3973 = vmatprep.mubr.bf16.mxu1 %v5001_v10  ;;  %4243 = vmatpush3.bf16.msra.mxu1 %v4591_v46 }
 0x115   : > { %4198 = vmatmul.mubr.bf16.vlgmr.msra.gmra.mrb[0].mxu0 %v5019_v63  ;;  %4236 = vmatprep.subr.bf16.mxu1 %v4592_v34 }
 0x116   : > { %4201 = vmatprep.mubr.bf16.mxu0 %v5052_v24 }
 0x118   : > { %4244 = vmatpush3.bf16.msra.mxu1 %v4592_v34 }
 0x11b   : > { %3974 = vmatmul.mubr.bf16.gmra.mrb[16].mxu1 %v5037_v55 }
 0x11c   : > { %3977 = vmatprep.mubr.bf16.mxu1 %v5076_v48 }
 0x11d   : > { %4202 = vmatmul.mubr.bf16.gmra.mrb[4].mxu0 %v5070_v38 }
 0x11e   : > { %4205 = vmatprep.mubr.bf16.mxu0 %v5120_v39 }
 0x123   : > { %3978 = vmatmul.mubr.bf16.gmra.mrb[20].mxu1 %v5104_v42 }
 0x124   : > { %3981 = vmatprep.mubr.bf16.mxu1 %v5141_v43 }
 0x125   : > { %4206 = vmatmul.mubr.bf16.gmra.mrb[8].mxu0 %v5137_v21 }
 0x126   : > { %4209 = vmatprep.mubr.bf16.mxu0 %v5173_v5 }
 0x12b   : > { %3982 = vmatmul.mubr.bf16.gmra.mrb[24].mxu1 %v5165_v44 }
 0x12c   : > { %3985 = vmatprep.mubr.bf16.mxu1 %v5190_v13 }
 0x12d   : > { %4210 = vmatmul.mubr.bf16.gmra.mrb[12].mxu0 %v5181_v41 }
 0x12e   : > { %4213 = vmatprep.mubr.bf16.mxu0 %v5215_v59 }
 0x133   : > { %3986 = vmatmul.mubr.bf16.gmra.mrb[28].mxu1 %v5262_v15 }
 0x134   : > { %4021 = vmatprep.mubr.bf16.mxu1 %v5763_v9 }
 0x135   : > { %4214 = vmatmul.mubr.bf16.gmra.mrb[16].mxu0 %v5219_v18 }
 0x136   : > { %4217 = vmatprep.mubr.bf16.mxu0 %v5234_v30 }
 0x13b   : > { %4022 = vmatmul.mubr.bf16.vlgmr.msra.gmra.mrb[16].mxu1 %v5764_v47 }
 0x13c   : > { %4025 = vmatprep.mubr.bf16.mxu1 %v5765_v14 }
 0x13d   : > { %4218 = vmatmul.mubr.bf16.gmra.mrb[20].mxu0 %v5240_v35 }
 0x13e   : > { %4221 = vmatprep.mubr.bf16.mxu0 %v5255_v28 }
 0x143   : > { %4026 = vmatmul.mubr.bf16.gmra.mrb[20].mxu1 %v5766_v61 }
 0x144   : > { %4029 = vmatprep.mubr.bf16.mxu1 %v5767_v32 }
 0x145   : > { %4222 = vmatmul.mubr.bf16.gmra.mrb[24].mxu0 %v5269_v6 }
 0x146   : > { %4225 = vmatprep.mubr.bf16.mxu0 %v5281_v1 }
 0x14b   : > { %4030 = vmatmul.mubr.bf16.gmra.mrb[24].mxu1 %v5210_v51 }
 0x14c   : > { %4033 = vmatprep.mubr.bf16.mxu1 %v5223_v37 }
 0x14d   : > { %4226 = vmatmul.mubr.bf16.gmra.mrb[28].mxu0 %v5343_v60 }
 0x153   : > { %4034 = vmatmul.mubr.bf16.gmra.mrb[28].mxu1 %v1856_v36 }
 0x1ce   : > { %v3959_v57 = vpop.f32.mrb[0].mxu1 }
 0x1cf   : > { %v1686_v25 = vpop.f32.mrb[1].mxu1 }
 0x1d0   : > { %v3960_v10 = vpop.f32.mrb[2].mxu1 }
 0x1d1   : > { %v1689_v2 = vpop.f32.mrb[3].mxu1 }
 0x1d6   : > { %v3963_v63 = vpop.f32.mrb[4].mxu1 }
 0x1d7   : > { %v1702_v55 = vpop.f32.mrb[5].mxu1 }
 0x1d8   : > { %v3964_v24 = vpop.f32.mrb[6].mxu1 }
 0x1d9   : > { %v1705_v38 = vpop.f32.mrb[7].mxu1 }
 0x1de   : > { %v3967_v48 = vpop.f32.mrb[8].mxu1 }
 0x1df   : > { %v1718_v59 = vpop.f32.mrb[9].mxu1 }
 0x1e0   : > { %v3968_v42 = vpop.f32.mrb[10].mxu1 }
 0x1e1   : > { %v1721_v39 = vpop.f32.mrb[11].mxu1 }
 0x1e6   : > { %v3971_v21 = vpop.f32.mrb[12].mxu1 }
 0x1e7   : > { %v1734_v43 = vpop.f32.mrb[13].mxu1 }
 0x1e8   : > { %v4199_v51 = vpop.f32.mrb[0].mxu0  ;;  %v3972_v41 = vpop.f32.mrb[14].mxu1 }
 0x1e9   : > { %v5500_v44 = vadd.f32 %v4199_v51, %v3959_v57  ;;  %v2995_v5 = vpop.f32.mrb[1].mxu0  ;;  %v1737_v37 = vpop.f32.mrb[15].mxu1 }
 0x1ea   : > { %v5502_v13 = vadd.f32 %v2995_v5, %v1686_v25  ;;  %v4200_v18 = vpop.f32.mrb[2].mxu0 }
 0x1eb   : > { %3156 = vst [vmem:[%s5498_s28 + $0x10] sm:$0xff] %v5500_v44  ;;  %v5506_v30 = vadd.f32 %v4200_v18, %v3960_v10  ;;  %v2998_v35 = vpop.f32.mrb[3].mxu0 }
 0x1ec   : > { %3154 = vst [vmem:[%s5498_s28] sm:$0xff] %v5502_v13  ;;  %v5510_v28 = vadd.f32 %v2998_v35, %v1689_v2 }
 0x1ed   : > { %3157 = vst [vmem:[%s5498_s28 + $0x18] sm:$0xff] %v5506_v30 }
 0x1ee   : > { %3155 = vst [vmem:[%s5498_s28 + $0x8] sm:$0xff] %v5510_v28 }
 0x1f0   : > { %v4203_v15 = vpop.f32.mrb[4].mxu0 }
 0x1f1   : > { %v5516_v6 = vadd.f32 %v4203_v15, %v3963_v63  ;;  %v3011_v1 = vpop.f32.mrb[5].mxu0 }
 0x1f2   : > { %v5518_v54 = vadd.f32 %v3011_v1, %v1702_v55  ;;  %v4204_v60 = vpop.f32.mrb[6].mxu0 }
 0x1f3   : > { %3160 = vst [vmem:[%s5498_s28 + $0x30] sm:$0xff] %v5516_v6  ;;  %v5522_v20 = vadd.f32 %v4204_v60, %v3964_v24  ;;  %v3014_v53 = vpop.f32.mrb[7].mxu0 }
 0x1f4   : > { %3158 = vst [vmem:[%s5498_s28 + $0x20] sm:$0xff] %v5518_v54  ;;  %v5526_v27 = vadd.f32 %v3014_v53, %v1705_v38 }
 0x1f5   : > { %3161 = vst [vmem:[%s5498_s28 + $0x38] sm:$0xff] %v5522_v20 }
 0x1f6   : > { %3159 = vst [vmem:[%s5498_s28 + $0x28] sm:$0xff] %v5526_v27 }
 0x1f8   : > { %v4207_v58 = vpop.f32.mrb[8].mxu0 }
 0x1f9   : > { %v5532_v12 = vadd.f32 %v4207_v58, %v3967_v48  ;;  %v3027_v31 = vpop.f32.mrb[9].mxu0 }
 0x1fa   : > { %v5534_v16 = vadd.f32 %v3027_v31, %v1718_v59  ;;  %v4208_v19 = vpop.f32.mrb[10].mxu0 }
 0x1fb   : > { %3164 = vst [vmem:[%s5498_s28 + $0x50] sm:$0xff] %v5532_v12  ;;  %v5538_v7 = vadd.f32 %v4208_v19, %v3968_v42  ;;  %v3030_v29 = vpop.f32.mrb[11].mxu0 }
 0x1fc   : > { %3162 = vst [vmem:[%s5498_s28 + $0x40] sm:$0xff] %v5534_v16  ;;  %v5542_v49 = vadd.f32 %v3030_v29, %v1721_v39 }
 0x1fd   : > { %3165 = vst [vmem:[%s5498_s28 + $0x58] sm:$0xff] %v5538_v7 }
 0x1fe   : > { %3163 = vst [vmem:[%s5498_s28 + $0x48] sm:$0xff] %v5542_v49 }
 0x200   : > { %v4211_v22 = vpop.f32.mrb[12].mxu0 }
 0x201   : > { %v5548_v26 = vadd.f32 %v4211_v22, %v3971_v21  ;;  %v3043_v11 = vpop.f32.mrb[13].mxu0 }
 0x202   : > { %v5550_v4 = vadd.f32 %v3043_v11, %v1734_v43  ;;  %v4212_v9 = vpop.f32.mrb[14].mxu0 }
 0x203   : > { %3168 = vst [vmem:[%s5498_s28 + $0x70] sm:$0xff] %v5548_v26  ;;  %v5554_v47 = vadd.f32 %v4212_v9, %v3972_v41  ;;  %v3046_v14 = vpop.f32.mrb[15].mxu0 }
 0x204   : > { %3166 = vst [vmem:[%s5498_s28 + $0x60] sm:$0xff] %v5550_v4  ;;  %v5558_v61 = vadd.f32 %v3046_v14, %v1737_v37 }
 0x205   : > { %3169 = vst [vmem:[%s5498_s28 + $0x78] sm:$0xff] %v5554_v47 }
 0x206   : > { %3167 = vst [vmem:[%s5498_s28 + $0x68] sm:$0xff] %v5558_v61 }
 0x208   : > { %v4215_v17 = vpop.f32.mrb[16].mxu0 }
 0x209   : > { %v3059_v56 = vpop.f32.mrb[17].mxu0 }
 0x20a   : > { %v4216_v3 = vpop.f32.mrb[18].mxu0 }
 0x20b   : > { %v3062_v52 = vpop.f32.mrb[19].mxu0 }
 0x20e   : > { %v4023_v32 = vpop.f32.mrb[16].mxu1 }
 0x20f   : > { %v5564_v62 = vadd.f32 %v4215_v17, %v4023_v32  ;;  %v2021_v0 = vpop.f32.mrb[17].mxu1  ;;  %v4602_v17 = vmov (!%p3576_p4), 0.0  }
 0x210   : > { %v4219_v23 = vpop.f32.mrb[20].mxu0  ;;  %v5566_v36 = vadd.f32 %v3059_v56, %v2021_v0  ;;  %v4024_v50 = vpop.f32.mrb[18].mxu1  ;;  %3190 = vst [vmem:[%s5743_s5] sm:$0xff] (!%p3576_p4), %v4602_v17 }
 0x211   : > { %v3075_v40 = vpop.f32.mrb[21].mxu0  ;;  %3172 = vst [vmem:[%s5498_s28 + $0x90] sm:$0xff] %v5564_v62  ;;  %v5570_v8 = vadd.f32 %v4216_v3, %v4024_v50  ;;  %v2024_v45 = vpop.f32.mrb[19].mxu1 }
 0x212   : > { %v4220_v33 = vpop.f32.mrb[22].mxu0  ;;  %3170 = vst [vmem:[%s5498_s28 + $0x80] sm:$0xff] %v5566_v36  ;;  %v5574_v34 = vadd.f32 %v3062_v52, %v2024_v45 }
 0x213   : > { %v3078_v46 = vpop.f32.mrb[23].mxu0  ;;  %3173 = vst [vmem:[%s5498_s28 + $0x98] sm:$0xff] %v5570_v8 }
 0x214   : > { %3171 = vst [vmem:[%s5498_s28 + $0x88] sm:$0xff] %v5574_v34 }
 0x216   : > { %v4027_v57 = vpop.f32.mrb[20].mxu1 }
 0x217   : > { %v5580_v10 = vadd.f32 %v4219_v23, %v4027_v57  ;;  %v2037_v2 = vpop.f32.mrb[21].mxu1 }
 0x218   : > { %v4223_v25 = vpop.f32.mrb[24].mxu0  ;;  %v5582_v55 = vadd.f32 %v3075_v40, %v2037_v2  ;;  %v4028_v24 = vpop.f32.mrb[22].mxu1 }
 0x219   : > { %v3091_v63 = vpop.f32.mrb[25].mxu0  ;;  %3176 = vst [vmem:[%s5498_s28 + $0xb0] sm:$0xff] %v5580_v10  ;;  %v5586_v48 = vadd.f32 %v4220_v33, %v4028_v24  ;;  %v2040_v59 = vpop.f32.mrb[23].mxu1 }
 0x21a   : > { %v4224_v38 = vpop.f32.mrb[26].mxu0  ;;  %3174 = vst [vmem:[%s5498_s28 + $0xa0] sm:$0xff] %v5582_v55  ;;  %v5590_v39 = vadd.f32 %v3078_v46, %v2040_v59 }
 0x21b   : > { %v3094_v42 = vpop.f32.mrb[27].mxu0  ;;  %3177 = vst [vmem:[%s5498_s28 + $0xb8] sm:$0xff] %v5586_v48 }
 0x21c   : > { %3175 = vst [vmem:[%s5498_s28 + $0xa8] sm:$0xff] %v5590_v39 }
 0x21e   : > { %v4031_v21 = vpop.f32.mrb[24].mxu1 }
 0x21f   : > { %v5596_v43 = vadd.f32 %v4223_v25, %v4031_v21  ;;  %v2053_v5 = vpop.f32.mrb[25].mxu1 }
 0x220   : > { %v4227_v51 = vpop.f32.mrb[28].mxu0  ;;  %v5598_v18 = vadd.f32 %v3091_v63, %v2053_v5  ;;  %v4032_v37 = vpop.f32.mrb[26].mxu1 }
 0x221   : > { %v3107_v41 = vpop.f32.mrb[29].mxu0  ;;  %3180 = vst [vmem:[%s5498_s28 + $0xd0] sm:$0xff] %v5596_v43  ;;  %v5602_v15 = vadd.f32 %v4224_v38, %v4032_v37  ;;  %v2056_v1 = vpop.f32.mrb[27].mxu1 }
 0x222   : > { %v4228_v35 = vpop.f32.mrb[30].mxu0  ;;  %3178 = vst [vmem:[%s5498_s28 + $0xc0] sm:$0xff] %v5598_v18  ;;  %v5606_v53 = vadd.f32 %v3094_v42, %v2056_v1 }
 0x223   : > { %v3110_v60 = vpop.f32.mrb[31].mxu0  ;;  %3181 = vst [vmem:[%s5498_s28 + $0xd8] sm:$0xff] %v5602_v15 }
 0x224   : > { %3179 = vst [vmem:[%s5498_s28 + $0xc8] sm:$0xff] %v5606_v53 }
 0x226   : > { %v4035_v58 = vpop.f32.mrb[28].mxu1  ;;  %3189 = sbr.rel (%p3576_p4) target bundleno = 557 (0x22d), region = 40 }
 0x227   : > { %v5612_v31 = vadd.f32 %v4227_v51, %v4035_v58  ;;  %v2069_v19 = vpop.f32.mrb[29].mxu1 }
 0x228   : > { %v5614_v29 = vadd.f32 %v3107_v41, %v2069_v19  ;;  %v4036_v22 = vpop.f32.mrb[30].mxu1 }
 0x229   : > { %3184 = vst [vmem:[%s5498_s28 + $0xf0] sm:$0xff] %v5612_v31  ;;  %v5618_v11 = vadd.f32 %v4228_v35, %v4036_v22  ;;  %v2072_v9 = vpop.f32.mrb[31].mxu1 }
 0x22a   : > { %3182 = vst [vmem:[%s5498_s28 + $0xe0] sm:$0xff] %v5614_v29  ;;  %v5622_v14 = vadd.f32 %v3110_v60, %v2072_v9 }
 0x22b   : > { %3185 = vst [vmem:[%s5498_s28 + $0xf8] sm:$0xff] %v5618_v11 }
 0x22c   : > { %3183 = vst [vmem:[%s5498_s28 + $0xe8] sm:$0xff] %v5622_v14 }
 0x22d PF: > { %v3192_v56 = vadd.f32 %v5510_v28, %v5502_v13  ;;  %v3229_v32 = vmul.f32 %v5502_v13, %v5502_v13  ;;  %v3230_v23 = vmul.f32 %v5510_v28, %v5510_v28  ;;  %v3231_v40 = vmul.f32 %v5500_v44, %v5500_v44 }
 0x22e   : > { %v3232_v33 = vmul.f32 %v5506_v30, %v5506_v30  ;;  %v3233_v57 = vmul.f32 %v5518_v54, %v5518_v54  ;;  %v3234_v28 = vmul.f32 %v5526_v27, %v5526_v27  ;;  %v3235_v63 = vmul.f32 %v5516_v6, %v5516_v6 }
 0x22f   : > { %v3193_v3 = vadd.f32 %v5500_v44, %v3192_v56  ;;  %v3261_v45 = vadd.f32 %v3230_v23, %v3229_v32  ;;  %v3236_v38 = vmul.f32 %v5522_v20, %v5522_v20  ;;  %v3237_v42 = vmul.f32 %v5534_v16, %v5534_v16 }
 0x230   : > { %v3238_v51 = vmul.f32 %v5542_v49, %v5542_v49  ;;  %v3239_v41 = vmul.f32 %v5532_v12, %v5532_v12  ;;  %v3240_v35 = vmul.f32 %v5538_v7, %v5538_v7  ;;  %v3241_v60 = vmul.f32 %v5550_v4, %v5550_v4 }
 0x231   : > { %v3194_v52 = vadd.f32 %v5506_v30, %v3193_v3  ;;  %v3262_v13 = vadd.f32 %v3261_v45, %v3231_v40  ;;  %v3242_v19 = vmul.f32 %v5558_v61, %v5558_v61  ;;  %v3243_v9 = vmul.f32 %v5548_v26, %v5548_v26 }
 0x232   : > { %v3244_v56 = vmul.f32 %v5554_v47, %v5554_v47  ;;  %v3246_v23 = vmul.f32 %v5574_v34, %v5574_v34  ;;  %v3247_v40 = vmul.f32 %v5564_v62, %v5564_v62  ;;  %vm3300_vm5 = vcmask 1041408  }
 0x233   : > { %v3195_v0 = vadd.f32 %v5518_v54, %v3194_v52  ;;  %v3263_v2 = vadd.f32 %v3262_v13, %v3232_v33  ;;  %v3245_v52 = vmul.f32 %v5566_v36, %v5566_v36  ;;  %v3248_v33 = vmul.f32 %v5570_v8, %v5570_v8 }
 0x234   : > { %v3250_v13 = vmul.f32 %v5590_v39, %v5590_v39 }
 0x235   : > { %v3196_v50 = vadd.f32 %v5526_v27, %v3195_v0  ;;  %v3264_v24 = vadd.f32 %v3263_v2, %v3233_v57 }
 0x237   : > { %v3197_v46 = vadd.f32 %v5516_v6, %v3196_v50  ;;  %v3265_v59 = vadd.f32 %v3264_v24, %v3234_v28  ;;  %v3251_v28 = vmul.f32 %v5580_v10, %v5580_v10  ;;  %v3253_v24 = vmul.f32 %v5598_v18, %v5598_v18 }
 0x239   : > { %v3198_v25 = vadd.f32 %v5522_v20, %v3197_v46  ;;  %v3266_v21 = vadd.f32 %v3265_v59, %v3235_v63  ;;  %v3249_v46 = vmul.f32 %v5582_v55, %v5582_v55 }
 0x23b   : > { %v3199_v44 = vadd.f32 %v5534_v16, %v3198_v25  ;;  %v3267_v5 = vadd.f32 %v3266_v21, %v3236_v38  ;;  %v3254_v38 = vmul.f32 %v5606_v53, %v5606_v53  ;;  %v3256_v21 = vmul.f32 %v5602_v15, %v5602_v15 }
 0x23d   : > { %v3200_v30 = vadd.f32 %v5542_v49, %v3199_v44  ;;  %v3268_v37 = vadd.f32 %v3267_v5, %v3237_v42  ;;  %v3252_v44 = vmul.f32 %v5586_v48, %v5586_v48 }
 0x23f   : > { %v3201_v54 = vadd.f32 %v5532_v12, %v3200_v30  ;;  %v3269_v1 = vadd.f32 %v3268_v37, %v3238_v51  ;;  %v3257_v51 = vmul.f32 %v5614_v29, %v5614_v29  ;;  %v3259_v37 = vmul.f32 %v5612_v31, %v5612_v31 }
 0x241   : > { %v3202_v27 = vadd.f32 %v5538_v7, %v3201_v54  ;;  %v3270_v58 = vadd.f32 %v3269_v1, %v3239_v41  ;;  %v3255_v54 = vmul.f32 %v5596_v43, %v5596_v43 }
 0x243   : > { %v3203_v6 = vadd.f32 %v5550_v4, %v3202_v27  ;;  %v3271_v22 = vadd.f32 %v3270_v58, %v3240_v35 }
 0x245   : > { %v3204_v20 = vadd.f32 %v5558_v61, %v3203_v6  ;;  %v3272_v17 = vadd.f32 %v3271_v22, %v3241_v60  ;;  %v3258_v6 = vmul.f32 %v5622_v14, %v5622_v14 }
 0x247   : > { %v3205_v16 = vadd.f32 %v5548_v26, %v3204_v20  ;;  %v3273_v3 = vadd.f32 %v3272_v17, %v3242_v19 }
 0x249   : > { %v3206_v49 = vadd.f32 %v5554_v47, %v3205_v16  ;;  %v3274_v32 = vadd.f32 %v3273_v3, %v3243_v9 }
 0x24b   : > { %v3207_v12 = vadd.f32 %v5566_v36, %v3206_v49  ;;  %v3275_v0 = vadd.f32 %v3274_v32, %v3244_v56 }
 0x24d   : > { %v3208_v7 = vadd.f32 %v5574_v34, %v3207_v12  ;;  %v3276_v50 = vadd.f32 %v3275_v0, %v3245_v52 }
 0x24f   : > { %v3209_v4 = vadd.f32 %v5564_v62, %v3208_v7  ;;  %v3277_v45 = vadd.f32 %v3276_v50, %v3246_v23 }
 0x251   : > { %v3210_v61 = vadd.f32 %v5570_v8, %v3209_v4  ;;  %v3278_v57 = vadd.f32 %v3277_v45, %v3247_v40 }
 0x253   : > { %v3211_v26 = vadd.f32 %v5582_v55, %v3210_v61  ;;  %v3279_v25 = vadd.f32 %v3278_v57, %v3248_v33 }
 0x255   : > { %v3212_v47 = vadd.f32 %v5590_v39, %v3211_v26  ;;  %v3280_v2 = vadd.f32 %v3279_v25, %v3249_v46 }
 0x257   : > { %v3213_v36 = vadd.f32 %v5580_v10, %v3212_v47  ;;  %v3281_v63 = vadd.f32 %v3280_v2, %v3250_v13 }
 0x259   : > { %v3214_v34 = vadd.f32 %v5586_v48, %v3213_v36  ;;  %v3282_v30 = vadd.f32 %v3281_v63, %v3251_v28 }
 0x25b   : > { %v3215_v62 = vadd.f32 %v5598_v18, %v3214_v34  ;;  %v3283_v59 = vadd.f32 %v3282_v30, %v3252_v44 }
 0x25d   : > { %v3216_v8 = vadd.f32 %v5606_v53, %v3215_v62  ;;  %v3284_v42 = vadd.f32 %v3283_v59, %v3253_v24 }
 0x25f   : > { %v3217_v55 = vadd.f32 %v5596_v43, %v3216_v8  ;;  %v3285_v27 = vadd.f32 %v3284_v42, %v3254_v38 }
 0x261   : > { %v3218_v39 = vadd.f32 %v5602_v15, %v3217_v55  ;;  %v3286_v5 = vadd.f32 %v3285_v27, %v3255_v54  ;;  %v3260_v15 = vmul.f32 %v5618_v11, %v5618_v11 }
 0x263   : > { %v3219_v10 = vadd.f32 %v5614_v29, %v3218_v39  ;;  %v3287_v41 = vadd.f32 %v3286_v5, %v3256_v21 }
 0x265   : > { %v3220_v48 = vadd.f32 %v5622_v14, %v3219_v10  ;;  %v3288_v20 = vadd.f32 %v3287_v41, %v3257_v51 }
 0x267   : > { %v3221_v18 = vadd.f32 %v5612_v31, %v3220_v48  ;;  %v3289_v1 = vadd.f32 %v3288_v20, %v3258_v6  ;;  %v3191_v31 = vld [vmem:[%s5743_s5] sm:$0xff] }
 0x269   : > { %v3222_v53 = vadd.f32 %v5618_v11, %v3221_v18  ;;  %v3290_v60 = vadd.f32 %v3289_v1, %v3259_v37 }
 0x26b   : > { %v3223_v43 = vrot.slane %v3222_v53, 4  ;;  %v3291_v29 = vadd.f32 %v3290_v60, %v3260_v15 }
 0x26d   : > { %v3224_v35 = vadd.f32 %v3223_v43, %v3222_v53  ;;  %v3292_v49 = vrot.slane %v3291_v29, 4 }
 0x26f   : > { %v3225_v16 = vrot.slane %v3224_v35, 2  ;;  %v3293_v19 = vadd.f32 %v3292_v49, %v3291_v29 }
 0x271   : > { %v3226_v58 = vadd.f32 %v3225_v16, %v3224_v35  ;;  %v3294_v12 = vrot.slane %v3293_v19, 2 }
 0x273   : > { %v3227_v22 = vrot.slane %v3226_v58, 1  ;;  %v3295_v14 = vadd.f32 %v3294_v12, %v3293_v19 }
 0x275   : > { %v3228_v9 = vadd.f32 %v3227_v22, %v3226_v58  ;;  %v3296_v17 = vrot.slane %v3295_v14, 1 }
 0x277   : > { %v3297_v7 = vadd.f32 %v3296_v17, %v3295_v14 }
 0x279   : > { %v3299_v11 = vsel %vm535_vm0, %v3228_v9, %v3297_v7 }
 0x27a   : > { %v3301_v56 = vsel %vm3300_vm5, %v3299_v11, 0.0 }
 0x27b   : > { %v3302_v3 = vadd.f32 %v3301_v56, %v3191_v31 }
 0x27d   : > { %3303 = vst [vmem:[%s5743_s5] sm:$0xff] %v3302_v3 }
 0x27e PF: > { %s16_s18 = sadd.s32 1, %s4599_s18  }
 0x27f   : > { %p13_p5 = scmp.ge.s32.totalorder %s16_s18, 6  }
 0x281   :  { %15 = sbr.rel (!%p13_p5) target bundleno = 1 (0x1), region = 86 }

</bundles_post_ra>
